<compile_context>
chip_gen: v6e
topology: v6e:2x2x1
jax: 0.10.0
libtpu: 0.0.40
codegen_flags: <defaults>
</compile_context>

<pallas_src>
import numpy as np
import jax
import jax.numpy as jnp
from jax.experimental import pallas as pl
from jax.experimental.pallas import tpu as pltpu

W = {'chamfer': 1.0, 'edge': 0.1, 'normal': 0.1, 'laplacian': 0.1, 'face': 0.1,
     'symmetry': 0.1, 'consistency': 0.5, 'penetration': 5.0, 'smooth': 0.1}

_VMEM = pl.BlockSpec(memory_space=pltpu.MemorySpace.VMEM)
_SMEM = pl.BlockSpec(memory_space=pltpu.MemorySpace.SMEM)

_BIG = 1e30  # sentinel distance for padded rows/columns


def _round_up(x, m):
    return ((x + m - 1) // m) * m


# --------------------- bidirectional / symmetric chamfer kernel ---------------------

def _make_chamfer_kernel(na, ta, tiles_per_core, symmetric):
    """Grid = (core_split, A tiles per core).  The homogeneous (8, nb_pad) B^T operand
    stays resident in VMEM; d2 = a8 @ bt8 already equals |a|^2 + |b|^2 - 2ab.
    Per-core partial results (row-min sum, column mins) accumulate in resident
    output blocks and are combined by the wrapper."""

    def kernel(a_ref, bt_ref, rowsum_ref, *maybe_colmin):
        c = pl.program_id(0)
        i = pl.program_id(1)
        tile = c * tiles_per_core + i

        # single MXU contraction: norms + cross term folded into K=8
        d2 = jnp.dot(a_ref[...], bt_ref[...], preferred_element_type=jnp.float32)

        row_ids = tile * ta + jax.lax.broadcasted_iota(jnp.int32, (ta, 1), 0)
        row_valid = row_ids < na                          # (ta, 1) - cheap mask only

        # a -> b direction: per-row min; padded B columns carry +1e30 so never win.
        # Clamp AFTER the reduction (ta elements, not ta*nb).
        row_min = jnp.maximum(jnp.min(d2, axis=1, keepdims=True), 0.0)
        partial = jnp.sum(jnp.where(row_valid, row_min, 0.0),
                          axis=0, keepdims=True)          # (1, 1)

        @pl.when(i == 0)
        def _():
            rowsum_ref[...] = jnp.zeros_like(rowsum_ref)

        rowsum_ref[...] += partial

        if not symmetric:
            (colmin_ref,) = maybe_colmin
            # b -> a direction: padded A rows carry +1e30 in their |a|^2 slot,
            # so no full-matrix where() is needed before the column min.
            col_min = jnp.min(d2, axis=0, keepdims=True)  # (1, nb_pad)

            @pl.when(i == 0)
            def _():
                colmin_ref[...] = jnp.full_like(colmin_ref, _BIG)

            colmin_ref[...] = jnp.minimum(colmin_ref[...], col_min)

    return kernel


def chamfer_distance(x, y, *, ta=256, symmetric=False, vmem_limit_bytes=None):
    """pytorch3d chamfer_distance (batch=1, squared L2, mean point reduction,
    summed over both directions) as a single pallas_call.

    symmetric=True: y must be an isometric image of x (same point count); only
    the x->y direction is computed and doubled (exactly equal for a symmetric
    distance matrix)."""
    x = x.astype(jnp.float32)
    y = y.astype(jnp.float32)
    na, nb = int(x.shape[0]), int(y.shape[0])

    # Mean-center both clouds by the SAME offset: pairwise differences (hence d2)
    # are unchanged, but the |a|^2+|b|^2-2ab expansion no longer cancels
    # catastrophically at SMPL-scale coordinates (+/-65+).
    center = 0.5 * (jnp.mean(x, axis=0) + jnp.mean(y, axis=0))
    x = x - center
    y = y - center

    n_split = 2 if na > ta else 1                    # v7x megacore split of the A-tile loop
    na_pad = _round_up(na, n_split * ta)
    nb_pad = _round_up(nb, 128)
    tiles_per_core = na_pad // (n_split * ta)

    # Homogeneous A rows: [x, y, z, |a|^2, 1, 0, 0, 0]; padded rows get |a|^2 = 1e30
    asq = jnp.sum(x * x, axis=1, keepdims=True)
    a8 = jnp.concatenate([
        jnp.pad(x, ((0, na_pad - na), (0, 0))),
        jnp.pad(asq, ((0, na_pad - na), (0, 0)), constant_values=_BIG),
        jnp.pad(jnp.ones((na, 1), jnp.float32), ((0, na_pad - na), (0, 0))),
        jnp.zeros((na_pad, 3), jnp.float32)], axis=1)              # (na_pad, 8)

    # Homogeneous B^T columns: [-2x, -2y, -2z, 1, |b|^2, 0, 0, 0]; padded cols get |b|^2 = 1e30
    bsq = jnp.sum(y * y, axis=1, keepdims=True)
    bt8 = jnp.concatenate([
        jnp.pad(-2.0 * y, ((0, nb_pad - nb), (0, 0))),
        jnp.pad(jnp.ones((nb, 1), jnp.float32), ((0, nb_pad - nb), (0, 0))),
        jnp.pad(bsq, ((0, nb_pad - nb), (0, 0)), constant_values=_BIG),
        jnp.zeros((nb_pad, 3), jnp.float32)], axis=1).T            # (8, nb_pad)

    kernel = _make_chamfer_kernel(na, ta, tiles_per_core, symmetric)

    out_shape = [jax.ShapeDtypeStruct((n_split, 1, 1), jnp.float32)]
    out_specs = [pl.BlockSpec((None, 1, 1), lambda c, i: (c, 0, 0))]
    if not symmetric:
        out_shape.append(jax.ShapeDtypeStruct((n_split, 1, nb_pad), jnp.float32))
        out_specs.append(pl.BlockSpec((None, 1, nb_pad), lambda c, i: (c, 0, 0)))

    cp_kwargs = dict(dimension_semantics=("parallel", "arbitrary"))
    if vmem_limit_bytes is not None:
        cp_kwargs["vmem_limit_bytes"] = vmem_limit_bytes

    # TODO(synk): for very large nb (100k+ samples) chunk the B columns inside the
    # kernel (inner loop over ~2K-lane column blocks) so the (ta, nb_pad) d2 slab
    # stays bounded on v7x's 64 MiB VMEM; test sizes here fit comfortably.
    outs = pl.pallas_call(
        kernel,
        out_shape=tuple(out_shape),
        grid=(n_split, tiles_per_core),
        in_specs=[pl.BlockSpec((ta, 8), lambda c, i: (c * tiles_per_core + i, 0)),
                  pl.BlockSpec((8, nb_pad), lambda c, i: (0, 0))],
        out_specs=tuple(out_specs),
        compiler_params=pltpu.CompilerParams(**cp_kwargs),
    )(a8, bt8)

    loss_a2b = jnp.sum(outs[0]) / float(na)
    if symmetric:
        # symmetric distance matrix + na == nb  =>  b->a direction == a->b direction
        return 2.0 * loss_a2b

    colmin = jnp.min(outs[1], axis=0)                              # (1, nb_pad)
    col_valid = jnp.arange(nb_pad) < nb
    loss_b2a = jnp.sum(jnp.where(col_valid, jnp.maximum(colmin, 0.0), 0.0)) / float(nb)
    return loss_a2b + loss_b2a


# --------------------- fused small scalar-loss kernel ---------------------

def _make_fused_loss_kernel(F, E, V, Fp, Ep, Vp):
    inv_f = 1.0 / float(F)
    inv_e = 1.0 / float(E)
    inv_v = 1.0 / float(V)

    def kernel(vf_ref, of_ref, ev_ref, nv_ref,
               face_ref, edge_ref, smooth_ref, cons_ref, pen_ref):
        fmask = (jax.lax.broadcasted_iota(jnp.int32, (1, Fp), 1) < F).astype(jnp.float32)
        emask = (jax.lax.broadcasted_iota(jnp.int32, (1, Ep), 1) < E).astype(jnp.float32)
        vmask = (jax.lax.broadcasted_iota(jnp.int32, (1, Vp), 1) < V).astype(jnp.float32)

        def length(d):                        # (3, N) -> (1, N): lane-dense VPU + EUP sqrt
            return jnp.sqrt(d[0:1, :] * d[0:1, :] + d[1:2, :] * d[1:2, :]
                            + d[2:3, :] * d[2:3, :])

        def fmean(x):                         # masked mean of |x| over valid faces
            return jnp.sum(jnp.abs(x) * fmask) * inv_f

        vf = vf_ref[...]                      # (9, Fp) = [v0; v1; v2] coord-major
        of = of_ref[...]                      # (9, Fp) = [o0; o1; o2]
        v0, v1, v2 = vf[0:3, :], vf[3:6, :], vf[6:9, :]
        o0, o1, o2 = of[0:3, :], of[3:6, :], of[6:9, :]

        # --- mesh_edge_loss_custom (loss_face, avg_len) ---
        e0 = length(v0 - v1) * fmask
        e1 = length(v1 - v2) * fmask
        e2 = length(v2 - v0) * fmask
        avg_len = jnp.sum(e0 + e1 + e2) * (inv_f / 3.0)
        face_ref[0, 0] = (fmean(e0 - e1) + fmean(e1 - e2) + fmean(e2 - e0) +
                          fmean(e0 - avg_len) + fmean(e1 - avg_len) +
                          fmean(e2 - avg_len))

        # --- pytorch3d mesh_edge_loss(target_length=avg_len) ---
        ev = ev_ref[...]                      # (6, Ep) = [ev0; ev1]
        el = length(ev[0:3, :] - ev[3:6, :])
        edge_ref[0, 0] = jnp.sum(((el - avg_len) ** 2) * emask) * inv_e

        # --- mesh_smoothness_custom ---
        s0 = length(v0 - o0)
        s1 = length(v1 - o1)
        s2 = length(v2 - o2)
        smooth_ref[0, 0] = fmean(s0 - s1) + fmean(s1 - s2) + fmean(s2 - s0)

        # --- normal consistency MSE (mean over 3*V) + penetration ---
        nv = nv_ref[...]                      # (9, Vp) = [new_normals; vertex_normal; deform]
        nn, vn, dv = nv[0:3, :], nv[3:6, :], nv[6:9, :]
        dn = nn - vn
        cons_ref[0, 0] = jnp.sum(dn * dn * vmask) * (inv_v / 3.0)
        dots = (dv[0:1, :] * vn[0:1, :] + dv[1:2, :] * vn[1:2, :]
                + dv[2:3, :] * vn[2:3, :])
        pen_ref[0, 0] = jnp.sum(jnp.abs(jnp.minimum(dots, -0.1)) * vmask) * inv_v

    return kernel


def _pack_coord_major(arrays, npad):
    """[(N,3), ...] -> (3*len, npad) stacked coordinate-major float32, zero padded."""
    stacked = jnp.concatenate([a.astype(jnp.float32).T for a in arrays], axis=0)
    return jnp.pad(stacked, ((0, 0), (0, npad - stacked.shape[1])))


def fused_mesh_losses(new_verts, init_verts, faces, edges,
                      new_normals, init_normals, deform_verts):
    F = int(faces.shape[0]); E = int(edges.shape[0]); V = int(new_verts.shape[0])
    Fp, Ep, Vp = _round_up(F, 128), _round_up(E, 128), _round_up(V, 128)

    vf = _pack_coord_major([new_verts[faces[:, 0]], new_verts[faces[:, 1]],
                            new_verts[faces[:, 2]]], Fp)                       # (9, Fp)
    of = _pack_coord_major([init_verts[faces[:, 0]], init_verts[faces[:, 1]],
                            init_verts[faces[:, 2]]], Fp)                      # (9, Fp)
    ev = _pack_coord_major([new_verts[edges[:, 0]], new_verts[edges[:, 1]]], Ep)  # (6, Ep)
    nv = _pack_coord_major([new_normals, init_normals, deform_verts], Vp)      # (9, Vp)

    kernel = _make_fused_loss_kernel(F, E, V, Fp, Ep, Vp)
    outs = pl.pallas_call(
        kernel,
        out_shape=tuple(jax.ShapeDtypeStruct((1, 1), jnp.float32) for _ in range(5)),
        in_specs=[_VMEM] * 4,
        out_specs=tuple([_SMEM] * 5),
    )(vf, of, ev, nv)
    loss_face, loss_edge, loss_smooth, loss_cons, loss_pen = (o[0, 0] for o in outs)
    return loss_face, loss_edge, loss_smooth, loss_cons, loss_pen


# ------------------------------ JAX glue ----------------------------------

def vertex_normals(verts, faces):
    v0, v1, v2 = verts[faces[:, 0]], verts[faces[:, 1]], verts[faces[:, 2]]
    fn = jnp.cross(v1 - v0, v2 - v0)
    vn = jnp.zeros_like(verts)
    vn = vn.at[faces[:, 0]].add(fn)
    vn = vn.at[faces[:, 1]].add(fn)
    vn = vn.at[faces[:, 2]].add(fn)
    return vn / (jnp.linalg.norm(vn, axis=1, keepdims=True) + 1e-12)


def sample_points_from_mesh(key, verts, faces, n):
    # area-weighted face sampling + barycentric coords (sample_points_from_meshes)
    v0, v1, v2 = verts[faces[:, 0]], verts[faces[:, 1]], verts[faces[:, 2]]
    areas = 0.5 * jnp.linalg.norm(jnp.cross(v1 - v0, v2 - v0), axis=1)
    k1, k2 = jax.random.split(key)
    fidx = jax.random.categorical(k1, jnp.log(areas + 1e-12), shape=(n,))
    uv = jax.random.uniform(k2, (n, 2))
    u = jnp.sqrt(uv[:, 0:1])
    v = uv[:, 1:2]
    w0, w1, w2 = 1.0 - u, u * (1.0 - v), u * v
    return w0 * v0[fidx] + w1 * v1[fidx] + w2 * v2[fidx]


def smpl2mesh_forward_loss(key, src_verts, src_faces, src_edges,
                           trg_verts, trg_faces, n_src=512, n_trg=1024):
    # deform_verts initialised to zeros, as in the PyTorch module.
    deform_verts = jnp.zeros_like(src_verts)
    vertex_normal = vertex_normals(src_verts, src_faces)
    initial_vertex = src_verts

    x_flip_mask = jnp.ones_like(vertex_normal).at[:, 0].multiply(-1.0)
    # hands_mask only gates the SGD update (deform_verts * hands_mask) in the
    # original module's optimization loop; it never enters the loss.

    new_verts = src_verts + deform_verts

    k1, k2 = jax.random.split(key)
    sample_src = sample_points_from_mesh(k1, new_verts, src_faces, n_src)
    sample_trg = sample_points_from_mesh(k2, trg_verts, trg_faces, n_trg)

    # chamfer terms: one pallas_call each
    loss_chamfer = chamfer_distance(sample_src, sample_trg)
    # x-flip is an isometry -> symmetric distance matrix, compute one direction only
    loss_flip = chamfer_distance(new_verts, new_verts * x_flip_mask, symmetric=True)

    # all five tiny scalar losses: one fused pallas_call
    new_normals = vertex_normals(new_verts, src_faces)
    loss_face, loss_edge, loss_smooth, loss_cons, loss_pen = fused_mesh_losses(
        new_verts, initial_vertex, src_faces, src_edges,
        new_normals, vertex_normal, deform_verts)

    # TODO(synk): mesh_normal_consistency and mesh_laplacian_smoothing need
    # edge->face adjacency / a sparse Laplacian; no clean Pallas equivalent here.
    # TODO(synk): the 500-step SGD(momentum=0.99) autograd loop, KDTree colour
    # transfer and trimesh fix_normals/fill_holes/filter_laplacian are host-side
    # / autograd machinery with no Pallas equivalent.

    loss = (loss_chamfer * W['chamfer'] + loss_face * W['face'] +
            loss_edge * W['edge'] + loss_smooth * W['smooth'] +
            loss_cons * W['consistency'] + loss_flip * W['symmetry'] +
            loss_pen * W['penetration'])
    return loss, new_verts


# ------------------------------ test setup ---------------------------------

def make_grid_mesh(n, z_amp):
    xs = np.linspace(-1.0, 1.0, n, dtype=np.float32)
    gx, gy = np.meshgrid(xs, xs, indexing="ij")
    gz = z_amp * np.sin(np.pi * gx) * np.cos(np.pi * gy)
    verts = np.stack([gx, gy, gz], axis=-1).reshape(-1, 3).astype(np.float32)
    faces = []
    for i in range(n - 1):
        for j in range(n - 1):
            a = i * n + j
            b = a + 1
            c = a + n
            d = c + 1
            faces.append([a, b, c])
            faces.append([b, d, c])
    return verts, np.asarray(faces, dtype=np.int32)


def unique_edges(faces):
    e = np.concatenate([faces[:, [0, 1]], faces[:, [1, 2]], faces[:, [2, 0]]], 0)
    e = np.sort(e, axis=1)
    return np.unique(e, axis=0).astype(np.int32)


if __name__ == "__main__":
    key = jax.random.PRNGKey(0)
    kj, ks = jax.random.split(key)

    src_verts_np, src_faces_np = make_grid_mesh(16, 0.05)   # V=256, F=450
    trg_verts_np, trg_faces_np = make_grid_mesh(16, 0.15)

    src_verts = jnp.asarray(src_verts_np)
    src_faces = jnp.asarray(src_faces_np)
    trg_verts = jnp.asarray(trg_verts_np) + 0.01 * jax.random.normal(
        kj, trg_verts_np.shape, dtype=jnp.float32)
    trg_faces = jnp.asarray(trg_faces_np)
    src_edges = jnp.asarray(unique_edges(src_faces_np))     # E=705

    fwd = jax.jit(smpl2mesh_forward_loss)
    total_loss, new_verts = fwd(ks, src_verts, src_faces, src_edges,
                                trg_verts, trg_faces)
    jax.block_until_ready((total_loss, new_verts))
    assert bool(jnp.isfinite(total_loss))
    print("KERNEL_OK")
</pallas_src>

<mosaic_0001>
module attributes {stable_mosaic.version = 11 : i64} {
  func.func @kernel(%arg0: memref<9x512xf32, #tpu.memory_space<vmem>>, %arg1: memref<9x512xf32, #tpu.memory_space<vmem>>, %arg2: memref<6x768xf32, #tpu.memory_space<vmem>>, %arg3: memref<9x256xf32, #tpu.memory_space<vmem>>, %arg4: memref<1x1xf32, #tpu.memory_space<smem>>, %arg5: memref<1x1xf32, #tpu.memory_space<smem>>, %arg6: memref<1x1xf32, #tpu.memory_space<smem>>, %arg7: memref<1x1xf32, #tpu.memory_space<smem>>, %arg8: memref<1x1xf32, #tpu.memory_space<smem>>) attributes {dimension_semantics = [], scalar_prefetch = 0 : i64, scratch_operands = 0 : i64, tpu.core_type = #tpu.core_type<tc>} {
    %0 = tpu.iota {dimensions = array<i32: 1>} : vector<1x512xi32>
    %c450_i32 = arith.constant 450 : i32
    %1 = vector.broadcast %c450_i32 : i32 to vector<1x512xi32>
    %2 = arith.cmpi slt, %0, %1 : vector<1x512xi32>
    %3 = arith.extui %2 : vector<1x512xi1> to vector<1x512xi32>
    %4 = arith.sitofp %3 : vector<1x512xi32> to vector<1x512xf32>
    %5 = tpu.iota {dimensions = array<i32: 1>} : vector<1x768xi32>
    %c705_i32 = arith.constant 705 : i32
    %6 = vector.broadcast %c705_i32 : i32 to vector<1x768xi32>
    %7 = arith.cmpi slt, %5, %6 : vector<1x768xi32>
    %8 = arith.extui %7 : vector<1x768xi1> to vector<1x768xi32>
    %9 = arith.sitofp %8 : vector<1x768xi32> to vector<1x768xf32>
    %10 = tpu.iota {dimensions = array<i32: 1>} : vector<1x256xi32>
    %c256_i32 = arith.constant 256 : i32
    %11 = vector.broadcast %c256_i32 : i32 to vector<1x256xi32>
    %12 = arith.cmpi slt, %10, %11 : vector<1x256xi32>
    %13 = arith.extui %12 : vector<1x256xi1> to vector<1x256xi32>
    %14 = arith.sitofp %13 : vector<1x256xi32> to vector<1x256xf32>
    %c0 = arith.constant 0 : index
    %c0_0 = arith.constant 0 : index
    %15 = vector.load %arg0[%c0, %c0_0] : memref<9x512xf32, #tpu.memory_space<vmem>>, vector<9x512xf32>
    %c0_1 = arith.constant 0 : index
    %c0_2 = arith.constant 0 : index
    %16 = vector.load %arg1[%c0_1, %c0_2] : memref<9x512xf32, #tpu.memory_space<vmem>>, vector<9x512xf32>
    %17 = vector.extract_strided_slice %15 {offsets = [0, 0], sizes = [3, 512], strides = [1, 1]} : vector<9x512xf32> to vector<3x512xf32>
    %18 = vector.extract_strided_slice %15 {offsets = [3, 0], sizes = [3, 512], strides = [1, 1]} : vector<9x512xf32> to vector<3x512xf32>
    %19 = vector.extract_strided_slice %15 {offsets = [6, 0], sizes = [3, 512], strides = [1, 1]} : vector<9x512xf32> to vector<3x512xf32>
    %20 = vector.extract_strided_slice %16 {offsets = [0, 0], sizes = [3, 512], strides = [1, 1]} : vector<9x512xf32> to vector<3x512xf32>
    %21 = vector.extract_strided_slice %16 {offsets = [3, 0], sizes = [3, 512], strides = [1, 1]} : vector<9x512xf32> to vector<3x512xf32>
    %22 = vector.extract_strided_slice %16 {offsets = [6, 0], sizes = [3, 512], strides = [1, 1]} : vector<9x512xf32> to vector<3x512xf32>
    %23 = arith.subf %17, %18 : vector<3x512xf32>
    %24 = vector.extract_strided_slice %23 {offsets = [0, 0], sizes = [1, 512], strides = [1, 1]} : vector<3x512xf32> to vector<1x512xf32>
    %25 = vector.extract_strided_slice %23 {offsets = [0, 0], sizes = [1, 512], strides = [1, 1]} : vector<3x512xf32> to vector<1x512xf32>
    %26 = arith.mulf %24, %25 : vector<1x512xf32>
    %27 = vector.extract_strided_slice %23 {offsets = [1, 0], sizes = [1, 512], strides = [1, 1]} : vector<3x512xf32> to vector<1x512xf32>
    %28 = vector.extract_strided_slice %23 {offsets = [1, 0], sizes = [1, 512], strides = [1, 1]} : vector<3x512xf32> to vector<1x512xf32>
    %29 = arith.mulf %27, %28 : vector<1x512xf32>
    %30 = arith.addf %26, %29 : vector<1x512xf32>
    %31 = vector.extract_strided_slice %23 {offsets = [2, 0], sizes = [1, 512], strides = [1, 1]} : vector<3x512xf32> to vector<1x512xf32>
    %32 = vector.extract_strided_slice %23 {offsets = [2, 0], sizes = [1, 512], strides = [1, 1]} : vector<3x512xf32> to vector<1x512xf32>
    %33 = arith.mulf %31, %32 : vector<1x512xf32>
    %34 = arith.addf %30, %33 : vector<1x512xf32>
    %35 = math.sqrt %34 : vector<1x512xf32>
    %36 = arith.mulf %35, %4 : vector<1x512xf32>
    %37 = arith.subf %18, %19 : vector<3x512xf32>
    %38 = vector.extract_strided_slice %37 {offsets = [0, 0], sizes = [1, 512], strides = [1, 1]} : vector<3x512xf32> to vector<1x512xf32>
    %39 = vector.extract_strided_slice %37 {offsets = [0, 0], sizes = [1, 512], strides = [1, 1]} : vector<3x512xf32> to vector<1x512xf32>
    %40 = arith.mulf %38, %39 : vector<1x512xf32>
    %41 = vector.extract_strided_slice %37 {offsets = [1, 0], sizes = [1, 512], strides = [1, 1]} : vector<3x512xf32> to vector<1x512xf32>
    %42 = vector.extract_strided_slice %37 {offsets = [1, 0], sizes = [1, 512], strides = [1, 1]} : vector<3x512xf32> to vector<1x512xf32>
    %43 = arith.mulf %41, %42 : vector<1x512xf32>
    %44 = arith.addf %40, %43 : vector<1x512xf32>
    %45 = vector.extract_strided_slice %37 {offsets = [2, 0], sizes = [1, 512], strides = [1, 1]} : vector<3x512xf32> to vector<1x512xf32>
    %46 = vector.extract_strided_slice %37 {offsets = [2, 0], sizes = [1, 512], strides = [1, 1]} : vector<3x512xf32> to vector<1x512xf32>
    %47 = arith.mulf %45, %46 : vector<1x512xf32>
    %48 = arith.addf %44, %47 : vector<1x512xf32>
    %49 = math.sqrt %48 : vector<1x512xf32>
    %50 = arith.mulf %49, %4 : vector<1x512xf32>
    %51 = arith.subf %19, %17 : vector<3x512xf32>
    %52 = vector.extract_strided_slice %51 {offsets = [0, 0], sizes = [1, 512], strides = [1, 1]} : vector<3x512xf32> to vector<1x512xf32>
    %53 = vector.extract_strided_slice %51 {offsets = [0, 0], sizes = [1, 512], strides = [1, 1]} : vector<3x512xf32> to vector<1x512xf32>
    %54 = arith.mulf %52, %53 : vector<1x512xf32>
    %55 = vector.extract_strided_slice %51 {offsets = [1, 0], sizes = [1, 512], strides = [1, 1]} : vector<3x512xf32> to vector<1x512xf32>
    %56 = vector.extract_strided_slice %51 {offsets = [1, 0], sizes = [1, 512], strides = [1, 1]} : vector<3x512xf32> to vector<1x512xf32>
    %57 = arith.mulf %55, %56 : vector<1x512xf32>
    %58 = arith.addf %54, %57 : vector<1x512xf32>
    %59 = vector.extract_strided_slice %51 {offsets = [2, 0], sizes = [1, 512], strides = [1, 1]} : vector<3x512xf32> to vector<1x512xf32>
    %60 = vector.extract_strided_slice %51 {offsets = [2, 0], sizes = [1, 512], strides = [1, 1]} : vector<3x512xf32> to vector<1x512xf32>
    %61 = arith.mulf %59, %60 : vector<1x512xf32>
    %62 = arith.addf %58, %61 : vector<1x512xf32>
    %63 = math.sqrt %62 : vector<1x512xf32>
    %64 = arith.mulf %63, %4 : vector<1x512xf32>
    %65 = arith.addf %36, %50 : vector<1x512xf32>
    %66 = arith.addf %65, %64 : vector<1x512xf32>
    %67 = vector.shape_cast %66 : vector<1x512xf32> to vector<1x1x512xf32>
    %cst = arith.constant dense<0.000000e+00> : vector<1xf32>
    %68 = vector.multi_reduction <add>, %67, %cst [1, 2] : vector<1x1x512xf32> to vector<1xf32>
    %69 = vector.shape_cast %68 : vector<1xf32> to vector<1x1x1xf32>
    %70 = vector.extract %69[0, 0, 0] : f32 from vector<1x1x1xf32>
    %cst_3 = arith.constant 7.40740739E-4 : f32
    %71 = arith.mulf %70, %cst_3 : f32
    %72 = arith.subf %36, %50 : vector<1x512xf32>
    %73 = math.absf %72 : vector<1x512xf32>
    %74 = arith.mulf %73, %4 : vector<1x512xf32>
    %75 = vector.shape_cast %74 : vector<1x512xf32> to vector<1x1x512xf32>
    %cst_4 = arith.constant dense<0.000000e+00> : vector<1xf32>
    %76 = vector.multi_reduction <add>, %75, %cst_4 [1, 2] : vector<1x1x512xf32> to vector<1xf32>
    %77 = vector.shape_cast %76 : vector<1xf32> to vector<1x1x1xf32>
    %78 = vector.extract %77[0, 0, 0] : f32 from vector<1x1x1xf32>
    %cst_5 = arith.constant 0.00222222228 : f32
    %79 = arith.mulf %78, %cst_5 : f32
    %80 = arith.subf %50, %64 : vector<1x512xf32>
    %81 = math.absf %80 : vector<1x512xf32>
    %82 = arith.mulf %81, %4 : vector<1x512xf32>
    %83 = vector.shape_cast %82 : vector<1x512xf32> to vector<1x1x512xf32>
    %cst_6 = arith.constant dense<0.000000e+00> : vector<1xf32>
    %84 = vector.multi_reduction <add>, %83, %cst_6 [1, 2] : vector<1x1x512xf32> to vector<1xf32>
    %85 = vector.shape_cast %84 : vector<1xf32> to vector<1x1x1xf32>
    %86 = vector.extract %85[0, 0, 0] : f32 from vector<1x1x1xf32>
    %cst_7 = arith.constant 0.00222222228 : f32
    %87 = arith.mulf %86, %cst_7 : f32
    %88 = arith.addf %79, %87 : f32
    %89 = arith.subf %64, %36 : vector<1x512xf32>
    %90 = math.absf %89 : vector<1x512xf32>
    %91 = arith.mulf %90, %4 : vector<1x512xf32>
    %92 = vector.shape_cast %91 : vector<1x512xf32> to vector<1x1x512xf32>
    %cst_8 = arith.constant dense<0.000000e+00> : vector<1xf32>
    %93 = vector.multi_reduction <add>, %92, %cst_8 [1, 2] : vector<1x1x512xf32> to vector<1xf32>
    %94 = vector.shape_cast %93 : vector<1xf32> to vector<1x1x1xf32>
    %95 = vector.extract %94[0, 0, 0] : f32 from vector<1x1x1xf32>
    %cst_9 = arith.constant 0.00222222228 : f32
    %96 = arith.mulf %95, %cst_9 : f32
    %97 = arith.addf %88, %96 : f32
    %98 = vector.broadcast %71 : f32 to vector<1x512xf32>
    %99 = arith.subf %36, %98 : vector<1x512xf32>
    %100 = math.absf %99 : vector<1x512xf32>
    %101 = arith.mulf %100, %4 : vector<1x512xf32>
    %102 = vector.shape_cast %101 : vector<1x512xf32> to vector<1x1x512xf32>
    %cst_10 = arith.constant dense<0.000000e+00> : vector<1xf32>
    %103 = vector.multi_reduction <add>, %102, %cst_10 [1, 2] : vector<1x1x512xf32> to vector<1xf32>
    %104 = vector.shape_cast %103 : vector<1xf32> to vector<1x1x1xf32>
    %105 = vector.extract %104[0, 0, 0] : f32 from vector<1x1x1xf32>
    %cst_11 = arith.constant 0.00222222228 : f32
    %106 = arith.mulf %105, %cst_11 : f32
    %107 = arith.addf %97, %106 : f32
    %108 = vector.broadcast %71 : f32 to vector<1x512xf32>
    %109 = arith.subf %50, %108 : vector<1x512xf32>
    %110 = math.absf %109 : vector<1x512xf32>
    %111 = arith.mulf %110, %4 : vector<1x512xf32>
    %112 = vector.shape_cast %111 : vector<1x512xf32> to vector<1x1x512xf32>
    %cst_12 = arith.constant dense<0.000000e+00> : vector<1xf32>
    %113 = vector.multi_reduction <add>, %112, %cst_12 [1, 2] : vector<1x1x512xf32> to vector<1xf32>
    %114 = vector.shape_cast %113 : vector<1xf32> to vector<1x1x1xf32>
    %115 = vector.extract %114[0, 0, 0] : f32 from vector<1x1x1xf32>
    %cst_13 = arith.constant 0.00222222228 : f32
    %116 = arith.mulf %115, %cst_13 : f32
    %117 = arith.addf %107, %116 : f32
    %118 = vector.broadcast %71 : f32 to vector<1x512xf32>
    %119 = arith.subf %64, %118 : vector<1x512xf32>
    %120 = math.absf %119 : vector<1x512xf32>
    %121 = arith.mulf %120, %4 : vector<1x512xf32>
    %122 = vector.shape_cast %121 : vector<1x512xf32> to vector<1x1x512xf32>
    %cst_14 = arith.constant dense<0.000000e+00> : vector<1xf32>
    %123 = vector.multi_reduction <add>, %122, %cst_14 [1, 2] : vector<1x1x512xf32> to vector<1xf32>
    %124 = vector.shape_cast %123 : vector<1xf32> to vector<1x1x1xf32>
    %125 = vector.extract %124[0, 0, 0] : f32 from vector<1x1x1xf32>
    %cst_15 = arith.constant 0.00222222228 : f32
    %126 = arith.mulf %125, %cst_15 : f32
    %127 = arith.addf %117, %126 : f32
    %c0_16 = arith.constant 0 : index
    %c0_17 = arith.constant 0 : index
    %128 = memref.load %arg4[%c0_16, %c0_17] : memref<1x1xf32, #tpu.memory_space<smem>>
    memref.store %127, %arg4[%c0_16, %c0_17] : memref<1x1xf32, #tpu.memory_space<smem>>
    %c0_18 = arith.constant 0 : index
    %c0_19 = arith.constant 0 : index
    %129 = vector.load %arg2[%c0_18, %c0_19] : memref<6x768xf32, #tpu.memory_space<vmem>>, vector<6x768xf32>
    %130 = vector.extract_strided_slice %129 {offsets = [0, 0], sizes = [3, 768], strides = [1, 1]} : vector<6x768xf32> to vector<3x768xf32>
    %131 = vector.extract_strided_slice %129 {offsets = [3, 0], sizes = [3, 768], strides = [1, 1]} : vector<6x768xf32> to vector<3x768xf32>
    %132 = arith.subf %130, %131 : vector<3x768xf32>
    %133 = vector.extract_strided_slice %132 {offsets = [0, 0], sizes = [1, 768], strides = [1, 1]} : vector<3x768xf32> to vector<1x768xf32>
    %134 = vector.extract_strided_slice %132 {offsets = [0, 0], sizes = [1, 768], strides = [1, 1]} : vector<3x768xf32> to vector<1x768xf32>
    %135 = arith.mulf %133, %134 : vector<1x768xf32>
    %136 = vector.extract_strided_slice %132 {offsets = [1, 0], sizes = [1, 768], strides = [1, 1]} : vector<3x768xf32> to vector<1x768xf32>
    %137 = vector.extract_strided_slice %132 {offsets = [1, 0], sizes = [1, 768], strides = [1, 1]} : vector<3x768xf32> to vector<1x768xf32>
    %138 = arith.mulf %136, %137 : vector<1x768xf32>
    %139 = arith.addf %135, %138 : vector<1x768xf32>
    %140 = vector.extract_strided_slice %132 {offsets = [2, 0], sizes = [1, 768], strides = [1, 1]} : vector<3x768xf32> to vector<1x768xf32>
    %141 = vector.extract_strided_slice %132 {offsets = [2, 0], sizes = [1, 768], strides = [1, 1]} : vector<3x768xf32> to vector<1x768xf32>
    %142 = arith.mulf %140, %141 : vector<1x768xf32>
    %143 = arith.addf %139, %142 : vector<1x768xf32>
    %144 = math.sqrt %143 : vector<1x768xf32>
    %145 = vector.broadcast %71 : f32 to vector<1x768xf32>
    %146 = arith.subf %144, %145 : vector<1x768xf32>
    %147 = arith.mulf %146, %146 : vector<1x768xf32>
    %148 = arith.mulf %147, %9 : vector<1x768xf32>
    %149 = vector.shape_cast %148 : vector<1x768xf32> to vector<1x1x768xf32>
    %cst_20 = arith.constant dense<0.000000e+00> : vector<1xf32>
    %150 = vector.multi_reduction <add>, %149, %cst_20 [1, 2] : vector<1x1x768xf32> to vector<1xf32>
    %151 = vector.shape_cast %150 : vector<1xf32> to vector<1x1x1xf32>
    %152 = vector.extract %151[0, 0, 0] : f32 from vector<1x1x1xf32>
    %cst_21 = arith.constant 0.00141843967 : f32
    %153 = arith.mulf %152, %cst_21 : f32
    %c0_22 = arith.constant 0 : index
    %c0_23 = arith.constant 0 : index
    %154 = memref.load %arg5[%c0_22, %c0_23] : memref<1x1xf32, #tpu.memory_space<smem>>
    memref.store %153, %arg5[%c0_22, %c0_23] : memref<1x1xf32, #tpu.memory_space<smem>>
    %155 = arith.subf %17, %20 : vector<3x512xf32>
    %156 = vector.extract_strided_slice %155 {offsets = [0, 0], sizes = [1, 512], strides = [1, 1]} : vector<3x512xf32> to vector<1x512xf32>
    %157 = vector.extract_strided_slice %155 {offsets = [0, 0], sizes = [1, 512], strides = [1, 1]} : vector<3x512xf32> to vector<1x512xf32>
    %158 = arith.mulf %156, %157 : vector<1x512xf32>
    %159 = vector.extract_strided_slice %155 {offsets = [1, 0], sizes = [1, 512], strides = [1, 1]} : vector<3x512xf32> to vector<1x512xf32>
    %160 = vector.extract_strided_slice %155 {offsets = [1, 0], sizes = [1, 512], strides = [1, 1]} : vector<3x512xf32> to vector<1x512xf32>
    %161 = arith.mulf %159, %160 : vector<1x512xf32>
    %162 = arith.addf %158, %161 : vector<1x512xf32>
    %163 = vector.extract_strided_slice %155 {offsets = [2, 0], sizes = [1, 512], strides = [1, 1]} : vector<3x512xf32> to vector<1x512xf32>
    %164 = vector.extract_strided_slice %155 {offsets = [2, 0], sizes = [1, 512], strides = [1, 1]} : vector<3x512xf32> to vector<1x512xf32>
    %165 = arith.mulf %163, %164 : vector<1x512xf32>
    %166 = arith.addf %162, %165 : vector<1x512xf32>
    %167 = math.sqrt %166 : vector<1x512xf32>
    %168 = arith.subf %18, %21 : vector<3x512xf32>
    %169 = vector.extract_strided_slice %168 {offsets = [0, 0], sizes = [1, 512], strides = [1, 1]} : vector<3x512xf32> to vector<1x512xf32>
    %170 = vector.extract_strided_slice %168 {offsets = [0, 0], sizes = [1, 512], strides = [1, 1]} : vector<3x512xf32> to vector<1x512xf32>
    %171 = arith.mulf %169, %170 : vector<1x512xf32>
    %172 = vector.extract_strided_slice %168 {offsets = [1, 0], sizes = [1, 512], strides = [1, 1]} : vector<3x512xf32> to vector<1x512xf32>
    %173 = vector.extract_strided_slice %168 {offsets = [1, 0], sizes = [1, 512], strides = [1, 1]} : vector<3x512xf32> to vector<1x512xf32>
    %174 = arith.mulf %172, %173 : vector<1x512xf32>
    %175 = arith.addf %171, %174 : vector<1x512xf32>
    %176 = vector.extract_strided_slice %168 {offsets = [2, 0], sizes = [1, 512], strides = [1, 1]} : vector<3x512xf32> to vector<1x512xf32>
    %177 = vector.extract_strided_slice %168 {offsets = [2, 0], sizes = [1, 512], strides = [1, 1]} : vector<3x512xf32> to vector<1x512xf32>
    %178 = arith.mulf %176, %177 : vector<1x512xf32>
    %179 = arith.addf %175, %178 : vector<1x512xf32>
    %180 = math.sqrt %179 : vector<1x512xf32>
    %181 = arith.subf %19, %22 : vector<3x512xf32>
    %182 = vector.extract_strided_slice %181 {offsets = [0, 0], sizes = [1, 512], strides = [1, 1]} : vector<3x512xf32> to vector<1x512xf32>
    %183 = vector.extract_strided_slice %181 {offsets = [0, 0], sizes = [1, 512], strides = [1, 1]} : vector<3x512xf32> to vector<1x512xf32>
    %184 = arith.mulf %182, %183 : vector<1x512xf32>
    %185 = vector.extract_strided_slice %181 {offsets = [1, 0], sizes = [1, 512], strides = [1, 1]} : vector<3x512xf32> to vector<1x512xf32>
    %186 = vector.extract_strided_slice %181 {offsets = [1, 0], sizes = [1, 512], strides = [1, 1]} : vector<3x512xf32> to vector<1x512xf32>
    %187 = arith.mulf %185, %186 : vector<1x512xf32>
    %188 = arith.addf %184, %187 : vector<1x512xf32>
    %189 = vector.extract_strided_slice %181 {offsets = [2, 0], sizes = [1, 512], strides = [1, 1]} : vector<3x512xf32> to vector<1x512xf32>
    %190 = vector.extract_strided_slice %181 {offsets = [2, 0], sizes = [1, 512], strides = [1, 1]} : vector<3x512xf32> to vector<1x512xf32>
    %191 = arith.mulf %189, %190 : vector<1x512xf32>
    %192 = arith.addf %188, %191 : vector<1x512xf32>
    %193 = math.sqrt %192 : vector<1x512xf32>
    %194 = arith.subf %167, %180 : vector<1x512xf32>
    %195 = math.absf %194 : vector<1x512xf32>
    %196 = arith.mulf %195, %4 : vector<1x512xf32>
    %197 = vector.shape_cast %196 : vector<1x512xf32> to vector<1x1x512xf32>
    %cst_24 = arith.constant dense<0.000000e+00> : vector<1xf32>
    %198 = vector.multi_reduction <add>, %197, %cst_24 [1, 2] : vector<1x1x512xf32> to vector<1xf32>
    %199 = vector.shape_cast %198 : vector<1xf32> to vector<1x1x1xf32>
    %200 = vector.extract %199[0, 0, 0] : f32 from vector<1x1x1xf32>
    %cst_25 = arith.constant 0.00222222228 : f32
    %201 = arith.mulf %200, %cst_25 : f32
    %202 = arith.subf %180, %193 : vector<1x512xf32>
    %203 = math.absf %202 : vector<1x512xf32>
    %204 = arith.mulf %203, %4 : vector<1x512xf32>
    %205 = vector.shape_cast %204 : vector<1x512xf32> to vector<1x1x512xf32>
    %cst_26 = arith.constant dense<0.000000e+00> : vector<1xf32>
    %206 = vector.multi_reduction <add>, %205, %cst_26 [1, 2] : vector<1x1x512xf32> to vector<1xf32>
    %207 = vector.shape_cast %206 : vector<1xf32> to vector<1x1x1xf32>
    %208 = vector.extract %207[0, 0, 0] : f32 from vector<1x1x1xf32>
    %cst_27 = arith.constant 0.00222222228 : f32
    %209 = arith.mulf %208, %cst_27 : f32
    %210 = arith.addf %201, %209 : f32
    %211 = arith.subf %193, %167 : vector<1x512xf32>
    %212 = math.absf %211 : vector<1x512xf32>
    %213 = arith.mulf %212, %4 : vector<1x512xf32>
    %214 = vector.shape_cast %213 : vector<1x512xf32> to vector<1x1x512xf32>
    %cst_28 = arith.constant dense<0.000000e+00> : vector<1xf32>
    %215 = vector.multi_reduction <add>, %214, %cst_28 [1, 2] : vector<1x1x512xf32> to vector<1xf32>
    %216 = vector.shape_cast %215 : vector<1xf32> to vector<1x1x1xf32>
    %217 = vector.extract %216[0, 0, 0] : f32 from vector<1x1x1xf32>
    %cst_29 = arith.constant 0.00222222228 : f32
    %218 = arith.mulf %217, %cst_29 : f32
    %219 = arith.addf %210, %218 : f32
    %c0_30 = arith.constant 0 : index
    %c0_31 = arith.constant 0 : index
    %220 = memref.load %arg6[%c0_30, %c0_31] : memref<1x1xf32, #tpu.memory_space<smem>>
    memref.store %219, %arg6[%c0_30, %c0_31] : memref<1x1xf32, #tpu.memory_space<smem>>
    %c0_32 = arith.constant 0 : index
    %c0_33 = arith.constant 0 : index
    %221 = vector.load %arg3[%c0_32, %c0_33] : memref<9x256xf32, #tpu.memory_space<vmem>>, vector<9x256xf32>
    %222 = vector.extract_strided_slice %221 {offsets = [0, 0], sizes = [3, 256], strides = [1, 1]} : vector<9x256xf32> to vector<3x256xf32>
    %223 = vector.extract_strided_slice %221 {offsets = [3, 0], sizes = [3, 256], strides = [1, 1]} : vector<9x256xf32> to vector<3x256xf32>
    %224 = vector.extract_strided_slice %221 {offsets = [6, 0], sizes = [3, 256], strides = [1, 1]} : vector<9x256xf32> to vector<3x256xf32>
    %225 = arith.subf %222, %223 : vector<3x256xf32>
    %226 = arith.mulf %225, %225 : vector<3x256xf32>
    %227 = vector.broadcast %14 : vector<1x256xf32> to vector<3x256xf32>
    %228 = arith.mulf %226, %227 : vector<3x256xf32>
    %229 = vector.shape_cast %228 : vector<3x256xf32> to vector<1x3x256xf32>
    %cst_34 = arith.constant dense<0.000000e+00> : vector<1xf32>
    %230 = vector.multi_reduction <add>, %229, %cst_34 [1, 2] : vector<1x3x256xf32> to vector<1xf32>
    %231 = vector.shape_cast %230 : vector<1xf32> to vector<1x1x1xf32>
    %232 = vector.extract %231[0, 0, 0] : f32 from vector<1x1x1xf32>
    %cst_35 = arith.constant 0.00130208337 : f32
    %233 = arith.mulf %232, %cst_35 : f32
    %c0_36 = arith.constant 0 : index
    %c0_37 = arith.constant 0 : index
    %234 = memref.load %arg7[%c0_36, %c0_37] : memref<1x1xf32, #tpu.memory_space<smem>>
    memref.store %233, %arg7[%c0_36, %c0_37] : memref<1x1xf32, #tpu.memory_space<smem>>
    %235 = vector.extract_strided_slice %224 {offsets = [0, 0], sizes = [1, 256], strides = [1, 1]} : vector<3x256xf32> to vector<1x256xf32>
    %236 = vector.extract_strided_slice %223 {offsets = [0, 0], sizes = [1, 256], strides = [1, 1]} : vector<3x256xf32> to vector<1x256xf32>
    %237 = arith.mulf %235, %236 : vector<1x256xf32>
    %238 = vector.extract_strided_slice %224 {offsets = [1, 0], sizes = [1, 256], strides = [1, 1]} : vector<3x256xf32> to vector<1x256xf32>
    %239 = vector.extract_strided_slice %223 {offsets = [1, 0], sizes = [1, 256], strides = [1, 1]} : vector<3x256xf32> to vector<1x256xf32>
    %240 = arith.mulf %238, %239 : vector<1x256xf32>
    %241 = arith.addf %237, %240 : vector<1x256xf32>
    %242 = vector.extract_strided_slice %224 {offsets = [2, 0], sizes = [1, 256], strides = [1, 1]} : vector<3x256xf32> to vector<1x256xf32>
    %243 = vector.extract_strided_slice %223 {offsets = [2, 0], sizes = [1, 256], strides = [1, 1]} : vector<3x256xf32> to vector<1x256xf32>
    %244 = arith.mulf %242, %243 : vector<1x256xf32>
    %245 = arith.addf %241, %244 : vector<1x256xf32>
    %cst_38 = arith.constant -1.000000e-01 : f32
    %246 = vector.broadcast %cst_38 : f32 to vector<1x256xf32>
    %247 = arith.minimumf %245, %246 : vector<1x256xf32>
    %248 = math.absf %247 : vector<1x256xf32>
    %249 = arith.mulf %248, %14 : vector<1x256xf32>
    %250 = vector.shape_cast %249 : vector<1x256xf32> to vector<1x1x256xf32>
    %cst_39 = arith.constant dense<0.000000e+00> : vector<1xf32>
    %251 = vector.multi_reduction <add>, %250, %cst_39 [1, 2] : vector<1x1x256xf32> to vector<1xf32>
    %252 = vector.shape_cast %251 : vector<1xf32> to vector<1x1x1xf32>
    %253 = vector.extract %252[0, 0, 0] : f32 from vector<1x1x1xf32>
    %cst_40 = arith.constant 3.906250e-03 : f32
    %254 = arith.mulf %253, %cst_40 : f32
    %c0_41 = arith.constant 0 : index
    %c0_42 = arith.constant 0 : index
    %255 = memref.load %arg8[%c0_41, %c0_42] : memref<1x1xf32, #tpu.memory_space<smem>>
    memref.store %254, %arg8[%c0_41, %c0_42] : memref<1x1xf32, #tpu.memory_space<smem>>
    return
  }
}

module attributes {stable_mosaic.version = 11 : i64} {
  func.func @kernel(%arg0: i32, %arg1: i32, %arg2: memref<256x8xf32, #tpu.memory_space<vmem>>, %arg3: memref<8x1024xf32, #tpu.memory_space<vmem>>, %arg4: memref<1x1x1xf32, #tpu.memory_space<vmem>>, %arg5: memref<1x1x1024xf32, #tpu.memory_space<vmem>>) attributes {dimension_semantics = [#tpu.dimension_semantics<parallel>, #tpu.dimension_semantics<arbitrary>], iteration_bounds = array<i64: 2, 1>, scalar_prefetch = 0 : i64, scratch_operands = 0 : i64, tpu.core_type = #tpu.core_type<tc>, window_params = [{transform_indices = @transform_0, window_bounds = array<i64: 256, 8>}, {pipeline_mode = #tpu.pipeline_mode<synchronous>, transform_indices = @transform_1, window_bounds = array<i64: 8, 1024>}, {transform_indices = @transform_2, window_bounds = array<i64: 1, 1, 1>}, {transform_indices = @transform_3, window_bounds = array<i64: 1, 1, 1024>}]} {
    %c1_i32 = arith.constant 1 : i32
    %0 = arith.muli %arg0, %c1_i32 : i32
    %1 = arith.addi %0, %arg1 : i32
    %c0 = arith.constant 0 : index
    %c0_0 = arith.constant 0 : index
    %2 = vector.load %arg2[%c0, %c0_0] : memref<256x8xf32, #tpu.memory_space<vmem>>, vector<256x8xf32>
    %c0_1 = arith.constant 0 : index
    %c0_2 = arith.constant 0 : index
    %3 = vector.load %arg3[%c0_1, %c0_2] : memref<8x1024xf32, #tpu.memory_space<vmem>>, vector<8x1024xf32>
    %cst = arith.constant dense<0.000000e+00> : vector<256x1024xf32>
    %4 = tpu.matmul %2, %3, %cst {dimension_numbers = #tpu.dot_dimension_numbers<[1], [0], [0], [1], [0, 0, 1, 1], [], []>} : vector<256x8xf32>, vector<8x1024xf32>, vector<256x1024xf32> -> vector<256x1024xf32>
    %c256_i32 = arith.constant 256 : i32
    %5 = arith.muli %1, %c256_i32 : i32
    %6 = tpu.iota {dimensions = array<i32: 0>} : vector<256x1xi32>
    %7 = vector.broadcast %5 : i32 to vector<256x1xi32>
    %8 = arith.addi %7, %6 : vector<256x1xi32>
    %c512_i32 = arith.constant 512 : i32
    %9 = vector.broadcast %c512_i32 : i32 to vector<256x1xi32>
    %10 = arith.cmpi slt, %8, %9 : vector<256x1xi32>
    %cst_3 = arith.constant dense<0x7F800000> : vector<256xf32>
    %11 = vector.multi_reduction <minimumf>, %4, %cst_3 [1] : vector<256x1024xf32> to vector<256xf32>
    %12 = vector.shape_cast %11 : vector<256xf32> to vector<256x1xf32>
    %cst_4 = arith.constant 0.000000e+00 : f32
    %13 = vector.broadcast %cst_4 : f32 to vector<256x1xf32>
    %14 = arith.maximumf %12, %13 : vector<256x1xf32>
    %cst_5 = arith.constant 0.000000e+00 : f32
    %15 = vector.broadcast %cst_5 : f32 to vector<256x1xf32>
    %16 = arith.select %10, %14, %15 : vector<256x1xi1>, vector<256x1xf32>
    %cst_6 = arith.constant dense<0.000000e+00> : vector<1xf32>
    %17 = vector.multi_reduction <add>, %16, %cst_6 [0] : vector<256x1xf32> to vector<1xf32>
    %18 = vector.shape_cast %17 : vector<1xf32> to vector<1x1xf32>
    %c0_i32 = arith.constant 0 : i32
    %19 = arith.cmpi eq, %arg1, %c0_i32 : i32
    %20 = arith.extui %19 : i1 to i32
    %c0_i32_7 = arith.constant 0 : i32
    %21 = arith.cmpi ne, %20, %c0_i32_7 : i32
    scf.if %21 {
      %cst_23 = arith.constant 0.000000e+00 : f32
      %39 = vector.broadcast %cst_23 : f32 to vector<1x1xf32>
      %c0_24 = arith.constant 0 : index
      %c0_25 = arith.constant 0 : index
      %c0_26 = arith.constant 0 : index
      %40 = vector.load %arg4[%c0_24, %c0_25, %c0_26] : memref<1x1x1xf32, #tpu.memory_space<vmem>>, vector<1x1x1xf32>
      %41 = vector.shape_cast %40 : vector<1x1x1xf32> to vector<1x1xf32>
      %42 = vector.shape_cast %39 : vector<1x1xf32> to vector<1x1x1xf32>
      tpu.vector_store %arg4[%c0_24, %c0_25, %c0_26], %42 {strides = array<i32>} : memref<1x1x1xf32, #tpu.memory_space<vmem>>, vector<1x1x1xf32>,
    } else {
    }
    %c0_8 = arith.constant 0 : index
    %c0_9 = arith.constant 0 : index
    %c0_10 = arith.constant 0 : index
    %22 = vector.load %arg4[%c0_8, %c0_9, %c0_10] : memref<1x1x1xf32, #tpu.memory_space<vmem>>, vector<1x1x1xf32>
    %23 = vector.shape_cast %22 : vector<1x1x1xf32> to vector<1x1xf32>
    %24 = arith.addf %23, %18 : vector<1x1xf32>
    %c0_11 = arith.constant 0 : index
    %c0_12 = arith.constant 0 : index
    %c0_13 = arith.constant 0 : index
    %25 = vector.load %arg4[%c0_11, %c0_12, %c0_13] : memref<1x1x1xf32, #tpu.memory_space<vmem>>, vector<1x1x1xf32>
    %26 = vector.shape_cast %25 : vector<1x1x1xf32> to vector<1x1xf32>
    %27 = vector.shape_cast %24 : vector<1x1xf32> to vector<1x1x1xf32>
    tpu.vector_store %arg4[%c0_11, %c0_12, %c0_13], %27 {strides = array<i32>} : memref<1x1x1xf32, #tpu.memory_space<vmem>>, vector<1x1x1xf32>,
    %cst_14 = arith.constant dense<0x7F800000> : vector<1024xf32>
    %28 = vector.multi_reduction <minimumf>, %4, %cst_14 [0] : vector<256x1024xf32> to vector<1024xf32>
    %29 = vector.shape_cast %28 : vector<1024xf32> to vector<1x1024xf32>
    %c0_i32_15 = arith.constant 0 : i32
    %30 = arith.cmpi eq, %arg1, %c0_i32_15 : i32
    %31 = arith.extui %30 : i1 to i32
    %c0_i32_16 = arith.constant 0 : i32
    %32 = arith.cmpi ne, %31, %c0_i32_16 : i32
    scf.if %32 {
      %cst_23 = arith.constant 1.000000e+30 : f32
      %39 = vector.broadcast %cst_23 : f32 to vector<1x1024xf32>
      %c0_24 = arith.constant 0 : index
      %c0_25 = arith.constant 0 : index
      %c0_26 = arith.constant 0 : index
      %40 = vector.load %arg5[%c0_24, %c0_25, %c0_26] : memref<1x1x1024xf32, #tpu.memory_space<vmem>>, vector<1x1x1024xf32>
      %41 = vector.shape_cast %40 : vector<1x1x1024xf32> to vector<1x1024xf32>
      %42 = vector.shape_cast %39 : vector<1x1024xf32> to vector<1x1x1024xf32>
      tpu.vector_store %arg5[%c0_24, %c0_25, %c0_26], %42 {strides = array<i32>} : memref<1x1x1024xf32, #tpu.memory_space<vmem>>, vector<1x1x1024xf32>,
    } else {
    }
    %c0_17 = arith.constant 0 : index
    %c0_18 = arith.constant 0 : index
    %c0_19 = arith.constant 0 : index
    %33 = vector.load %arg5[%c0_17, %c0_18, %c0_19] : memref<1x1x1024xf32, #tpu.memory_space<vmem>>, vector<1x1x1024xf32>
    %34 = vector.shape_cast %33 : vector<1x1x1024xf32> to vector<1x1024xf32>
    %35 = arith.minimumf %34, %29 : vector<1x1024xf32>
    %c0_20 = arith.constant 0 : index
    %c0_21 = arith.constant 0 : index
    %c0_22 = arith.constant 0 : index
    %36 = vector.load %arg5[%c0_20, %c0_21, %c0_22] : memref<1x1x1024xf32, #tpu.memory_space<vmem>>, vector<1x1x1024xf32>
    %37 = vector.shape_cast %36 : vector<1x1x1024xf32> to vector<1x1024xf32>
    %38 = vector.shape_cast %35 : vector<1x1024xf32> to vector<1x1x1024xf32>
    tpu.vector_store %arg5[%c0_20, %c0_21, %c0_22], %38 {strides = array<i32>} : memref<1x1x1024xf32, #tpu.memory_space<vmem>>, vector<1x1x1024xf32>,
    return
  }
  func.func @transform_0(%arg0: i32, %arg1: i32) -> (i32, i32) {
    %c1_i32 = arith.constant 1 : i32
    %0 = arith.muli %arg0, %c1_i32 : i32
    %1 = arith.addi %0, %arg1 : i32
    %c0_i32 = arith.constant 0 : i32
    %c0_i32_0 = arith.constant 0 : i32
    return %1, %c0_i32 : i32, i32
  }
  func.func @transform_1(%arg0: i32, %arg1: i32) -> (i32, i32) {
    %c0_i32 = arith.constant 0 : i32
    %c0_i32_0 = arith.constant 0 : i32
    %c0_i32_1 = arith.constant 0 : i32
    return %c0_i32, %c0_i32_0 : i32, i32
  }
  func.func @transform_2(%arg0: i32, %arg1: i32) -> (i32, i32, i32) {
    %c0_i32 = arith.constant 0 : i32
    %c0_i32_0 = arith.constant 0 : i32
    %c0_i32_1 = arith.constant 0 : i32
    return %arg0, %c0_i32, %c0_i32_0 : i32, i32, i32
  }
  func.func @transform_3(%arg0: i32, %arg1: i32) -> (i32, i32, i32) {
    %c0_i32 = arith.constant 0 : i32
    %c0_i32_0 = arith.constant 0 : i32
    %c0_i32_1 = arith.constant 0 : i32
    return %arg0, %c0_i32, %c0_i32_0 : i32, i32, i32
  }
}

module attributes {stable_mosaic.version = 11 : i64} {
  func.func @kernel(%arg0: i32, %arg1: i32, %arg2: memref<256x8xf32, #tpu.memory_space<vmem>>, %arg3: memref<8x256xf32, #tpu.memory_space<vmem>>, %arg4: memref<1x1x1xf32, #tpu.memory_space<vmem>>) attributes {dimension_semantics = [#tpu.dimension_semantics<parallel>, #tpu.dimension_semantics<arbitrary>], iteration_bounds = array<i64: 1, 1>, scalar_prefetch = 0 : i64, scratch_operands = 0 : i64, tpu.core_type = #tpu.core_type<tc>, window_params = [{transform_indices = @transform_0, window_bounds = array<i64: 256, 8>}, {pipeline_mode = #tpu.pipeline_mode<synchronous>, transform_indices = @transform_1, window_bounds = array<i64: 8, 256>}, {transform_indices = @transform_2, window_bounds = array<i64: 1, 1, 1>}]} {
    %c1_i32 = arith.constant 1 : i32
    %0 = arith.muli %arg0, %c1_i32 : i32
    %1 = arith.addi %0, %arg1 : i32
    %c0 = arith.constant 0 : index
    %c0_0 = arith.constant 0 : index
    %2 = vector.load %arg2[%c0, %c0_0] : memref<256x8xf32, #tpu.memory_space<vmem>>, vector<256x8xf32>
    %c0_1 = arith.constant 0 : index
    %c0_2 = arith.constant 0 : index
    %3 = vector.load %arg3[%c0_1, %c0_2] : memref<8x256xf32, #tpu.memory_space<vmem>>, vector<8x256xf32>
    %cst = arith.constant dense<0.000000e+00> : vector<256x256xf32>
    %4 = tpu.matmul %2, %3, %cst {dimension_numbers = #tpu.dot_dimension_numbers<[1], [0], [0], [1], [0, 0, 1, 1], [], []>} : vector<256x8xf32>, vector<8x256xf32>, vector<256x256xf32> -> vector<256x256xf32>
    %c256_i32 = arith.constant 256 : i32
    %5 = arith.muli %1, %c256_i32 : i32
    %6 = tpu.iota {dimensions = array<i32: 0>} : vector<256x1xi32>
    %7 = vector.broadcast %5 : i32 to vector<256x1xi32>
    %8 = arith.addi %7, %6 : vector<256x1xi32>
    %c256_i32_3 = arith.constant 256 : i32
    %9 = vector.broadcast %c256_i32_3 : i32 to vector<256x1xi32>
    %10 = arith.cmpi slt, %8, %9 : vector<256x1xi32>
    %cst_4 = arith.constant dense<0x7F800000> : vector<256xf32>
    %11 = vector.multi_reduction <minimumf>, %4, %cst_4 [1] : vector<256x256xf32> to vector<256xf32>
    %12 = vector.shape_cast %11 : vector<256xf32> to vector<256x1xf32>
    %cst_5 = arith.constant 0.000000e+00 : f32
    %13 = vector.broadcast %cst_5 : f32 to vector<256x1xf32>
    %14 = arith.maximumf %12, %13 : vector<256x1xf32>
    %cst_6 = arith.constant 0.000000e+00 : f32
    %15 = vector.broadcast %cst_6 : f32 to vector<256x1xf32>
    %16 = arith.select %10, %14, %15 : vector<256x1xi1>, vector<256x1xf32>
    %cst_7 = arith.constant dense<0.000000e+00> : vector<1xf32>
    %17 = vector.multi_reduction <add>, %16, %cst_7 [0] : vector<256x1xf32> to vector<1xf32>
    %18 = vector.shape_cast %17 : vector<1xf32> to vector<1x1xf32>
    %c0_i32 = arith.constant 0 : i32
    %19 = arith.cmpi eq, %arg1, %c0_i32 : i32
    %20 = arith.extui %19 : i1 to i32
    %c0_i32_8 = arith.constant 0 : i32
    %21 = arith.cmpi ne, %20, %c0_i32_8 : i32
    scf.if %21 {
      %cst_15 = arith.constant 0.000000e+00 : f32
      %28 = vector.broadcast %cst_15 : f32 to vector<1x1xf32>
      %c0_16 = arith.constant 0 : index
      %c0_17 = arith.constant 0 : index
      %c0_18 = arith.constant 0 : index
      %29 = vector.load %arg4[%c0_16, %c0_17, %c0_18] : memref<1x1x1xf32, #tpu.memory_space<vmem>>, vector<1x1x1xf32>
      %30 = vector.shape_cast %29 : vector<1x1x1xf32> to vector<1x1xf32>
      %31 = vector.shape_cast %28 : vector<1x1xf32> to vector<1x1x1xf32>
      tpu.vector_store %arg4[%c0_16, %c0_17, %c0_18], %31 {strides = array<i32>} : memref<1x1x1xf32, #tpu.memory_space<vmem>>, vector<1x1x1xf32>,
    } else {
    }
    %c0_9 = arith.constant 0 : index
    %c0_10 = arith.constant 0 : index
    %c0_11 = arith.constant 0 : index
    %22 = vector.load %arg4[%c0_9, %c0_10, %c0_11] : memref<1x1x1xf32, #tpu.memory_space<vmem>>, vector<1x1x1xf32>
    %23 = vector.shape_cast %22 : vector<1x1x1xf32> to vector<1x1xf32>
    %24 = arith.addf %23, %18 : vector<1x1xf32>
    %c0_12 = arith.constant 0 : index
    %c0_13 = arith.constant 0 : index
    %c0_14 = arith.constant 0 : index
    %25 = vector.load %arg4[%c0_12, %c0_13, %c0_14] : memref<1x1x1xf32, #tpu.memory_space<vmem>>, vector<1x1x1xf32>
    %26 = vector.shape_cast %25 : vector<1x1x1xf32> to vector<1x1xf32>
    %27 = vector.shape_cast %24 : vector<1x1xf32> to vector<1x1x1xf32>
    tpu.vector_store %arg4[%c0_12, %c0_13, %c0_14], %27 {strides = array<i32>} : memref<1x1x1xf32, #tpu.memory_space<vmem>>, vector<1x1x1xf32>,
    return
  }
  func.func @transform_0(%arg0: i32, %arg1: i32) -> (i32, i32) {
    %c1_i32 = arith.constant 1 : i32
    %0 = arith.muli %arg0, %c1_i32 : i32
    %1 = arith.addi %0, %arg1 : i32
    %c0_i32 = arith.constant 0 : i32
    %c0_i32_0 = arith.constant 0 : i32
    return %1, %c0_i32 : i32, i32
  }
  func.func @transform_1(%arg0: i32, %arg1: i32) -> (i32, i32) {
    %c0_i32 = arith.constant 0 : i32
    %c0_i32_0 = arith.constant 0 : i32
    %c0_i32_1 = arith.constant 0 : i32
    return %c0_i32, %c0_i32_0 : i32, i32
  }
  func.func @transform_2(%arg0: i32, %arg1: i32) -> (i32, i32, i32) {
    %c0_i32 = arith.constant 0 : i32
    %c0_i32_0 = arith.constant 0 : i32
    %c0_i32_1 = arith.constant 0 : i32
    return %arg0, %c0_i32, %c0_i32_0 : i32, i32, i32
  }
}

</mosaic_0001>

<bundles_post_ra>
// kernel: smpl2mesh_forward_loss.4
= control target key start
LH: loop header
LB: loop body
LE: loop exit
PB: predicated region body
PF: predicated region fallthrough
CT: control target
= control target key end

     0   :  { %14 = vsyncpa [#allocation3], 0  ;;  %s2033_s0 = inlined_call_operand.vmem [shape: f32[9,512], index: 0, kind: input, shape index: {}, may-alias: {0,1}]   ;;  %s2034_s1 = inlined_call_operand.vmem [shape: f32[9,512], index: 1, kind: input, shape index: {}, may-alias: {0,1}]   ;;  %s2035_s2 = inlined_call_operand.vmem [shape: f32[6,768], index: 2, kind: input, shape index: {}]   ;;  %s2036_s3 = inlined_call_operand.vmem [shape: f32[9,256], index: 3, kind: input, shape index: {}]   ;;  %s2037_s4 = inlined_call_operand.hbm [shape: f32[1,1], index: 4, kind: output, shape index: {0}]   ;;  %s2038_s5 = inlined_call_operand.hbm [shape: f32[1,1], index: 5, kind: output, shape index: {1}]   ;;  %s2039_s6 = inlined_call_operand.hbm [shape: f32[1,1], index: 6, kind: output, shape index: {2}]   ;;  %s2040_s7 = inlined_call_operand.hbm [shape: f32[1,1], index: 7, kind: output, shape index: {3}]   ;;  %s2041_s8 = inlined_call_operand.hbm [shape: f32[1,1], index: 8, kind: output, shape index: {4}]  }
   0x1   :  { %15 = vsyncpa [#allocation5], 0  ;;  %v1389_v0 = vld [vmem:[%s2033_s0] sm:$0xff]  ;;  %v1394_v1 = vld [vmem:[%s2033_s0 + $0x8] sm:$0xff] }
   0x2   :  { %v1399_v2 = vld [vmem:[%s2033_s0 + $0x18] sm:$0xff]  ;;  %v1404_v3 = vld [vmem:[%s2033_s0 + $0x20] sm:$0x1]  ;;  %v88_v4 = vrot.slane %v1389_v0, 3  ;;  %v1410_v5 = vld [vmem:[%s2033_s0 + $0x10] sm:$0xff]  ;;  %v89_v7 = vrot.slane %v1394_v1, 3 }
   0x3   :  { %v1415_v6 = vld [vmem:[%s2033_s0 + $0x28] sm:$0x1]  ;;  %v1421_v8 = vld [vmem:[%s2033_s0 + $0x30] sm:$0x1]  ;;  %v91_v9 = vrot.slane %v1399_v2, 3  ;;  %v169_v11 = vrot.slane %v1404_v3, 3 }
   0x4   :  { %v96_v10 = vsub.f32 %v1389_v0, %v88_v4 }
   0x5   :  { %16 = vsyncpa [#allocation8], 0  ;;  %v97_v12 = vsub.f32 %v1394_v1, %v89_v7  ;;  %vm168_vm0 = vcmask 1044480   ;;  %v1430_v13 = vld [vmem:[%s2033_s0 + $0x38] sm:$0x1]  ;;  %v90_v14 = vrot.slane %v1410_v5, 3  ;;  %v99_v15 = vsub.f32 %v1399_v2, %v91_v9 }
   0x6   :  { %v171_v16 = vrot.slane %v1415_v6, 3  ;;  %v173_v17 = vrot.slane %v1421_v8, 3  ;;  %v100_v19 = vmul.f32 %v96_v10, %v96_v10  ;;  %v170_v20 = vsel %vm168_vm0, %v88_v4, %v169_v11  ;;  %s1336_s24 = smov [#allocation2]  }
   0x7   :  { %v98_v18 = vsub.f32 %v1410_v5, %v90_v14  ;;  %v101_v21 = vmul.f32 %v97_v12, %v97_v12  ;;  %v175_v22 = vrot.slane %v1430_v13, 3  ;;  %v103_v23 = vmul.f32 %v99_v15, %v99_v15 }
   0x8   :  { %v172_v24 = vsel %vm168_vm0, %v89_v7, %v171_v16  ;;  %v174_v25 = vsel %vm168_vm0, %v90_v14, %v173_v17  ;;  %v181_v26 = vsub.f32 %v1389_v0, %v170_v20  ;;  %v108_v28 = vrot.slane %v100_v19, 1 }
   0x9   :  { %v102_v27 = vmul.f32 %v98_v18, %v98_v18  ;;  %v176_v29 = vsel %vm168_vm0, %v91_v9, %v175_v22  ;;  %v109_v30 = vrot.slane %v101_v21, 1  ;;  %v111_v31 = vrot.slane %v103_v23, 1 }
   0xa   :  { %v182_v32 = vsub.f32 %v1394_v1, %v172_v24  ;;  %v183_v33 = vsub.f32 %v1410_v5, %v174_v25  ;;  %v184_v34 = vsub.f32 %v1399_v2, %v176_v29  ;;  %v185_v35 = vmul.f32 %v181_v26, %v181_v26 }
   0xb   :  { %v110_v36 = vrot.slane %v102_v27, 1  ;;  %v116_v37 = vadd.f32 %v108_v28, %v100_v19  ;;  %v120_v38 = vrot.slane %v100_v19, 2  ;;  %v117_v39 = vadd.f32 %v109_v30, %v101_v21 }
   0xc   :  { %v121_v40 = vrot.slane %v101_v21, 2  ;;  %v119_v41 = vadd.f32 %v111_v31, %v103_v23  ;;  %v123_v42 = vrot.slane %v103_v23, 2  ;;  %v186_v43 = vmul.f32 %v182_v32, %v182_v32 }
   0xd   :  { %v187_v44 = vmul.f32 %v183_v33, %v183_v33  ;;  %v122_v45 = vrot.slane %v102_v27, 2  ;;  %v188_v46 = vmul.f32 %v184_v34, %v184_v34  ;;  %v193_v47 = vrot.slane %v185_v35, 1 }
   0xe   :  { %v205_v48 = vrot.slane %v185_v35, 2  ;;  %v118_v49 = vadd.f32 %v110_v36, %v102_v27  ;;  %v1446_v50 = vadd.f32 %v120_v38, %v116_v37  ;;  %v194_v51 = vrot.slane %v186_v43, 1 }
   0xf   :  { %v195_v52 = vrot.slane %v187_v44, 1  ;;  %v1448_v53 = vadd.f32 %v121_v40, %v117_v39  ;;  %v196_v54 = vrot.slane %v188_v46, 1  ;;  %v201_v55 = vadd.f32 %v193_v47, %v185_v35 }
  0x10   :  { %v206_v56 = vrot.slane %v186_v43, 2  ;;  %v1450_v57 = vadd.f32 %v123_v42, %v119_v41  ;;  %v202_v58 = vadd.f32 %v194_v51, %v186_v43  ;;  %v208_v59 = vrot.slane %v188_v46, 2 }
  0x11   :  { %v203_v60 = vadd.f32 %v195_v52, %v187_v44  ;;  %v204_v61 = vadd.f32 %v196_v54, %v188_v46  ;;  %v207_v62 = vrot.slane %v187_v44, 2  ;;  %v1452_v63 = vadd.f32 %v205_v48, %v201_v55 }
  0x12   :  { %v1454_v4 = vadd.f32 %v122_v45, %v118_v49  ;;  %1237 = vrsqrt.f32 %v1446_v50  ;;  %v249_v7 = vrot.slane %v1389_v0, 2  ;;  %v250_v9 = vrot.slane %v1394_v1, 2 }
  0x13   :  { %1239 = vrsqrt.f32 %v1448_v53  ;;  %v1460_v10 = vadd.f32 %v206_v56, %v202_v58  ;;  %v251_v11 = vrot.slane %v1410_v5, 2  ;;  %v252_v12 = vrot.slane %v1399_v2, 2 }
  0x14   :  { %1241 = vrsqrt.f32 %v1450_v57  ;;  %v1465_v14 = vadd.f32 %v208_v59, %v204_v61  ;;  %v1467_v15 = vadd.f32 %v207_v62, %v203_v60  ;;  %v257_v16 = vsub.f32 %v1389_v0, %v249_v7 }
  0x15   :  { %1243 = vrsqrt.f32 %v1452_v63  ;;  %v258_v17 = vsub.f32 %v1394_v1, %v250_v9  ;;  %v25_v18 = vlaneseq  ;;  %v259_v19 = vsub.f32 %v1410_v5, %v251_v11 }
  0x16   :  { %1245 = vrsqrt.f32 %v1454_v4  ;;  %v260_v20 = vsub.f32 %v1399_v2, %v252_v12  ;;  %v261_v21 = vsub.f32 %v1404_v3, %v249_v7  ;;  %v262_v22 = vsub.f32 %v1415_v6, %v250_v9 }
  0x17   :  { %1247 = vrsqrt.f32 %v1460_v10  ;;  %v263_v23 = vsub.f32 %v1421_v8, %v251_v11  ;;  %v264_v24 = vsub.f32 %v1430_v13, %v252_v12  ;;  %v265_v25 = vmul.f32 %v257_v16, %v257_v16 }
  0x18   :  { %1249 = vrsqrt.f32 %v1465_v14  ;;  %v266_v26 = vmul.f32 %v258_v17, %v258_v17  ;;  %v1482_v27 = vand.u32 127, %v25_v18  ;;  %v267_v28 = vmul.f32 %v259_v19, %v259_v19 }
  0x19   :  { %1251 = vrsqrt.f32 %v1467_v15  ;;  %v268_v29 = vmul.f32 %v260_v20, %v260_v20  ;;  %v273_v30 = vrot.slane %v265_v25, 1  ;;  %v285_v32 = vmul.f32 %v261_v21, %v261_v21 }
  0x1a   :  { %v274_v31 = vrot.slane %v266_v26, 1  ;;  %v275_v33 = vrot.slane %v267_v28, 1  ;;  %v286_v35 = vmul.f32 %v262_v22, %v262_v22  ;;  %v287_v38 = vmul.f32 %v263_v23, %v263_v23 }
  0x1b   :  { %v276_v34 = vrot.slane %v268_v29, 1  ;;  %v281_v36 = vadd.f32 %v273_v30, %v265_v25  ;;  %v288_v39 = vmul.f32 %v264_v24, %v264_v24  ;;  %v1485_v41 = vadd.s32 384, %v1482_v27 }
  0x1c   :  { %v282_v37 = vadd.f32 %v274_v31, %v266_v26  ;;  %v283_v42 = vadd.f32 %v275_v33, %v267_v28  ;;  %v293_v43 = vrot.slane %v285_v32, 2  ;;  %v294_v44 = vrot.slane %v286_v35, 2 }
  0x1d   :  { %v284_v46 = vadd.f32 %v276_v34, %v268_v29  ;;  %v295_v47 = vrot.slane %v287_v38, 2  ;;  %v296_v48 = vrot.slane %v288_v39, 2  ;;  %vm134_vm1 = vcmp.eq.f32.partialorder %v1446_v50, inf }
  0x1e   :  { %v1487_v51 = vadd.f32 %v293_v43, %v281_v36  ;;  %v1489_v52 = vadd.f32 %v294_v44, %v282_v37  ;;  %v137_v55 = vand.u32 2147483648, %v1446_v50  ;;  %vm141_vm2 = vcmp.eq.f32.partialorder %v1448_v53, inf }
  0x1f   :  { %v1238_v40 = vpop.eup %1237  ;;  %vm33_vm3 = vcmp.lt.s32.totalorder %v1485_v41, 450  ;;  %vm136_vm4 = vcmp.eq.f32.partialorder %v1446_v50, 0.0  ;;  %vm143_vm5 = vcmp.eq.f32.partialorder %v1448_v53, 0.0  ;;  %v144_v58 = vand.u32 2147483648, %v1448_v53 }
  0x20   :  { %v1240_v45 = vpop.eup %1239  ;;  %vm148_vm6 = vcmp.eq.f32.partialorder %v1454_v4, inf  ;;  %v1499_v59 = vadd.f32 %v295_v47, %v283_v42  ;;  %1253 = vrsqrt.f32 %v1487_v51  ;;  %vm150_vm7 = vcmp.eq.f32.partialorder %v1454_v4, 0.0 }
  0x21   :  { %v1242_v49 = vpop.eup %1241  ;;  %v151_v61 = vand.u32 2147483648, %v1454_v4  ;;  %vm155_vm8 = vcmp.eq.f32.partialorder %v1450_v57, inf  ;;  %vm157_vm9 = vcmp.eq.f32.partialorder %v1450_v57, 0.0  ;;  %v1506_v62 = vadd.f32 %v296_v48, %v284_v46 }
  0x22   :  { %v1244_v54 = vpop.eup %1243  ;;  %v154_v9 = vmul.f32 %v1242_v49, %v1450_v57  ;;  %v158_v11 = vand.u32 2147483648, %v1450_v57  ;;  %1255 = vrsqrt.f32 %v1489_v52  ;;  %vm219_vm10 = vcmp.eq.f32.partialorder %v1452_v63, inf }
  0x23   :  { %v1246_v56 = vpop.eup %1245  ;;  %v218_v12 = vmul.f32 %v1244_v54, %v1452_v63  ;;  %vm221_vm11 = vcmp.eq.f32.partialorder %v1452_v63, 0.0  ;;  %v222_v17 = vand.u32 2147483648, %v1452_v63  ;;  %vm226_vm12 = vcmp.eq.f32.partialorder %v1460_v10, inf }
  0x24   :  { %v1248_v60 = vpop.eup %1247  ;;  %v133_v18 = vmul.f32 %v1238_v40, %v1446_v50  ;;  %v140_v19 = vmul.f32 %v1240_v45, %v1448_v53  ;;  %1257 = vrsqrt.f32 %v1499_v59  ;;  %v147_v21 = vmul.f32 %v1246_v56, %v1454_v4 }
  0x25   :  { %v1250_v7 = vpop.eup %1249  ;;  %v225_v20 = vmul.f32 %v1248_v60, %v1460_v10  ;;  %vm228_vm13 = vcmp.eq.f32.partialorder %v1460_v10, 0.0  ;;  %1259 = vrsqrt.f32 %v1506_v62  ;;  %v156_v23 = vsel %vm155_vm8, %v1450_v57, %v154_v9 }
  0x26   :  { %v1252_v16 = vpop.eup %1251  ;;  %v239_v22 = vmul.f32 %v1250_v7, %v1465_v14  ;;  %v220_v24 = vsel %vm219_vm10, %v1452_v63, %v218_v12  ;;  %vm240_vm14 = vcmp.eq.f32.partialorder %v1465_v14, inf  ;;  %v229_v26 = vand.u32 2147483648, %v1460_v10 }
  0x27   :  { %v232_v25 = vmul.f32 %v1252_v16, %v1467_v15  ;;  %vm233_vm15 = vcmp.eq.f32.partialorder %v1467_v15, inf  ;;  %v236_v28 = vand.u32 2147483648, %v1467_v15  ;;  %vm242_vm0 = vcmp.eq.f32.partialorder %v1465_v14, 0.0 }
  0x28   :  { %v135_v29 = vsel %vm134_vm1, %v1446_v50, %v133_v18  ;;  %v142_v30 = vsel %vm141_vm2, %v1448_v53, %v140_v19  ;;  %v227_v31 = vsel %vm226_vm12, %v1460_v10, %v225_v20  ;;  %v243_v32 = vand.u32 2147483648, %v1465_v14 }
  0x29   :  { %v149_v33 = vsel %vm148_vm6, %v1454_v4, %v147_v21  ;;  %v159_v34 = vsel %vm157_vm9, %v158_v11, %v156_v23  ;;  %v1551_v35 = vsel %vm221_vm11, %v222_v17, %v220_v24  ;;  %v241_v36 = vsel %vm240_vm14, %v1465_v14, %v239_v22 }
  0x2a   :  { %v234_v37 = vsel %vm233_vm15, %v1467_v15, %v232_v25  ;;  %vm235_vm1 = vcmp.eq.f32.partialorder %v1467_v15, 0.0  ;;  %v1335_v38 = vmov 0.0   ;;  %v1563_v57 = vsel %vm136_vm4, %v137_v55, %v135_v29 }
  0x2b   :  { %v1559_v39 = vsel %vm33_vm3, 1.0, %v1335_v38  ;;  %v1567_v63 = vsel %vm143_vm5, %v144_v58, %v142_v30  ;;  %v1571_v40 = vsel %vm228_vm13, %v229_v26, %v227_v31  ;;  %vm2042_vm2 = vcmask 1040384  }
  0x2c   :  { %v1575_v15 = vsel %vm150_vm7, %v151_v61, %v149_v33  ;;  %v1578_v41 = vmul.f32 %v1559_v39, %v159_v34  ;;  %v244_v50 = vsel %vm242_vm0, %v243_v32, %v241_v36  ;;  %v341_v42 = vrot.slane %v1551_v35, 3 }
  0x2d   :  { %v1254_v53 = vpop.eup %1253  ;;  %v1583_v43 = vsel %vm235_vm1, %v236_v28, %v234_v37  ;;  %vm307_vm3 = vcmp.eq.f32.partialorder %v1487_v51, inf  ;;  %vm309_vm4 = vcmp.eq.f32.partialorder %v1487_v51, 0.0  ;;  %v310_v10 = vand.u32 2147483648, %v1487_v51 }
  0x2e   :  { %v306_v4 = vmul.f32 %v1254_v53, %v1487_v51  ;;  %vm314_vm5 = vcmp.eq.f32.partialorder %v1489_v52, inf  ;;  %vm316_vm6 = vcmp.eq.f32.partialorder %v1489_v52, 0.0  ;;  %v342_v14 = vrot.slane %v1571_v40, 3  ;;  %v77_v53 = vld [vmem:[%s2034_s1 + $0x8] sm:$0xff] }
  0x2f   :  { %v1256_v44 = vpop.eup %1255  ;;  %v1593_v45 = vmul.f32 %v1559_v39, %v244_v50  ;;  %v317_v46 = vand.u32 2147483648, %v1489_v52  ;;  %vm321_vm7 = vcmp.eq.f32.partialorder %v1499_v59, inf  ;;  %vm323_vm8 = vcmp.eq.f32.partialorder %v1499_v59, 0.0  ;;  %v76_v50 = vld [vmem:[%s2034_s1] sm:$0xff] }
  0x30   :  { %v308_v47 = vsel %vm307_vm3, %v1487_v51, %v306_v4  ;;  %v313_v48 = vmul.f32 %v1256_v44, %v1489_v52  ;;  %v343_v49 = vrot.slane %v1583_v43, 3  ;;  %v349_v54 = vadd.f32 %v341_v42, %v1563_v57  ;;  %v79_v4 = vld [vmem:[%s2034_s1 + $0x18] sm:$0xff] }
  0x31   :  { %v1258_v55 = vpop.eup %1257  ;;  %v1606_v56 = vsel %vm309_vm4, %v310_v10, %v308_v47  ;;  %v324_v58 = vand.u32 2147483648, %v1499_v59  ;;  %vm328_vm9 = vcmp.eq.f32.partialorder %v1506_v62, inf  ;;  %v331_v60 = vand.u32 2147483648, %v1506_v62  ;;  %v78_v10 = vld [vmem:[%s2034_s1 + $0x10] sm:$0xff] }
  0x32   :  { %v1260_v61 = vpop.eup %1259  ;;  %v315_v7 = vsel %vm314_vm5, %v1489_v52, %v313_v48  ;;  %v320_v9 = vmul.f32 %v1258_v55, %v1499_v59  ;;  %v350_v11 = vadd.f32 %v342_v14, %v1567_v63  ;;  %v357_v51 = vrot.slane %v1606_v56, 6  ;;  %v80_v48 = vld [vmem:[%s2034_s1 + $0x20] sm:$0x1] }
  0x33   :  { %v1621_v12 = vsel %vm316_vm6, %v317_v46, %v315_v7  ;;  %v327_v16 = vmul.f32 %v1260_v61, %v1506_v62  ;;  %vm330_vm10 = vcmp.eq.f32.partialorder %v1506_v62, 0.0  ;;  %v344_v17 = vrot.slane %v1593_v45, 3 }
  0x34   :  { %v322_v18 = vsel %vm321_vm7, %v1499_v59, %v320_v9  ;;  %v351_v19 = vadd.f32 %v343_v49, %v1575_v15  ;;  %v358_v20 = vrot.slane %v1621_v12, 6  ;;  %v365_v21 = vadd.f32 %v357_v51, %v349_v54  ;;  %v81_v54 = vld [vmem:[%s2034_s1 + $0x28] sm:$0x1] }
  0x35   :  { %v1635_v52 = vsel %vm323_vm8, %v324_v58, %v322_v18  ;;  %v329_v22 = vsel %vm328_vm9, %v1506_v62, %v327_v16  ;;  %v352_v29 = vadd.f32 %v344_v17, %v1578_v41  ;;  %v798_v44 = vsub.f32 %v1389_v0, %v76_v50  ;;  %v82_v58 = vld [vmem:[%s2034_s1 + $0x30] sm:$0x1]  ;;  %v83_v0 = vld [vmem:[%s2034_s1 + $0x38] sm:$0x1] }
  0x36   :  { %v332_v23 = vsel %vm330_vm10, %v331_v60, %v329_v22  ;;  %v359_v24 = vrot.slane %v1635_v52, 6  ;;  %v366_v25 = vadd.f32 %v358_v20, %v350_v11  ;;  %v370_v26 = vsel %vm2042_vm2, %v365_v21, 0.0 }
  0x37   :  { %v1643_v28 = vmul.f32 %v1559_v39, %v332_v23  ;;  %v799_v46 = vsub.f32 %v1394_v1, %v77_v53  ;;  %v800_v47 = vsub.f32 %v1410_v5, %v78_v10  ;;  %v801_v55 = vsub.f32 %v1399_v2, %v79_v4 }
  0x38   :  { %v367_v59 = vadd.f32 %v359_v24, %v351_v19  ;;  %v371_v30 = vsel %vm2042_vm2, %v366_v25, 0.0  ;;  %v862_v1 = vsub.f32 %v1404_v3, %v80_v48  ;;  %v863_v5 = vsub.f32 %v1415_v6, %v81_v54 }
  0x39   :  { %v360_v31 = vrot.slane %v1643_v28, 6  ;;  %v372_v32 = vadd.f32 %v371_v30, %v370_v26  ;;  %v802_v60 = vmul.f32 %v798_v44, %v798_v44  ;;  %v803_v61 = vmul.f32 %v799_v46, %v799_v46 }
  0x3a   :  { %v373_v62 = vsel %vm2042_vm2, %v367_v59, 0.0  ;;  %v804_v7 = vmul.f32 %v800_v47, %v800_v47  ;;  %v864_v9 = vsub.f32 %v1421_v8, %v82_v58  ;;  %v805_v11 = vmul.f32 %v801_v55, %v801_v55 }
  0x3b   :  { %v368_v33 = vadd.f32 %v360_v31, %v352_v29  ;;  %v374_v34 = vadd.f32 %v373_v62, %v372_v32  ;;  %v865_v2 = vsub.f32 %v1430_v13, %v83_v0  ;;  %v866_v51 = vmul.f32 %v862_v1, %v862_v1 }
  0x3c   :  { %v867_v16 = vmul.f32 %v863_v5, %v863_v5  ;;  %v810_v18 = vrot.slane %v802_v60, 1  ;;  %v811_v19 = vrot.slane %v803_v61, 1  ;;  %v812_v20 = vrot.slane %v804_v7, 1 }
  0x3d   :  { %v375_v36 = vsel %vm2042_vm2, %v368_v33, 0.0  ;;  %v822_v21 = vrot.slane %v802_v60, 2  ;;  %v813_v22 = vrot.slane %v805_v11, 1  ;;  %v823_v23 = vrot.slane %v803_v61, 2 }
  0x3e   :  { %v376_v37 = vadd.f32 %v375_v36, %v374_v34  ;;  %v824_v24 = vrot.slane %v804_v7, 2  ;;  %v825_v3 = vrot.slane %v805_v11, 2  ;;  %v818_v25 = vadd.f32 %v810_v18, %v802_v60 }
  0x3f   :  { %v819_v6 = vadd.f32 %v811_v19, %v803_v61  ;;  %v820_v26 = vadd.f32 %v812_v20, %v804_v7  ;;  %v868_v29 = vmul.f32 %v864_v9, %v864_v9  ;;  %v821_v59 = vadd.f32 %v813_v22, %v805_v11 }
  0x40   :  { %377 = vadd.xlane.f32.xlu0 %v376_v37  ;;  %v869_v30 = vmul.f32 %v865_v2, %v865_v2  ;;  %v874_v8 = vrot.slane %v866_v51, 2  ;;  %v875_v31 = vrot.slane %v867_v16, 2  ;;  %v830_v32 = vadd.f32 %v822_v21, %v818_v25 }
  0x41   :  { %v831_v13 = vadd.f32 %v823_v23, %v819_v6  ;;  %v832_v62 = vadd.f32 %v824_v24, %v820_v26  ;;  %v1684_v33 = vadd.f32 %v825_v3, %v821_v59  ;;  %v876_v34 = vrot.slane %v868_v29, 2 }
  0x42   :  { %1261 = vrsqrt.f32 %v830_v32  ;;  %v877_v36 = vrot.slane %v869_v30, 2  ;;  %v1686_v37 = vadd.f32 %v874_v8, %v818_v25  ;;  %v1688_v50 = vadd.f32 %v875_v31, %v819_v6 }
  0x43   :  { %1263 = vrsqrt.f32 %v831_v13  ;;  %v1691_v53 = vadd.f32 %v876_v34, %v820_v26  ;;  %vm836_vm11 = vcmp.eq.f32.partialorder %v830_v32, inf  ;;  %vm838_vm12 = vcmp.eq.f32.partialorder %v830_v32, 0.0 }
  0x44   :  { %1265 = vrsqrt.f32 %v832_v62  ;;  %v1693_v10 = vadd.f32 %v877_v36, %v821_v59  ;;  %v839_v4 = vand.u32 2147483648, %v830_v32  ;;  %vm843_vm13 = vcmp.eq.f32.partialorder %v831_v13, inf }
  0x45   :  { %1267 = vrsqrt.f32 %v1684_v33  ;;  %vm845_vm14 = vcmp.eq.f32.partialorder %v831_v13, 0.0  ;;  %v846_v44 = vand.u32 2147483648, %v831_v13  ;;  %vm850_vm15 = vcmp.eq.f32.partialorder %v832_v62, inf }
  0x46   :  { %1269 = vrsqrt.f32 %v1686_v37  ;;  %vm852_vm0 = vcmp.eq.f32.partialorder %v832_v62, 0.0  ;;  %v853_v46 = vand.u32 2147483648, %v832_v62  ;;  %vm857_vm1 = vcmp.eq.f32.partialorder %v1684_v33, inf }
  0x47   :  { %1271 = vrsqrt.f32 %v1688_v50  ;;  %vm859_vm3 = vcmp.eq.f32.partialorder %v1684_v33, 0.0  ;;  %v860_v48 = vand.u32 2147483648, %v1684_v33  ;;  %vm888_vm4 = vcmp.eq.f32.partialorder %v1686_v37, inf }
  0x48   :  { %1273 = vrsqrt.f32 %v1691_v53  ;;  %vm890_vm5 = vcmp.eq.f32.partialorder %v1686_v37, 0.0  ;;  %v891_v54 = vand.u32 2147483648, %v1686_v37  ;;  %vm895_vm6 = vcmp.eq.f32.partialorder %v1688_v50, inf }
  0x49   :  { %1275 = vrsqrt.f32 %v1693_v10  ;;  %vm897_vm7 = vcmp.eq.f32.partialorder %v1688_v50, 0.0  ;;  %v898_v0 = vand.u32 2147483648, %v1688_v50  ;;  %vm902_vm8 = vcmp.eq.f32.partialorder %v1691_v53, inf }
  0x4a   :  { %vm904_vm9 = vcmp.eq.f32.partialorder %v1691_v53, 0.0  ;;  %v905_v60 = vand.u32 2147483648, %v1691_v53  ;;  %vm909_vm10 = vcmp.eq.f32.partialorder %v1693_v10, inf  ;;  %vm911_vm2 = vcmp.eq.f32.partialorder %v1693_v10, 0.0 }
  0x4b   :  { %v912_v18 = vand.u32 2147483648, %v1693_v10 }
  0x4f   :  { %v1262_v47 = vpop.eup %1261 }
  0x50   :  { %v1264_v55 = vpop.eup %1263  ;;  %v835_v58 = vmul.f32 %v1262_v47, %v830_v32 }
  0x51   :  { %v1266_v1 = vpop.eup %1265  ;;  %v842_v5 = vmul.f32 %v1264_v55, %v831_v13 }
  0x52   :  { %v1268_v61 = vpop.eup %1267  ;;  %v837_v7 = vsel %vm836_vm11, %v830_v32, %v835_v58  ;;  %v849_v9 = vmul.f32 %v1266_v1, %v832_v62  ;;  %vm2043_vm11 = vcmask 1040384  }
  0x53   :  { %v1270_v11 = vpop.eup %1269  ;;  %v1715_v2 = vsel %vm838_vm12, %v839_v4, %v837_v7  ;;  %v844_v51 = vsel %vm843_vm13, %v831_v13, %v842_v5  ;;  %v856_v16 = vmul.f32 %v1268_v61, %v1684_v33  ;;  %vm2044_vm12 = vmmov %vm2043_vm11 }
  0x54   :  { %v1272_v19 = vpop.eup %1271  ;;  %v847_v20 = vsel %vm845_vm14, %v846_v44, %v844_v51  ;;  %v851_v21 = vsel %vm850_vm15, %v832_v62, %v849_v9  ;;  %v918_v22 = vrot.slane %v1715_v2, 3  ;;  %v887_v23 = vmul.f32 %v1270_v11, %v1686_v37  ;;  %vm2045_vm13 = vmmov %vm2043_vm11 }
  0x55   :  { %v1274_v24 = vpop.eup %1273  ;;  %v854_v3 = vsel %vm852_vm0, %v853_v46, %v851_v21  ;;  %v858_v25 = vsel %vm857_vm1, %v1684_v33, %v856_v16  ;;  %v919_v6 = vrot.slane %v847_v20, 3  ;;  %v894_v26 = vmul.f32 %v1272_v19, %v1688_v50  ;;  %vm2046_vm14 = vmmov %vm2043_vm11 }
  0x56   :  { %v1276_v29 = vpop.eup %1275  ;;  %v861_v59 = vsel %vm859_vm3, %v860_v48, %v858_v25  ;;  %v920_v30 = vrot.slane %v854_v3, 3  ;;  %v926_v8 = vsub.f32 %v1715_v2, %v918_v22  ;;  %v889_v31 = vsel %vm888_vm4, %v1686_v37, %v887_v23 }
  0x57   :  { %v921_v32 = vrot.slane %v861_v59, 3  ;;  %v927_v13 = vsub.f32 %v847_v20, %v919_v6  ;;  %v892_v62 = vsel %vm890_vm5, %v891_v54, %v889_v31  ;;  %v896_v34 = vsel %vm895_vm6, %v1688_v50, %v894_v26 }
  0x58   :  { %v928_v36 = vsub.f32 %v854_v3, %v920_v30  ;;  %v930_v4 = vand.u32 2147483647, %v926_v8  ;;  %v899_v33 = vsel %vm897_vm7, %v898_v0, %v896_v34  ;;  %v901_v44 = vmul.f32 %v1274_v24, %v1691_v53 }
  0x59   :  { %v929_v46 = vsub.f32 %v861_v59, %v921_v32  ;;  %v931_v47 = vand.u32 2147483647, %v927_v13  ;;  %v908_v48 = vmul.f32 %v1276_v29, %v1693_v10  ;;  %v959_v55 = vrot.slane %v892_v62, 3 }
  0x5a   :  { %v932_v58 = vand.u32 2147483647, %v928_v36  ;;  %v938_v37 = vsel %vm2043_vm11, %v930_v4, 0.0  ;;  %v903_v54 = vsel %vm902_vm8, %v1691_v53, %v901_v44  ;;  %v960_v1 = vrot.slane %v899_v33, 3 }
  0x5b   :  { %v933_v5 = vand.u32 2147483647, %v929_v46  ;;  %v939_v61 = vsel %vm2044_vm12, %v931_v47, 0.0  ;;  %v906_v50 = vsel %vm904_vm9, %v905_v60, %v903_v54  ;;  %v910_v0 = vsel %vm909_vm10, %v1693_v10, %v908_v48 }
  0x5c   :  { %v940_v7 = vadd.f32 %v939_v61, %v938_v37  ;;  %v941_v9 = vsel %vm2045_vm13, %v932_v58, 0.0  ;;  %v913_v11 = vsel %vm911_vm2, %v912_v18, %v910_v0  ;;  %v961_v51 = vrot.slane %v906_v50, 3  ;;  %vm2047_vm2 = vmmov %vm2043_vm11 }
  0x5d   :  { %v937_v16 = vmul.f32 %v1559_v39, %v933_v5  ;;  %v962_v19 = vrot.slane %v913_v11, 3  ;;  %v967_v21 = vsub.f32 %v1715_v2, %v959_v55  ;;  %v968_v22 = vsub.f32 %v847_v20, %v960_v1  ;;  %vm2048_vm15 = vmmov %vm2047_vm2 }
  0x5e   :  { %v942_v23 = vadd.f32 %v941_v9, %v940_v7  ;;  %v969_v53 = vsub.f32 %v854_v3, %v961_v51  ;;  %v1009_v60 = vrot.slane %v1715_v2, 2  ;;  %v1010_v24 = vrot.slane %v847_v20, 2  ;;  %vm2049_vm0 = vmmov %vm2047_vm2 }
  0x5f   :  { %v943_v25 = vsel %vm2046_vm14, %v937_v16, 0.0  ;;  %v970_v6 = vsub.f32 %v861_v59, %v962_v19  ;;  %v971_v26 = vand.u32 2147483647, %v967_v21  ;;  %v972_v29 = vand.u32 2147483647, %v968_v22  ;;  %vm2050_vm1 = vmmov %vm2049_vm0 }
  0x60   :  { %v944_v30 = vadd.f32 %v943_v25, %v942_v23  ;;  %v973_v10 = vand.u32 2147483647, %v969_v53  ;;  %v1011_v18 = vrot.slane %v854_v3, 2  ;;  %v1012_v8 = vrot.slane %v861_v59, 2  ;;  %vm2051_vm3 = vmmov %vm2049_vm0 }
  0x61   :  { %v974_v31 = vand.u32 2147483647, %v970_v6  ;;  %v983_v32 = vrot.slane %v971_v26, 3  ;;  %v984_v13 = vrot.slane %v972_v29, 3  ;;  %v1017_v34 = vsub.f32 %v892_v62, %v1009_v60  ;;  %vm2052_vm4 = vmmov %vm2049_vm0 }
  0x62   :  { %945 = vadd.xlane.f32.xlu0 %v944_v30  ;;  %v985_v36 = vrot.slane %v973_v10, 3  ;;  %v1018_v4 = vsub.f32 %v899_v33, %v1010_v24  ;;  %v1019_v44 = vsub.f32 %v906_v50, %v1011_v18  ;;  %v1020_v46 = vsub.f32 %v913_v11, %v1012_v8  ;;  %vm2053_vm5 = vmmov %vm2049_vm0 }
  0x63   :  { %v978_v2 = vmul.f32 %v1559_v39, %v974_v31  ;;  %v991_v20 = vsel %vm2047_vm2, %v983_v32, 0.0  ;;  %v992_v47 = vsel %vm2048_vm15, %v984_v13, 0.0  ;;  %v1021_v48 = vand.u32 2147483647, %v1017_v34  ;;  %vm2054_vm6 = vmmov %vm2049_vm0 }
  0x64   :  { %v993_v55 = vadd.f32 %v992_v47, %v991_v20  ;;  %v994_v3 = vsel %vm2049_vm0, %v985_v36, 0.0  ;;  %v1022_v59 = vand.u32 2147483647, %v1018_v4  ;;  %v1023_v58 = vand.u32 2147483647, %v1019_v44  ;;  %vm2055_vm7 = vmmov %vm2049_vm0 }
  0x65   :  { %v986_v37 = vrot.slane %v978_v2, 3  ;;  %v1024_v54 = vand.u32 2147483647, %v1020_v46  ;;  %v1033_v62 = vrot.slane %v1021_v48, 6  ;;  %v416_v1 = vrot.slane %v1606_v56, 3  ;;  %vm2056_vm8 = vmmov %vm2049_vm0 }
  0x66   :  { %v995_v33 = vadd.f32 %v994_v3, %v993_v55  ;;  %v1034_v5 = vrot.slane %v1022_v59, 6  ;;  %v1035_v61 = vrot.slane %v1023_v58, 6  ;;  %v417_v50 = vrot.slane %v1621_v12, 3  ;;  %vm2057_vm9 = vmmov %vm2049_vm0 }
  0x67   :  { %v996_v0 = vsel %vm2050_vm1, %v986_v37, 0.0  ;;  %v1028_v7 = vmul.f32 %v1559_v39, %v1024_v54  ;;  %v1041_v9 = vsel %vm2051_vm3, %v1033_v62, 0.0  ;;  %v418_v11 = vrot.slane %v1635_v52, 3  ;;  %vm2058_vm10 = vmmov %vm2049_vm0 }
  0x68   :  { %v997_v51 = vadd.f32 %v996_v0, %v995_v33  ;;  %v1042_v16 = vsel %vm2052_vm4, %v1034_v5, 0.0  ;;  %v1044_v19 = vsel %vm2053_vm5, %v1035_v61, 0.0  ;;  %v419_v21 = vrot.slane %v1643_v28, 3  ;;  %vm2059_vm11 = vmmov %vm2049_vm0 }
  0x69   :  { %v1036_v22 = vrot.slane %v1028_v7, 6  ;;  %v1043_v23 = vadd.f32 %v1042_v16, %v1041_v9  ;;  %v424_v53 = vsub.f32 %v1551_v35, %v416_v1  ;;  %v425_v60 = vsub.f32 %v1571_v40, %v417_v50  ;;  %vm2060_vm12 = vmmov %vm2049_vm0 }
  0x6a   :  { %998 = vadd.xlane.f32.xlu1 %v997_v51  ;;  %v426_v24 = vsub.f32 %v1583_v43, %v418_v11  ;;  %v427_v25 = vsub.f32 %v1593_v45, %v419_v21  ;;  %v387_v6 = vsub.f32 %v1563_v57, %v341_v42  ;;  %v388_v26 = vsub.f32 %v1567_v63, %v342_v14  ;;  %vm2061_vm13 = vmmov %vm2049_vm0 }
  0x6b   :  { %v1045_v29 = vadd.f32 %v1044_v19, %v1043_v23  ;;  %v1046_v30 = vsel %vm2054_vm6, %v1036_v22, 0.0  ;;  %v428_v10 = vand.u32 2147483647, %v424_v53  ;;  %v429_v18 = vand.u32 2147483647, %v425_v60  ;;  %vm2062_vm14 = vmmov %vm2049_vm0 }
  0x6c   :  { %v430_v8 = vand.u32 2147483647, %v426_v24  ;;  %v431_v31 = vand.u32 2147483647, %v427_v25  ;;  %v389_v32 = vsub.f32 %v1575_v15, %v343_v49  ;;  %v390_v13 = vsub.f32 %v1578_v41, %v344_v17  ;;  %vm2063_vm2 = vmmov %vm2049_vm0 }
  0x6d   :  { %v1047_v42 = vadd.f32 %v1046_v30, %v1045_v29  ;;  %v440_v34 = vrot.slane %v428_v10, 3  ;;  %v441_v36 = vrot.slane %v429_v18, 3  ;;  %v391_v4 = vand.u32 2147483647, %v387_v6  ;;  %vm2064_vm15 = vmmov %vm2049_vm0 }
  0x6e   :  { %v435_v14 = vmul.f32 %v1559_v39, %v431_v31  ;;  %v442_v44 = vrot.slane %v430_v8, 3  ;;  %v392_v46 = vand.u32 2147483647, %v388_v26  ;;  %v393_v2 = vand.u32 2147483647, %v389_v32  ;;  %vm2065_vm1 = vmmov %vm2049_vm0 }
  0x6f   :  { %1048 = vadd.xlane.f32.xlu0 %v1047_v42  ;;  %v448_v20 = vsel %vm2055_vm7, %v440_v34, 0.0  ;;  %v449_v47 = vsel %vm2056_vm8, %v441_v36, 0.0  ;;  %v394_v48 = vand.u32 2147483647, %v390_v13  ;;  %v399_v49 = vsel %vm2057_vm9, %v391_v4, 0.0 }
  0x70   :  { %v443_v55 = vrot.slane %v435_v14, 3  ;;  %v450_v3 = vadd.f32 %v449_v47, %v448_v20  ;;  %v451_v17 = vsel %vm2058_vm10, %v442_v44, 0.0  ;;  %v400_v59 = vsel %vm2059_vm11, %v392_v46, 0.0  ;;  %v637_v46 = vld [vmem:[%s2035_s2] sm:$0x3f] }
  0x71   :  { %v398_v58 = vmul.f32 %v1559_v39, %v394_v48  ;;  %v401_v37 = vadd.f32 %v400_v59, %v399_v49  ;;  %v402_v54 = vsel %vm2060_vm12, %v393_v2, 0.0  ;;  %v470_v62 = vrot.slane %v1563_v57, 2  ;;  %v638_v20 = vld [vmem:[%s2035_s2 + $0x8] sm:$0x3f]  ;;  %v639_v47 = vld [vmem:[%s2035_s2 + $0x10] sm:$0x3f] }
  0x72   :  { %v452_v1 = vadd.f32 %v451_v17, %v450_v3  ;;  %v453_v33 = vsel %vm2061_vm13, %v443_v55, 0.0  ;;  %v471_v5 = vrot.slane %v1567_v63, 2  ;;  %v472_v61 = vrot.slane %v1575_v15, 2  ;;  %v640_v48 = vld [vmem:[%s2035_s2 + $0x18] sm:$0x3f] }
  0x73   :  { %v403_v50 = vadd.f32 %v402_v54, %v401_v37  ;;  %v404_v0 = vsel %vm2062_vm14, %v398_v58, 0.0  ;;  %v473_v7 = vrot.slane %v1578_v41, 2  ;;  %v478_v9 = vsub.f32 %v1606_v56, %v470_v62  ;;  %v641_v55 = vld [vmem:[%s2035_s2 + $0x20] sm:$0x3f]  ;;  %v642_v17 = vld [vmem:[%s2035_s2 + $0x28] sm:$0x3f] }
  0x74   :  { %v454_v11 = vadd.f32 %v453_v33, %v452_v1  ;;  %v479_v51 = vsub.f32 %v1621_v12, %v471_v5  ;;  %v480_v16 = vsub.f32 %v1635_v52, %v472_v61  ;;  %v649_v49 = vrot.slane %v637_v46, 3 }
  0x75   :  { %v405_v19 = vadd.f32 %v404_v0, %v403_v50  ;;  %v481_v21 = vsub.f32 %v1643_v28, %v473_v7  ;;  %v482_v22 = vand.u32 2147483647, %v478_v9  ;;  %v650_v3 = vrot.slane %v638_v20, 3 }
  0x76   :  { %455 = vadd.xlane.f32.xlu1 %v454_v11  ;;  %v483_v23 = vand.u32 2147483647, %v479_v51  ;;  %v484_v53 = vand.u32 2147483647, %v480_v16  ;;  %v651_v59 = vrot.slane %v639_v47, 3  ;;  %v652_v58 = vrot.slane %v640_v48, 3 }
  0x77   :  { %406 = vadd.xlane.f32.xlu0 %v405_v19  ;;  %v485_v60 = vand.u32 2147483647, %v481_v21  ;;  %v494_v24 = vrot.slane %v482_v22, 6  ;;  %v653_v37 = vrot.slane %v641_v55, 3  ;;  %v661_v54 = vsub.f32 %v637_v46, %v649_v49 }
  0x78   :  { %v495_v25 = vrot.slane %v483_v23, 6  ;;  %v496_v6 = vrot.slane %v484_v53, 6  ;;  %v654_v62 = vrot.slane %v642_v17, 3  ;;  %v662_v1 = vsub.f32 %v638_v20, %v650_v3  ;;  %v1064_v3 = vld [vmem:[%s2036_s3 + $0x18] sm:$0x1] }
  0x79   :  { %v489_v26 = vmul.f32 %v1559_v39, %v485_v60  ;;  %v502_v29 = vsel %vm2063_vm2, %v494_v24, 0.0  ;;  %v663_v33 = vsub.f32 %v639_v47, %v651_v59  ;;  %v664_v5 = vsub.f32 %v640_v48, %v652_v58  ;;  %vm2066_vm2 = vmmov %vm2049_vm0 }
  0x7a   :  { %v503_v30 = vsel %vm2064_vm15, %v495_v25, 0.0  ;;  %v505_v10 = vsel %vm2049_vm0, %v496_v6, 0.0  ;;  %v665_v61 = vsub.f32 %v641_v55, %v653_v37  ;;  %v667_v50 = vmul.f32 %v661_v54, %v661_v54  ;;  %v1063_v55 = vld [vmem:[%s2036_s3 + $0x10] sm:$0x1]  ;;  %vm2067_vm15 = vmmov %vm2049_vm0 }
  0x7b   :  { %v497_v18 = vrot.slane %v489_v26, 6  ;;  %v504_v8 = vadd.f32 %v503_v30, %v502_v29  ;;  %v666_v0 = vsub.f32 %v642_v17, %v654_v62  ;;  %v668_v7 = vmul.f32 %v662_v1, %v662_v1 }
  0x7c   :  { %v669_v9 = vmul.f32 %v663_v33, %v663_v33  ;;  %v670_v11 = vmul.f32 %v664_v5, %v664_v5  ;;  %v671_v51 = vmul.f32 %v665_v61, %v665_v61  ;;  %v679_v16 = vrot.slane %v667_v50, 1 }
  0x7d   :  { %v506_v31 = vadd.f32 %v505_v10, %v504_v8  ;;  %v507_v32 = vsel %vm2065_vm1, %v497_v18, 0.0  ;;  %v672_v19 = vmul.f32 %v666_v0, %v666_v0  ;;  %v680_v21 = vrot.slane %v668_v7, 1  ;;  %vm2068_vm1 = vmmov %vm2049_vm0 }
  0x7e   :  { %v681_v22 = vrot.slane %v669_v9, 1  ;;  %v682_v23 = vrot.slane %v670_v11, 1  ;;  %v683_v53 = vrot.slane %v671_v51, 1  ;;  %v691_v60 = vadd.f32 %v679_v16, %v667_v50 }
  0x7f   :  { %v508_v13 = vadd.f32 %v507_v32, %v506_v31  ;;  %v697_v24 = vrot.slane %v667_v50, 2  ;;  %v684_v25 = vrot.slane %v672_v19, 1  ;;  %v692_v6 = vadd.f32 %v680_v21, %v668_v7 }
  0x80   :  { %v698_v26 = vrot.slane %v668_v7, 2  ;;  %v693_v29 = vadd.f32 %v681_v22, %v669_v9  ;;  %v699_v30 = vrot.slane %v669_v9, 2  ;;  %v694_v10 = vadd.f32 %v682_v23, %v670_v11 }
  0x81   :  { %509 = vadd.xlane.f32.xlu1 %v508_v13  ;;  %v700_v18 = vrot.slane %v670_v11, 2  ;;  %v695_v8 = vadd.f32 %v683_v53, %v671_v51  ;;  %v701_v31 = vrot.slane %v671_v51, 2  ;;  %v1832_v32 = vadd.f32 %v697_v24, %v691_v60  ;;  %v1837_v13 = vld [vmem:[%s2036_s3] sm:$0xff] }
  0x82   :  { %v1093_v46 = vrot.slane %v1837_v13, 5 }
  0x83   :  { %v1852_v20 = vadd.f32 %v701_v31, %v695_v8  ;;  %1277 = vrsqrt.f32 %v1832_v32  ;;  %vm717_vm3 = vcmp.eq.f32.partialorder %v1832_v32, inf  ;;  %vm719_vm4 = vcmp.eq.f32.partialorder %v1832_v32, 0.0 }
  0x84   :  { %v1097_v48 = vmul.f32 %v1093_v46, %v1837_v13  ;;  %v1107_v58 = vmul.f32 %v1093_v46, %v1063_v55  ;;  %v720_v51 = vand.u32 2147483648, %v1832_v32  ;;  %v1914_v55 = vadd.s32 640, %v1482_v27 }
  0x85   :  { %vm745_vm11 = vcmp.eq.f32.partialorder %v1852_v20, inf  ;;  %vm747_vm13 = vcmp.eq.f32.partialorder %v1852_v20, 0.0 }
  0x86   :  { %v1101_v17 = vrot.slane %v1097_v48, 1  ;;  %v1111_v1 = vrot.slane %v1107_v58, 2 }
  0x88   :  { %v1105_v54 = vadd.f32 %v1101_v17, %v1097_v48 }
  0x8a   :  { %v1115_v0 = vadd.f32 %v1111_v1, %v1105_v54 }
  0x8c   :  { %v1117_v22 = vmin.f32 %v1115_v0, -0.1 }
  0x90   :  { %v1278_v5 = vpop.eup %1277 }
  0x91   :  { %v716_v21 = vmul.f32 %v1278_v5, %v1832_v32 }
  0xc9   :  { %v378_v42 = vpop.xlane.xlu0 %377 }
  0xca   :  { %v379_v34 = vrot.slane %v378_v42, 4 }
  0xcc   :  { %v380_v36 = vadd.f32 %v379_v34, %v378_v42  ;;  %v1842_v42 = vld [vmem:[%s2036_s3 + $0x8] sm:$0xff]  ;;  %v696_v34 = vadd.f32 %v684_v25, %v672_v19 }
  0xcd   :  { %v1068_v17 = vrot.slane %v1842_v42, 3 }
  0xce   :  { %v381_v4 = vrot.slane %v380_v36, 2 }
  0xd0   :  { %v382_v14 = vadd.f32 %v381_v4, %v380_v36  ;;  %v702_v36 = vrot.slane %v672_v19, 2  ;;  %v1844_v4 = vadd.f32 %v698_v26, %v692_v6 }
  0xd2   :  { %v383_v44 = vrot.slane %v382_v14, 1  ;;  %v1855_v47 = vadd.f32 %v702_v36, %v696_v34  ;;  %1279 = vrsqrt.f32 %v1844_v4  ;;  %vm724_vm5 = vcmp.eq.f32.partialorder %v1844_v4, inf }
  0xd3   :  { %vm726_vm6 = vcmp.eq.f32.partialorder %v1844_v4, 0.0  ;;  %v727_v19 = vand.u32 2147483648, %v1844_v4  ;;  %v748_v36 = vand.u32 2147483648, %v1852_v20 }
  0xd4   :  { %v384_v2 = vadd.f32 %v383_v44, %v382_v14  ;;  %v1846_v14 = vadd.f32 %v699_v30, %v693_v29  ;;  %v1848_v44 = vadd.f32 %v700_v18, %v694_v10  ;;  %vm752_vm12 = vcmp.eq.f32.partialorder %v1855_v47, inf }
  0xd5   :  { %v1067_v30 = vrot.slane %v1837_v13, 3  ;;  %v718_v10 = vsel %vm717_vm3, %v1832_v32, %v716_v21  ;;  %v1895_v18 = vand.u32 2147483647, %v1117_v22  ;;  %v755_v46 = vand.u32 2147483648, %v1855_v47  ;;  %vm2069_vm3 = vmmov %vm2049_vm0 }
  0xd6   :  { %1205 = vpush %v384_v2  ;;  %v1094_v2 = vrot.slane %v1842_v42, 5  ;;  %1281 = vrsqrt.f32 %v1846_v14  ;;  %vm731_vm7 = vcmp.eq.f32.partialorder %v1846_v14, inf  ;;  %vm733_vm8 = vcmp.eq.f32.partialorder %v1846_v14, 0.0 }
  0xd7   :  { %1283 = vrsqrt.f32 %v1848_v44  ;;  %v734_v24 = vand.u32 2147483648, %v1846_v14  ;;  %vm738_vm9 = vcmp.eq.f32.partialorder %v1848_v44, inf  ;;  %vm740_vm10 = vcmp.eq.f32.partialorder %v1848_v44, 0.0 }
  0xd8   :  { %v1098_v49 = vmul.f32 %v1094_v2, %v1842_v42  ;;  %1285 = vrsqrt.f32 %v1852_v20  ;;  %v1108_v37 = vmul.f32 %v1094_v2, %v1064_v3  ;;  %v741_v29 = vand.u32 2147483648, %v1848_v44 }
  0xd9   :  { %1287 = vrsqrt.f32 %v1855_v47  ;;  %vm754_vm14 = vcmp.eq.f32.partialorder %v1855_v47, 0.0  ;;  %v721_v3 = vsel %vm719_vm4, %v720_v51, %v718_v10  ;;  %vm49_vm4 = vcmp.lt.s32.totalorder %v1914_v55, 705 }
  0xda   :  { %v1102_v59 = vrot.slane %v1098_v49, 1  ;;  %v1112_v33 = vrot.slane %v1108_v37, 2 }
  0xdc   :  { %v1106_v62 = vadd.f32 %v1102_v59, %v1098_v49  ;;  %v1920_v59 = vsub.f32 %v1837_v13, %v1067_v30 }
  0xde   :  { %v1116_v7 = vadd.f32 %v1112_v33, %v1106_v62 }
  0xdf   :  { %v1280_v61 = vpop.eup %1279 }
  0xe0   :  { %v1118_v23 = vmin.f32 %v1116_v7, -0.1  ;;  %v723_v53 = vmul.f32 %v1280_v61, %v1844_v4 }
  0xe2   :  { %v1897_v8 = vand.u32 2147483647, %v1118_v23  ;;  %v725_v31 = vsel %vm724_vm5, %v1844_v4, %v723_v53  ;;  %vm2070_vm5 = vmmov %vm2049_vm0 }
  0xe3   :  { %v1282_v50 = vpop.eup %1281  ;;  %v728_v58 = vsel %vm726_vm6, %v727_v19, %v725_v31  ;;  %vm2071_vm6 = vmmov %vm2049_vm0 }
  0xe4   :  { %v1284_v9 = vpop.eup %1283  ;;  %v730_v60 = vmul.f32 %v1282_v50, %v1846_v14  ;;  %v1126_v54 = vrot.slane %v1897_v8, 6  ;;  %v1073_v8 = vmul.f32 %v1920_v59, %v1920_v59 }
  0xe5   :  { %v1286_v11 = vpop.eup %1285  ;;  %v737_v25 = vmul.f32 %v1284_v9, %v1848_v44 }
  0xe6   :  { %v1288_v16 = vpop.eup %1287  ;;  %v744_v6 = vmul.f32 %v1286_v11, %v1852_v20  ;;  %v732_v34 = vsel %vm731_vm7, %v1846_v14, %v730_v60  ;;  %vm2072_vm7 = vmmov %vm2049_vm0 }
  0xe7   :  { %v751_v26 = vmul.f32 %v1288_v16, %v1855_v47  ;;  %v739_v2 = vsel %vm738_vm9, %v1848_v44, %v737_v25  ;;  %v735_v37 = vsel %vm733_vm8, %v734_v24, %v732_v34  ;;  %vm2073_vm8 = vmmov %vm2049_vm0 }
  0xe8   :  { %v746_v48 = vsel %vm745_vm11, %v1852_v20, %v744_v6  ;;  %v742_v32 = vsel %vm740_vm10, %v741_v29, %v739_v2  ;;  %vm2074_vm9 = vmmov %vm2049_vm0 }
  0xe9   :  { %v753_v49 = vsel %vm752_vm12, %v1855_v47, %v751_v26  ;;  %v1125_v47 = vrot.slane %v1895_v18, 6  ;;  %v1934_v62 = vsel %vm747_vm13, %v748_v36, %v746_v48  ;;  %vm2075_vm10 = vmmov %vm2049_vm0 }
  0xea   :  { %v1936_v13 = vsel %vm754_vm14, %v755_v46, %v753_v49  ;;  %vm2076_vm11 = vmmov %vm2049_vm0 }
  0xeb   :  { %v1972_v30 = vpop.xlane.xlu0 %945  ;;  %vm2077_vm12 = vmmov %vm2049_vm0 }
  0xec   :  { %vm2078_vm13 = vmmov %vm2049_vm0 }
  0xed   :  { %vm2079_vm14 = vmmov %vm2049_vm0 }
 0x107   :  { %s1206_s3 = spop %1205 }
 0x108   :  { %s386_s9 = smul.f32 0.00074074074, %s1206_s3 }
 0x10a   :  { %v1928_v27 = vstv %s386_s9 }
 0x10b   :  { %v521_v4 = vsub.f32 %v1563_v57, %v1928_v27  ;;  %v522_v14 = vsub.f32 %v1567_v63, %v1928_v27  ;;  %v523_v1 = vsub.f32 %v1575_v15, %v1928_v27  ;;  %v524_v33 = vsub.f32 %v1578_v41, %v1928_v27 }
 0x10c   :  { %v551_v44 = vsub.f32 %v1551_v35, %v1928_v27  ;;  %v552_v20 = vsub.f32 %v1571_v40, %v1928_v27  ;;  %v553_v5 = vsub.f32 %v1583_v43, %v1928_v27  ;;  %v554_v57 = vsub.f32 %v1593_v45, %v1928_v27 }
 0x10d   :  { %v525_v61 = vand.u32 2147483647, %v521_v4  ;;  %v526_v63 = vand.u32 2147483647, %v522_v14  ;;  %v527_v50 = vand.u32 2147483647, %v523_v1  ;;  %v593_v15 = vsub.f32 %v1606_v56, %v1928_v27 }
 0x10e   :  { %v528_v0 = vand.u32 2147483647, %v524_v33  ;;  %v555_v41 = vand.u32 2147483647, %v551_v44  ;;  %v556_v7 = vand.u32 2147483647, %v552_v20  ;;  %v594_v35 = vsub.f32 %v1621_v12, %v1928_v27 }
 0x10f   :  { %v533_v40 = vsel %vm2066_vm2, %v525_v61, 0.0  ;;  %v534_v9 = vsel %vm2067_vm15, %v526_v63, 0.0  ;;  %v536_v43 = vsel %vm2049_vm0, %v527_v50, 0.0  ;;  %v557_v11 = vand.u32 2147483647, %v553_v5  ;;  %v1985_v63 = vpop.xlane.xlu1 %998  ;;  %vm2080_vm2 = vmmov %vm2049_vm0 }
 0x110   :  { %v532_v45 = vmul.f32 %v1559_v39, %v528_v0  ;;  %v535_v51 = vadd.f32 %v534_v9, %v533_v40  ;;  %v558_v16 = vand.u32 2147483647, %v554_v57  ;;  %v567_v19 = vrot.slane %v555_v41, 3  ;;  %v1990_v0 = vpop.xlane.xlu0 %1048  ;;  %vm2081_vm15 = vmmov %vm2049_vm0 }
 0x111   :  { %v568_v21 = vrot.slane %v556_v7, 3  ;;  %v569_v56 = vrot.slane %v557_v11, 3  ;;  %v595_v22 = vsub.f32 %v1635_v52, %v1928_v27  ;;  %v596_v12 = vsub.f32 %v1643_v28, %v1928_v27 }
 0x112   :  { %v537_v23 = vadd.f32 %v536_v43, %v535_v51  ;;  %v538_v53 = vsel %vm2068_vm1, %v532_v45, 0.0  ;;  %v562_v60 = vmul.f32 %v1559_v39, %v558_v16  ;;  %v575_v24 = vsel %vm2069_vm3, %v567_v19, 0.0  ;;  %vm2082_vm3 = vmmov %vm2049_vm0 }
 0x113   :  { %v576_v25 = vsel %vm2070_vm5, %v568_v21, 0.0  ;;  %v578_v6 = vsel %vm2071_vm6, %v569_v56, 0.0  ;;  %v597_v26 = vand.u32 2147483647, %v593_v15  ;;  %v598_v29 = vand.u32 2147483647, %v594_v35 }
 0x114   :  { %v539_v52 = vadd.f32 %v538_v53, %v537_v23  ;;  %v570_v10 = vrot.slane %v562_v60, 3  ;;  %v577_v28 = vadd.f32 %v576_v25, %v575_v24  ;;  %v599_v31 = vand.u32 2147483647, %v595_v22  ;;  %v407_v19 = vpop.xlane.xlu0 %406 }
 0x115   :  { %v600_v34 = vand.u32 2147483647, %v596_v12  ;;  %v609_v36 = vrot.slane %v597_v26, 6  ;;  %v610_v46 = vrot.slane %v598_v29, 6  ;;  %v757_v2 = vsub.f32 %v721_v3, %v1928_v27 }
 0x116   :  { %540 = vadd.xlane.f32.xlu0 %v539_v52  ;;  %v579_v48 = vadd.f32 %v578_v6, %v577_v28  ;;  %v580_v49 = vsel %vm2072_vm7, %v570_v10, 0.0  ;;  %v611_v4 = vrot.slane %v599_v31, 6  ;;  %v758_v14 = vsub.f32 %v728_v58, %v1928_v27 }
 0x117   :  { %v604_v1 = vmul.f32 %v1559_v39, %v600_v34  ;;  %v617_v33 = vsel %vm2073_vm8, %v609_v36, 0.0  ;;  %v618_v44 = vsel %vm2074_vm9, %v610_v46, 0.0  ;;  %v759_v20 = vsub.f32 %v735_v37, %v1928_v27 }
 0x118   :  { %v581_v5 = vadd.f32 %v580_v49, %v579_v48  ;;  %v619_v57 = vadd.f32 %v618_v44, %v617_v33  ;;  %v760_v61 = vsub.f32 %v742_v32, %v1928_v27  ;;  %v1072_v3 = vsub.f32 %v1842_v42, %v1068_v17 }
 0x119   :  { %v612_v50 = vrot.slane %v604_v1, 6  ;;  %v620_v58 = vsel %vm2075_vm10, %v611_v4, 0.0  ;;  %v762_v39 = vsub.f32 %v1936_v13, %v1928_v27  ;;  %v763_v15 = vmul.f32 %v757_v2, %v757_v2 }
 0x11a   :  { %582 = vadd.xlane.f32.xlu1 %v581_v5  ;;  %v621_v37 = vadd.f32 %v620_v58, %v619_v57  ;;  %v761_v32 = vsub.f32 %v1934_v62, %v1928_v27  ;;  %v764_v41 = vmul.f32 %v758_v14, %v758_v14  ;;  %v765_v7 = vmul.f32 %v759_v20, %v759_v20 }
 0x11b   :  { %v622_v42 = vsel %vm2076_vm11, %v612_v50, 0.0  ;;  %v775_v17 = vsel %vm2077_vm12, %v763_v15, 0.0  ;;  %v1129_v35 = vsel %vm2078_vm13, %v1125_v47, 0.0  ;;  %v1130_v13 = vsel %vm2079_vm14, %v1126_v54, 0.0  ;;  %v456_v47 = vpop.xlane.xlu1 %455 }
 0x11c   :  { %v623_v40 = vadd.f32 %v622_v42, %v621_v37  ;;  %v766_v9 = vmul.f32 %v760_v61, %v760_v61  ;;  %v768_v43 = vmul.f32 %v762_v39, %v762_v39  ;;  %v776_v11 = vsel %vm2080_vm2, %v764_v41, 0.0 }
 0x11d   :  { %v1204_v27 = vsel %vm49_vm4, 1.0, %v1335_v38  ;;  %v777_v62 = vadd.f32 %v776_v11, %v775_v17  ;;  %v767_v45 = vmul.f32 %v761_v32, %v761_v32  ;;  %v778_v18 = vsel %vm2081_vm15, %v765_v7, 0.0  ;;  %vm2083_vm4 = vmmov %vm2049_vm0 }
 0x11e   :  { %624 = vadd.xlane.f32.xlu0 %v623_v40  ;;  %v1131_v51 = vadd.f32 %v1130_v13, %v1129_v35  ;;  %v457_v54 = vrot.slane %v456_v47, 4  ;;  %v774_v21 = vmul.f32 %v1204_v27, %v768_v43  ;;  %v780_v56 = vsel %vm2049_vm0, %v766_v9, 0.0 }
 0x11f   :  { %v779_v16 = vadd.f32 %v778_v18, %v777_v62  ;;  %v1074_v22 = vmul.f32 %v1072_v3, %v1072_v3  ;;  %v408_v12 = vrot.slane %v407_v19, 4  ;;  %vm1077_vm1 = vcmask 1042432   ;;  %v510_v36 = vpop.xlane.xlu1 %509 }
 0x120   :  { %v458_v38 = vadd.f32 %v457_v54, %v456_v47  ;;  %v782_v23 = vsel %vm2082_vm3, %v767_v45, 0.0  ;;  %v784_v25 = vsel %vm2083_vm4, %v774_v21, 0.0  ;;  %v1078_v6 = vsel %vm1077_vm1, %v1073_v8, 0.0 }
 0x121   :  { %v781_v55 = vadd.f32 %v780_v56, %v779_v16  ;;  %v409_v53 = vadd.f32 %v408_v12, %v407_v19  ;;  %v1079_v59 = vsel %vm1077_vm1, %v1074_v22, 0.0  ;;  %v511_v2 = vrot.slane %v510_v36, 4 }
 0x122   :  { %1132 = vadd.xlane.f32.xlu0 %v1131_v51  ;;  %v459_v24 = vrot.slane %v458_v38, 2  ;;  %v1080_v28 = vadd.f32 %v1079_v59, %v1078_v6  ;;  %v947_v15 = vrot.slane %v1972_v30, 4  ;;  %v1000_v7 = vrot.slane %v1985_v63, 4 }
 0x123   :  { %v783_v60 = vadd.f32 %v782_v23, %v781_v55  ;;  %v410_v26 = vrot.slane %v409_v53, 2  ;;  %v512_v49 = vadd.f32 %v511_v2, %v510_v36  ;;  %v1050_v42 = vrot.slane %v1990_v0, 4 }
 0x124   :  { %v460_v52 = vadd.f32 %v459_v24, %v458_v38  ;;  %v948_v9 = vadd.f32 %v947_v15, %v1972_v30  ;;  %v1001_v62 = vadd.f32 %v1000_v7, %v1985_v63 }
 0x125   :  { %v785_v29 = vadd.f32 %v784_v25, %v783_v60  ;;  %v411_v10 = vadd.f32 %v410_v26, %v409_v53  ;;  %v513_v4 = vrot.slane %v512_v49, 2  ;;  %v1051_v45 = vadd.f32 %v1050_v42, %v1990_v0 }
 0x126   :  { %v461_v31 = vrot.slane %v460_v52, 1  ;;  %v949_v47 = vrot.slane %v948_v9, 2  ;;  %v1002_v19 = vrot.slane %v1001_v62, 2 }
 0x127   :  { %786 = vadd.xlane.f32.xlu1 %v785_v29  ;;  %v412_v34 = vrot.slane %v411_v10, 1  ;;  %v514_v14 = vadd.f32 %v513_v4, %v512_v49  ;;  %v1052_v56 = vrot.slane %v1051_v45, 2 }
 0x128   :  { %v462_v46 = vadd.f32 %v461_v31, %v460_v52  ;;  %v950_v38 = vadd.f32 %v949_v47, %v948_v9  ;;  %v1003_v53 = vadd.f32 %v1002_v19, %v1001_v62 }
 0x129   :  { %v413_v48 = vadd.f32 %v412_v34, %v411_v10  ;;  %v515_v1 = vrot.slane %v514_v14, 1  ;;  %v1053_v0 = vadd.f32 %v1052_v56, %v1051_v45 }
 0x12a   :  { %v951_v6 = vrot.slane %v950_v38, 1  ;;  %v1004_v29 = vrot.slane %v1003_v53, 1 }
 0x12b   :  { %1081 = vadd.xlane.f32.xlu1 %v1080_v28  ;;  %1207 = vpush %v413_v48  ;;  %v516_v33 = vadd.f32 %v515_v1, %v514_v14  ;;  %v1054_v52 = vrot.slane %v1053_v0, 1 }
 0x12c   :  { %1209 = vpush %v462_v46  ;;  %v952_v31 = vadd.f32 %v951_v6, %v950_v38  ;;  %v1005_v36 = vadd.f32 %v1004_v29, %v1003_v53 }
 0x12d   :  { %1211 = vpush %v516_v33  ;;  %v1055_v2 = vadd.f32 %v1054_v52, %v1053_v0 }
 0x15c   :  { %s1208_s10 = spop %1207 }
 0x15d   :  { %s1210_s11 = spop %1209  ;;  %s415_s12 = smul.f32 0.0022222223, %s1208_s10 }
 0x15e   :  { %s464_s13 = smul.f32 0.0022222223, %s1210_s11  ;;  %s1212_s1 = spop %1211 }
 0x15f   :  { %s518_s15 = smul.f32 0.0022222223, %s1212_s1 }
 0x160   :  { %s465_s14 = sadd.f32 %s464_s13, %s415_s12 }
 0x162   :  { %s519_s17 = sadd.f32 %s518_s15, %s465_s14  ;;  %s1337_s15 = smov [#allocation4]  }
 0x19f   :  { %v541_v44 = vpop.xlane.xlu0 %540 }
 0x1a0   :  { %v542_v20 = vrot.slane %v541_v44, 4 }
 0x1a2   :  { %v543_v5 = vadd.f32 %v542_v20, %v541_v44 }
 0x1a3   :  { %v583_v57 = vpop.xlane.xlu1 %582 }
 0x1a4   :  { %v544_v61 = vrot.slane %v543_v5, 2  ;;  %v584_v3 = vrot.slane %v583_v57, 4 }
 0x1a6   :  { %v585_v50 = vadd.f32 %v584_v3, %v583_v57  ;;  %v545_v58 = vadd.f32 %v544_v61, %v543_v5 }
 0x1a7   :  { %v625_v39 = vpop.xlane.xlu0 %624 }
 0x1a8   :  { %v586_v37 = vrot.slane %v585_v50, 2  ;;  %v626_v32 = vrot.slane %v625_v39, 4  ;;  %v546_v41 = vrot.slane %v545_v58, 1 }
 0x1aa   :  { %v627_v17 = vadd.f32 %v626_v32, %v625_v39  ;;  %v547_v35 = vadd.f32 %v546_v41, %v545_v58  ;;  %v587_v13 = vadd.f32 %v586_v37, %v585_v50 }
 0x1ab   :  { %v1133_v40 = vpop.xlane.xlu0 %1132 }
 0x1ac   :  { %v628_v43 = vrot.slane %v627_v17, 2  ;;  %v1134_v11 = vrot.slane %v1133_v40, 4  ;;  %1213 = vpush %v547_v35  ;;  %v588_v27 = vrot.slane %v587_v13, 1 }
 0x1ae   :  { %v589_v18 = vadd.f32 %v588_v27, %v587_v13  ;;  %v629_v51 = vadd.f32 %v628_v43, %v627_v17  ;;  %v1135_v8 = vadd.f32 %v1134_v11, %v1133_v40 }
 0x1b0   :  { %v787_v16 = vpop.xlane.xlu1 %786  ;;  %1215 = vpush %v589_v18  ;;  %v630_v54 = vrot.slane %v629_v51, 1  ;;  %v1136_v12 = vrot.slane %v1135_v8, 2 }
 0x1b1   :  { %v788_v21 = vrot.slane %v787_v16, 4 }
 0x1b2   :  { %v631_v22 = vadd.f32 %v630_v54, %v629_v51  ;;  %v1137_v25 = vadd.f32 %v1136_v12, %v1135_v8 }
 0x1b3   :  { %v789_v30 = vadd.f32 %v788_v21, %v787_v16 }
 0x1b4   :  { %v1082_v55 = vpop.xlane.xlu1 %1081  ;;  %1217 = vpush %v631_v22  ;;  %v1138_v34 = vrot.slane %v1137_v25, 1 }
 0x1b5   :  { %v790_v23 = vrot.slane %v789_v30, 2  ;;  %v1083_v63 = vrot.slane %v1082_v55, 4 }
 0x1b6   :  { %v1139_v49 = vadd.f32 %v1138_v34, %v1137_v25 }
 0x1b7   :  { %v1084_v60 = vadd.f32 %v1083_v63, %v1082_v55  ;;  %v791_v24 = vadd.f32 %v790_v23, %v789_v30 }
 0x1b9   :  { %v1085_v59 = vrot.slane %v1084_v60, 2  ;;  %v792_v26 = vrot.slane %v791_v24, 1 }
 0x1bb   :  { %v1086_v10 = vadd.f32 %v1085_v59, %v1084_v60  ;;  %v793_v28 = vadd.f32 %v792_v26, %v791_v24 }
 0x1bd   :  { %1219 = vpush %v793_v28  ;;  %v1087_v46 = vrot.slane %v1086_v10, 1 }
 0x1be   :  { %1221 = vpush %v952_v31 }
 0x1bf   :  { %1223 = vpush %v1005_v36  ;;  %v1088_v48 = vadd.f32 %v1087_v46, %v1086_v10 }
 0x1c0   :  { %1225 = vpush %v1055_v2 }
 0x1c1   :  { %1227 = vpush %v1088_v48 }
 0x1c2   :  { %1229 = vpush %v1139_v49 }
 0x1dd   :  { %s1214_s16 = spop %1213 }
 0x1de   :  { %s549_s18 = smul.f32 0.0022222223, %s1214_s16 }
 0x1e0   :  { %s550_s19 = sadd.f32 %s549_s18, %s519_s17  ;;  %s1338_s18 = smov [#allocation7]  }
 0x1e1   :  { %s1216_s20 = spop %1215 }
 0x1e2   :  { %s591_s0 = smul.f32 0.0022222223, %s1216_s20 }
 0x1e4   :  { %s592_s21 = sadd.f32 %s591_s0, %s550_s19 }
 0x1e5   :  { %s1218_s22 = spop %1217 }
 0x1e6   :  { %s633_s23 = smul.f32 0.0022222223, %s1218_s22 }
 0x1e8   :  { %s634_s2 = sadd.f32 %s633_s23, %s592_s21  ;;  %s1339_s21 = smov [#allocation9]  }
 0x1ea   :  { %636 = sst [smem:[#allocation2]] %s634_s2  ;;  %s1340_s2 = smov [#allocation6]  }
 0x1eb   :  { %1151 = dma.smem_to_hbm %s1336_s24, 16, %s2037_s4, [#allocation3]  }
 0x1ee   :  { %s1220_s27 = spop %1219 }
 0x1ef   :  { %s795_s28 = smul.f32 0.0014184397, %s1220_s27  ;;  %s1222_s29 = spop %1221 }
 0x1f0   :  { %s954_s30 = smul.f32 0.0022222223, %s1222_s29  ;;  %s1224_s3 = spop %1223 }
 0x1f1   :  { %s1007_s9 = smul.f32 0.0022222223, %s1224_s3  ;;  %s1226_s10 = spop %1225 }
 0x1f2   :  { %s1228_s11 = spop %1227  ;;  %797 = sst [smem:[#allocation4]] %s795_s28 }
 0x1f3   :  { %s1008_s12 = sadd.f32 %s1007_s9, %s954_s30  ;;  %s1090_s13 = smul.f32 0.0013020834, %s1228_s11 }
 0x1f4   :  { %s1230_s1 = spop %1229  ;;  %s1057_s4 = smul.f32 0.0022222223, %s1226_s10 }
 0x1f5   :  { %1092 = sst [smem:[#allocation7]] %s1090_s13  ;;  %s1141_s14 = smul.f32 0.00390625, %s1230_s1 }
 0x1f6   :  { %1159 = dma.smem_to_hbm %s1337_s15, 16, %s2038_s5, [#allocation5]  }
 0x1f7   :  { %1143 = sst [smem:[#allocation9]] %s1141_s14 }
 0x1f8   :  { %1175 = dma.smem_to_hbm %s1338_s18, 16, %s2040_s7, [#allocation8]  }
 0x1f9   :  { %s1058_s0 = sadd.f32 %s1057_s4, %s1008_s12 }
 0x1fa   :  { %1183 = dma.smem_to_hbm %s1339_s21, 16, %s2041_s8, [#allocation8]  }
 0x1fb   :  { %1060 = sst [smem:[#allocation6]] %s1058_s0 }
 0x1fc   :  { %1167 = dma.smem_to_hbm %s1340_s2, 16, %s2039_s6, [#allocation5]  }
 0x1fd   :  { %1329 = dma.done.wait [#allocation3], 16  }
 0x1fe   :  { %1330 = vsyncadd [#allocation3], 4294967280 }
 0x1ff   :  { %1331 = dma.done.wait [#allocation5], 32  }
 0x200   :  { %1332 = vsyncadd [#allocation5], 4294967264 }
 0x201   :  { %1333 = dma.done.wait [#allocation8], 32  }
 0x202   :  { %1334 = vsyncadd [#allocation8], 4294967264 }
 0x203   :  { %1199 = sfence }
 0x204   :  { %1200 = vsyncpa [#allocation3], 1 }
 0x205   :  { %1201 = vsyncpa [#allocation5], 1 }
 0x206   :  { %1202 = vsyncpa [#allocation8], 1 }

// kernel: smpl2mesh_forward_loss.3
= control target key start
LH: loop header
LB: loop body
LE: loop exit
PB: predicated region body
PF: predicated region fallthrough
CT: control target
= control target key end

     0   :  { %s2522_s12 = smov 0   ;;  %s2524_s13 = smov 0   ;;  %s3884_s0 = inlined_call_operand.vmem [shape: f32[512,8], index: 0, kind: input, shape index: {}]   ;;  %s3885_s1 = inlined_call_operand.vmem [shape: f32[8,1024], index: 1, kind: input, shape index: {}]   ;;  %s3886_s2 = inlined_call_operand.vmem [shape: f32[2,1,1], index: 2, kind: output, shape index: {0}]   ;;  %s3887_s3 = inlined_call_operand.vmem [shape: f32[2,1,1024], index: 3, kind: output, shape index: {1}]  }
   0x1   :  { %s2526_s14 = smov 0  }
   0x2 LB: > { %s26_s15 = sadd.s32 1, %s2494_s13  ;;  %p2314_p0 = scmp.ge.s32.totalorder %s2498_s14, 1  ;;  %s2498_s14 = sphi %s2526_s14, %s14_s14   ;;  %s2494_s13 = sphi %s2524_s13, %s4070_s13   ;;  %s2490_s12 = sphi %s2522_s12, %s4069_s12  }
   0x3   : > { %p28_p1 = scmp.ge.s32.totalorder %s26_s15, 2  ;;  %p157_p2 = scmp.lt.s32.totalorder %s2498_s14, 3 }
   0x5   : > { %s4072_s15 = smov (%p28_p1, %s26_s15), 0  ;;  %p158_p3 = pnand %p2314_p0, %p157_p2 }
   0x7   : > { %161 = sbr.rel (%p158_p3) target bundleno = 630 (0x276), region = 28 }
   0xc   : > { %v233_v0 = vld [vmem:[%s3885_s1 + $0x8] sm:$0xff]  ;;  %v232_v1 = vld [vmem:[%s3885_s1] sm:$0xff]  ;;  %v235_v2 = vld [vmem:[%s3885_s1 + $0x18] sm:$0xff]  ;;  %s2315_s22 = sshll.u32 %s2490_s12, 5  ;;  %v3888_v5 = vmov 0.0   ;;  %vm240_vm0 = vcmask 64512  }
   0xd   : > { %367 = vmatprep.subr.mxu0 %v233_v0  ;;  %624 = vmatprep.subr.mxu1 %v235_v2  ;;  %v234_v3 = vld [vmem:[%s3885_s1 + $0x10] sm:$0xff]  ;;  %v237_v4 = vld [vmem:[%s3885_s1 + $0x28] sm:$0xff]  ;;  %p186_p4 = scmp.lt.s32.totalorder %s2315_s22, 63  ;;  %v239_v6 = vld [vmem:[%s3885_s1 + $0x38] sm:$0xff]  ;;  %p192_p5 = scmp.lt.s32.totalorder %s2490_s12, 1  ;;  %vm1857_vm1 = vcmask 0  }
   0xe   : > { %368 = vmatpush1.msra.mxu0 %v232_v1  ;;  %401 = vmatprep.mubr.f32.mxu0 %v3888_v5  ;;  %v236_v7 = vld [vmem:[%s3885_s1 + $0x20] sm:$0xff]  ;;  %v238_v9 = vld [vmem:[%s3885_s1 + $0x30] sm:$0xff] }
   0xf   : > { %625 = vmatpush1.msra.mxu1 %v234_v3  ;;  %658 = vmatprep.mubr.f32.mxu1 %v3888_v5  ;;  %s4074_s22 = smov (!%p186_p4, %s2315_s22), 63 }
  0x10   : > { %881 = vmatprep.subr.mxu0 %v237_v4  ;;  %1138 = vmatprep.subr.mxu1 %v239_v6  ;;  %s2316_s29 = sshll.u32 %s4074_s22, 3  ;;  %s2446_s22 = sshll.u32 %s2490_s12, 8 }
  0x11   : > { %s2566_s5 = scalar_lea.vmem %s3884_s0, %s2316_s29 }
  0x12   : > { %v2572_v8 = vld [vmem:[%s2566_s5] sm:$0xff]  ;;  %v2583_v10 = vld [vmem:[%s2566_s5 + $0x8] sm:$0xff]  ;;  %v2593_v11 = vld [vmem:[%s2566_s5 + $0x10] sm:$0xff]  ;;  %s193_s10 = scalar_select %p192_p5, %s2490_s12, 1 }
  0x13   : > { %2318 = vmatmul.mubr.msk.f32.vlgmr.msra.gmra.mxu0 %vm240_vm0, %v2572_v8  ;;  %2350 = vmatmul.mubr.msk.f32.vlgmr.msra.gmra.mxu1 %vm240_vm0, %v2572_v8  ;;  %v2602_v12 = vld [vmem:[%s2566_s5 + $0x18] sm:$0xff]  ;;  %v2611_v13 = vld [vmem:[%s2566_s5 + $0x20] sm:$0xff]  ;;  %v2620_v14 = vld [vmem:[%s2566_s5 + $0x28] sm:$0xff] }
  0x14   : > { %882 = vmatpush1.msra.mxu0 %v236_v7  ;;  %407 = vmatprep.mubr.f32.mxu0 %v3888_v5  ;;  %v2629_v15 = vld [vmem:[%s2566_s5 + $0x30] sm:$0xff]  ;;  %v2638_v16 = vld [vmem:[%s2566_s5 + $0x38] sm:$0xff]  ;;  %v2647_v17 = vld [vmem:[%s2566_s5 + $0x40] sm:$0xff]  ;;  %s3791_s17 = scalar_lea.vmem %s3886_s2, %s193_s10  ;;  %s2317_s18 = sshll.u32 %s193_s10, 3 }
  0x15   : > { %664 = vmatprep.mubr.f32.mxu1 %v3888_v5  ;;  %1139 = vmatpush1.msra.mxu1 %v238_v9  ;;  %v2656_v18 = vld [vmem:[%s2566_s5 + $0x48] sm:$0xff]  ;;  %v2665_v19 = vld [vmem:[%s2566_s5 + $0x50] sm:$0xff]  ;;  %v2674_v20 = vld [vmem:[%s2566_s5 + $0x58] sm:$0xff]  ;;  %s198_s21 = scalar_lea.vmem %s3887_s3, %s2317_s18 }
  0x16   : > { %v2683_v21 = vld [vmem:[%s2566_s5 + $0x60] sm:$0xff]  ;;  %v2692_v22 = vld [vmem:[%s2566_s5 + $0x68] sm:$0xff]  ;;  %v2701_v23 = vld [vmem:[%s2566_s5 + $0x70] sm:$0xff] }
  0x17   : > { %2319 = vmatmul.mubr.msk.f32.gmra.mxu0 %vm240_vm0, %v2583_v10  ;;  %2351 = vmatmul.mubr.msk.f32.gmra.mxu1 %vm240_vm0, %v2583_v10  ;;  %v2710_v24 = vld [vmem:[%s2566_s5 + $0x78] sm:$0xff]  ;;  %v2719_v25 = vld [vmem:[%s2566_s5 + $0x80] sm:$0xff]  ;;  %v2728_v26 = vld [vmem:[%s2566_s5 + $0x88] sm:$0xff] }
  0x18   : > { %413 = vmatprep.mubr.f32.mxu0 %v3888_v5  ;;  %670 = vmatprep.mubr.f32.mxu1 %v3888_v5  ;;  %v2737_v27 = vld [vmem:[%s2566_s5 + $0x90] sm:$0xff]  ;;  %v2746_v28 = vld [vmem:[%s2566_s5 + $0x98] sm:$0xff]  ;;  %v2755_v29 = vld [vmem:[%s2566_s5 + $0xa0] sm:$0xff] }
  0x19   : > { %v2764_v30 = vld [vmem:[%s2566_s5 + $0xa8] sm:$0xff]  ;;  %v2773_v31 = vld [vmem:[%s2566_s5 + $0xb0] sm:$0xff]  ;;  %v2782_v32 = vld [vmem:[%s2566_s5 + $0xb8] sm:$0xff] }
  0x1a   : > { %v2791_v33 = vld [vmem:[%s2566_s5 + $0xc0] sm:$0xff]  ;;  %v2800_v34 = vld [vmem:[%s2566_s5 + $0xc8] sm:$0xff]  ;;  %v2809_v35 = vld [vmem:[%s2566_s5 + $0xd0] sm:$0xff] }
  0x1b   : > { %2320 = vmatmul.mubr.msk.f32.gmra.mxu0 %vm240_vm0, %v2593_v11  ;;  %2352 = vmatmul.mubr.msk.f32.gmra.mxu1 %vm240_vm0, %v2593_v11  ;;  %v2818_v36 = vld [vmem:[%s2566_s5 + $0xd8] sm:$0xff]  ;;  %v2827_v37 = vld [vmem:[%s2566_s5 + $0xe0] sm:$0xff]  ;;  %v2836_v38 = vld [vmem:[%s2566_s5 + $0xe8] sm:$0xff] }
  0x1c   : > { %419 = vmatprep.mubr.f32.mxu0 %v3888_v5  ;;  %676 = vmatprep.mubr.f32.mxu1 %v3888_v5  ;;  %v2845_v39 = vld [vmem:[%s2566_s5 + $0xf0] sm:$0xff]  ;;  %v2854_v40 = vld [vmem:[%s2566_s5 + $0xf8] sm:$0xff] }
  0x1f   : > { %2321 = vmatmul.mubr.msk.f32.gmra.mxu0 %vm240_vm0, %v2602_v12  ;;  %2353 = vmatmul.mubr.msk.f32.gmra.mxu1 %vm240_vm0, %v2602_v12 }
  0x20   : > { %425 = vmatprep.mubr.f32.mxu0 %v3888_v5  ;;  %682 = vmatprep.mubr.f32.mxu1 %v3888_v5 }
  0x23   : > { %2322 = vmatmul.mubr.msk.f32.gmra.mxu0 %vm240_vm0, %v2611_v13  ;;  %2354 = vmatmul.mubr.msk.f32.gmra.mxu1 %vm240_vm0, %v2611_v13 }
  0x24   : > { %431 = vmatprep.mubr.f32.mxu0 %v3888_v5  ;;  %688 = vmatprep.mubr.f32.mxu1 %v3888_v5 }
  0x27   : > { %2323 = vmatmul.mubr.msk.f32.gmra.mxu0 %vm240_vm0, %v2620_v14  ;;  %2355 = vmatmul.mubr.msk.f32.gmra.mxu1 %vm240_vm0, %v2620_v14 }
  0x28   : > { %437 = vmatprep.mubr.f32.mxu0 %v3888_v5  ;;  %694 = vmatprep.mubr.f32.mxu1 %v3888_v5 }
  0x2b   : > { %2324 = vmatmul.mubr.msk.f32.gmra.mxu0 %vm240_vm0, %v2629_v15  ;;  %2356 = vmatmul.mubr.msk.f32.gmra.mxu1 %vm240_vm0, %v2629_v15 }
  0x2c   : > { %443 = vmatprep.mubr.f32.mxu0 %v3888_v5  ;;  %700 = vmatprep.mubr.f32.mxu1 %v3888_v5 }
  0x2f   : > { %2325 = vmatmul.mubr.msk.f32.gmra.mxu0 %vm240_vm0, %v2638_v16  ;;  %2357 = vmatmul.mubr.msk.f32.gmra.mxu1 %vm240_vm0, %v2638_v16 }
  0x30   : > { %449 = vmatprep.mubr.f32.mxu0 %v3888_v5  ;;  %706 = vmatprep.mubr.f32.mxu1 %v3888_v5 }
  0x33   : > { %2326 = vmatmul.mubr.msk.f32.gmra.mxu0 %vm240_vm0, %v2647_v17  ;;  %2358 = vmatmul.mubr.msk.f32.gmra.mxu1 %vm240_vm0, %v2647_v17 }
  0x34   : > { %455 = vmatprep.mubr.f32.mxu0 %v3888_v5  ;;  %712 = vmatprep.mubr.f32.mxu1 %v3888_v5 }
  0x37   : > { %2327 = vmatmul.mubr.msk.f32.gmra.mxu0 %vm240_vm0, %v2656_v18  ;;  %2359 = vmatmul.mubr.msk.f32.gmra.mxu1 %vm240_vm0, %v2656_v18 }
  0x38   : > { %461 = vmatprep.mubr.f32.mxu0 %v3888_v5  ;;  %718 = vmatprep.mubr.f32.mxu1 %v3888_v5 }
  0x3b   : > { %2328 = vmatmul.mubr.msk.f32.gmra.mxu0 %vm240_vm0, %v2665_v19  ;;  %2360 = vmatmul.mubr.msk.f32.gmra.mxu1 %vm240_vm0, %v2665_v19 }
  0x3c   : > { %467 = vmatprep.mubr.f32.mxu0 %v3888_v5  ;;  %724 = vmatprep.mubr.f32.mxu1 %v3888_v5 }
  0x3f   : > { %2329 = vmatmul.mubr.msk.f32.gmra.mxu0 %vm240_vm0, %v2674_v20  ;;  %2361 = vmatmul.mubr.msk.f32.gmra.mxu1 %vm240_vm0, %v2674_v20 }
  0x40   : > { %473 = vmatprep.mubr.f32.mxu0 %v3888_v5  ;;  %730 = vmatprep.mubr.f32.mxu1 %v3888_v5 }
  0x43   : > { %2330 = vmatmul.mubr.msk.f32.gmra.mxu0 %vm240_vm0, %v2683_v21  ;;  %2362 = vmatmul.mubr.msk.f32.gmra.mxu1 %vm240_vm0, %v2683_v21 }
  0x44   : > { %479 = vmatprep.mubr.f32.mxu0 %v3888_v5  ;;  %736 = vmatprep.mubr.f32.mxu1 %v3888_v5 }
  0x47   : > { %2331 = vmatmul.mubr.msk.f32.gmra.mxu0 %vm240_vm0, %v2692_v22  ;;  %2363 = vmatmul.mubr.msk.f32.gmra.mxu1 %vm240_vm0, %v2692_v22 }
  0x48   : > { %485 = vmatprep.mubr.f32.mxu0 %v3888_v5  ;;  %742 = vmatprep.mubr.f32.mxu1 %v3888_v5 }
  0x4b   : > { %2332 = vmatmul.mubr.msk.f32.gmra.mxu0 %vm240_vm0, %v2701_v23  ;;  %2364 = vmatmul.mubr.msk.f32.gmra.mxu1 %vm240_vm0, %v2701_v23 }
  0x4c   : > { %491 = vmatprep.mubr.f32.mxu0 %v3888_v5  ;;  %748 = vmatprep.mubr.f32.mxu1 %v3888_v5 }
  0x4f   : > { %2333 = vmatmul.mubr.msk.f32.gmra.mxu0 %vm240_vm0, %v2710_v24  ;;  %2365 = vmatmul.mubr.msk.f32.gmra.mxu1 %vm240_vm0, %v2710_v24 }
  0x50   : > { %497 = vmatprep.mubr.f32.mxu0 %v3888_v5  ;;  %754 = vmatprep.mubr.f32.mxu1 %v3888_v5 }
  0x53   : > { %2334 = vmatmul.mubr.msk.f32.gmra.mxu0 %vm240_vm0, %v2719_v25  ;;  %2366 = vmatmul.mubr.msk.f32.gmra.mxu1 %vm240_vm0, %v2719_v25 }
  0x54   : > { %503 = vmatprep.mubr.f32.mxu0 %v3888_v5  ;;  %760 = vmatprep.mubr.f32.mxu1 %v3888_v5 }
  0x57   : > { %2335 = vmatmul.mubr.msk.f32.gmra.mxu0 %vm240_vm0, %v2728_v26  ;;  %2367 = vmatmul.mubr.msk.f32.gmra.mxu1 %vm240_vm0, %v2728_v26 }
  0x58   : > { %509 = vmatprep.mubr.f32.mxu0 %v3888_v5  ;;  %766 = vmatprep.mubr.f32.mxu1 %v3888_v5 }
  0x5b   : > { %2336 = vmatmul.mubr.msk.f32.gmra.mxu0 %vm240_vm0, %v2737_v27  ;;  %2368 = vmatmul.mubr.msk.f32.gmra.mxu1 %vm240_vm0, %v2737_v27 }
  0x5c   : > { %515 = vmatprep.mubr.f32.mxu0 %v3888_v5  ;;  %772 = vmatprep.mubr.f32.mxu1 %v3888_v5 }
  0x5f   : > { %2337 = vmatmul.mubr.msk.f32.gmra.mxu0 %vm240_vm0, %v2746_v28  ;;  %2369 = vmatmul.mubr.msk.f32.gmra.mxu1 %vm240_vm0, %v2746_v28 }
  0x60   : > { %521 = vmatprep.mubr.f32.mxu0 %v3888_v5  ;;  %778 = vmatprep.mubr.f32.mxu1 %v3888_v5 }
  0x63   : > { %2338 = vmatmul.mubr.msk.f32.gmra.mxu0 %vm240_vm0, %v2755_v29  ;;  %2370 = vmatmul.mubr.msk.f32.gmra.mxu1 %vm240_vm0, %v2755_v29 }
  0x64   : > { %527 = vmatprep.mubr.f32.mxu0 %v3888_v5  ;;  %784 = vmatprep.mubr.f32.mxu1 %v3888_v5 }
  0x67   : > { %2339 = vmatmul.mubr.msk.f32.gmra.mxu0 %vm240_vm0, %v2764_v30  ;;  %2371 = vmatmul.mubr.msk.f32.gmra.mxu1 %vm240_vm0, %v2764_v30 }
  0x68   : > { %533 = vmatprep.mubr.f32.mxu0 %v3888_v5  ;;  %790 = vmatprep.mubr.f32.mxu1 %v3888_v5 }
  0x6b   : > { %2340 = vmatmul.mubr.msk.f32.gmra.mxu0 %vm240_vm0, %v2773_v31  ;;  %2372 = vmatmul.mubr.msk.f32.gmra.mxu1 %vm240_vm0, %v2773_v31 }
  0x6c   : > { %539 = vmatprep.mubr.f32.mxu0 %v3888_v5  ;;  %796 = vmatprep.mubr.f32.mxu1 %v3888_v5 }
  0x6f   : > { %2341 = vmatmul.mubr.msk.f32.gmra.mxu0 %vm240_vm0, %v2782_v32  ;;  %2373 = vmatmul.mubr.msk.f32.gmra.mxu1 %vm240_vm0, %v2782_v32 }
  0x70   : > { %545 = vmatprep.mubr.f32.mxu0 %v3888_v5  ;;  %802 = vmatprep.mubr.f32.mxu1 %v3888_v5 }
  0x73   : > { %2342 = vmatmul.mubr.msk.f32.gmra.mxu0 %vm240_vm0, %v2791_v33  ;;  %2374 = vmatmul.mubr.msk.f32.gmra.mxu1 %vm240_vm0, %v2791_v33 }
  0x74   : > { %551 = vmatprep.mubr.f32.mxu0 %v3888_v5  ;;  %808 = vmatprep.mubr.f32.mxu1 %v3888_v5 }
  0x77   : > { %2343 = vmatmul.mubr.msk.f32.gmra.mxu0 %vm240_vm0, %v2800_v34  ;;  %2375 = vmatmul.mubr.msk.f32.gmra.mxu1 %vm240_vm0, %v2800_v34 }
  0x78   : > { %557 = vmatprep.mubr.f32.mxu0 %v3888_v5  ;;  %814 = vmatprep.mubr.f32.mxu1 %v3888_v5 }
  0x7b   : > { %2344 = vmatmul.mubr.msk.f32.gmra.mxu0 %vm240_vm0, %v2809_v35  ;;  %2376 = vmatmul.mubr.msk.f32.gmra.mxu1 %vm240_vm0, %v2809_v35 }
  0x7c   : > { %563 = vmatprep.mubr.f32.mxu0 %v3888_v5  ;;  %820 = vmatprep.mubr.f32.mxu1 %v3888_v5 }
  0x7f   : > { %2345 = vmatmul.mubr.msk.f32.gmra.mxu0 %vm240_vm0, %v2818_v36  ;;  %2377 = vmatmul.mubr.msk.f32.gmra.mxu1 %vm240_vm0, %v2818_v36 }
  0x80   : > { %569 = vmatprep.mubr.f32.mxu0 %v3888_v5  ;;  %826 = vmatprep.mubr.f32.mxu1 %v3888_v5 }
  0x83   : > { %2346 = vmatmul.mubr.msk.f32.gmra.mxu0 %vm240_vm0, %v2827_v37  ;;  %2378 = vmatmul.mubr.msk.f32.gmra.mxu1 %vm240_vm0, %v2827_v37 }
  0x84   : > { %575 = vmatprep.mubr.f32.mxu0 %v3888_v5  ;;  %832 = vmatprep.mubr.f32.mxu1 %v3888_v5 }
  0x87   : > { %2347 = vmatmul.mubr.msk.f32.gmra.mxu0 %vm240_vm0, %v2836_v38  ;;  %2379 = vmatmul.mubr.msk.f32.gmra.mxu1 %vm240_vm0, %v2836_v38 }
  0x88   : > { %581 = vmatprep.mubr.f32.mxu0 %v3888_v5  ;;  %838 = vmatprep.mubr.f32.mxu1 %v3888_v5 }
  0x8b   : > { %2348 = vmatmul.mubr.msk.f32.gmra.mxu0 %vm240_vm0, %v2845_v39  ;;  %2380 = vmatmul.mubr.msk.f32.gmra.mxu1 %vm240_vm0, %v2845_v39 }
  0x8c   : > { %587 = vmatprep.mubr.f32.mxu0 %v3888_v5  ;;  %844 = vmatprep.mubr.f32.mxu1 %v3888_v5 }
  0x8f   : > { %2349 = vmatmul.mubr.msk.f32.gmra.mxu0 %vm240_vm0, %v2854_v40  ;;  %2381 = vmatmul.mubr.msk.f32.gmra.mxu1 %vm240_vm0, %v2854_v40 }
  0x90   : > { %915 = vmatprep.mubr.f32.mxu0 %v3888_v5  ;;  %1172 = vmatprep.mubr.f32.mxu1 %v3888_v5 }
  0x93   : > { %2382 = vmatmul.mubr.msk.f32.vlgmr.msra.gmra.mxu0 %vm240_vm0, %v2572_v8  ;;  %2414 = vmatmul.mubr.msk.f32.vlgmr.msra.gmra.mxu1 %vm240_vm0, %v2572_v8 }
  0x94   : > { %921 = vmatprep.mubr.f32.mxu0 %v3888_v5  ;;  %1178 = vmatprep.mubr.f32.mxu1 %v3888_v5 }
  0x97   : > { %2383 = vmatmul.mubr.msk.f32.gmra.mxu0 %vm240_vm0, %v2583_v10  ;;  %2415 = vmatmul.mubr.msk.f32.gmra.mxu1 %vm240_vm0, %v2583_v10 }
  0x98   : > { %927 = vmatprep.mubr.f32.mxu0 %v3888_v5  ;;  %1184 = vmatprep.mubr.f32.mxu1 %v3888_v5 }
  0x9b   : > { %2384 = vmatmul.mubr.msk.f32.gmra.mxu0 %vm240_vm0, %v2593_v11  ;;  %2416 = vmatmul.mubr.msk.f32.gmra.mxu1 %vm240_vm0, %v2593_v11 }
  0x9c   : > { %933 = vmatprep.mubr.f32.mxu0 %v3888_v5  ;;  %1190 = vmatprep.mubr.f32.mxu1 %v3888_v5 }
  0x9f   : > { %2385 = vmatmul.mubr.msk.f32.gmra.mxu0 %vm240_vm0, %v2602_v12  ;;  %2417 = vmatmul.mubr.msk.f32.gmra.mxu1 %vm240_vm0, %v2602_v12 }
  0xa0   : > { %939 = vmatprep.mubr.f32.mxu0 %v3888_v5  ;;  %1196 = vmatprep.mubr.f32.mxu1 %v3888_v5 }
  0xa3   : > { %2386 = vmatmul.mubr.msk.f32.gmra.mxu0 %vm240_vm0, %v2611_v13  ;;  %2418 = vmatmul.mubr.msk.f32.gmra.mxu1 %vm240_vm0, %v2611_v13 }
  0xa4   : > { %945 = vmatprep.mubr.f32.mxu0 %v3888_v5  ;;  %1202 = vmatprep.mubr.f32.mxu1 %v3888_v5 }
  0xa7   : > { %2387 = vmatmul.mubr.msk.f32.gmra.mxu0 %vm240_vm0, %v2620_v14  ;;  %2419 = vmatmul.mubr.msk.f32.gmra.mxu1 %vm240_vm0, %v2620_v14 }
  0xa8   : > { %951 = vmatprep.mubr.f32.mxu0 %v3888_v5  ;;  %1208 = vmatprep.mubr.f32.mxu1 %v3888_v5 }
  0xab   : > { %2388 = vmatmul.mubr.msk.f32.gmra.mxu0 %vm240_vm0, %v2629_v15  ;;  %2420 = vmatmul.mubr.msk.f32.gmra.mxu1 %vm240_vm0, %v2629_v15 }
  0xac   : > { %957 = vmatprep.mubr.f32.mxu0 %v3888_v5  ;;  %1214 = vmatprep.mubr.f32.mxu1 %v3888_v5 }
  0xaf   : > { %2389 = vmatmul.mubr.msk.f32.gmra.mxu0 %vm240_vm0, %v2638_v16  ;;  %2421 = vmatmul.mubr.msk.f32.gmra.mxu1 %vm240_vm0, %v2638_v16 }
  0xb0   : > { %963 = vmatprep.mubr.f32.mxu0 %v3888_v5  ;;  %1220 = vmatprep.mubr.f32.mxu1 %v3888_v5 }
  0xb3   : > { %2390 = vmatmul.mubr.msk.f32.gmra.mxu0 %vm240_vm0, %v2647_v17  ;;  %2422 = vmatmul.mubr.msk.f32.gmra.mxu1 %vm240_vm0, %v2647_v17 }
  0xb4   : > { %969 = vmatprep.mubr.f32.mxu0 %v3888_v5  ;;  %1226 = vmatprep.mubr.f32.mxu1 %v3888_v5 }
  0xb7   : > { %2391 = vmatmul.mubr.msk.f32.gmra.mxu0 %vm240_vm0, %v2656_v18  ;;  %2423 = vmatmul.mubr.msk.f32.gmra.mxu1 %vm240_vm0, %v2656_v18 }
  0xb8   : > { %975 = vmatprep.mubr.f32.mxu0 %v3888_v5  ;;  %1232 = vmatprep.mubr.f32.mxu1 %v3888_v5 }
  0xbb   : > { %2392 = vmatmul.mubr.msk.f32.gmra.mxu0 %vm240_vm0, %v2665_v19  ;;  %2424 = vmatmul.mubr.msk.f32.gmra.mxu1 %vm240_vm0, %v2665_v19 }
  0xbc   : > { %981 = vmatprep.mubr.f32.mxu0 %v3888_v5  ;;  %1238 = vmatprep.mubr.f32.mxu1 %v3888_v5 }
  0xbf   : > { %2393 = vmatmul.mubr.msk.f32.gmra.mxu0 %vm240_vm0, %v2674_v20  ;;  %2425 = vmatmul.mubr.msk.f32.gmra.mxu1 %vm240_vm0, %v2674_v20 }
  0xc0   : > { %987 = vmatprep.mubr.f32.mxu0 %v3888_v5  ;;  %1244 = vmatprep.mubr.f32.mxu1 %v3888_v5 }
  0xc3   : > { %2394 = vmatmul.mubr.msk.f32.gmra.mxu0 %vm240_vm0, %v2683_v21  ;;  %2426 = vmatmul.mubr.msk.f32.gmra.mxu1 %vm240_vm0, %v2683_v21 }
  0xc4   : > { %993 = vmatprep.mubr.f32.mxu0 %v3888_v5  ;;  %1250 = vmatprep.mubr.f32.mxu1 %v3888_v5 }
  0xc7   : > { %2395 = vmatmul.mubr.msk.f32.gmra.mxu0 %vm240_vm0, %v2692_v22  ;;  %2427 = vmatmul.mubr.msk.f32.gmra.mxu1 %vm240_vm0, %v2692_v22 }
  0xc8   : > { %999 = vmatprep.mubr.f32.mxu0 %v3888_v5  ;;  %1256 = vmatprep.mubr.f32.mxu1 %v3888_v5 }
  0xcb   : > { %2396 = vmatmul.mubr.msk.f32.gmra.mxu0 %vm240_vm0, %v2701_v23  ;;  %2428 = vmatmul.mubr.msk.f32.gmra.mxu1 %vm240_vm0, %v2701_v23 }
  0xcc   : > { %1005 = vmatprep.mubr.f32.mxu0 %v3888_v5  ;;  %1262 = vmatprep.mubr.f32.mxu1 %v3888_v5 }
  0xcf   : > { %2397 = vmatmul.mubr.msk.f32.gmra.mxu0 %vm240_vm0, %v2710_v24  ;;  %2429 = vmatmul.mubr.msk.f32.gmra.mxu1 %vm240_vm0, %v2710_v24 }
  0xd0   : > { %1011 = vmatprep.mubr.f32.mxu0 %v3888_v5  ;;  %1268 = vmatprep.mubr.f32.mxu1 %v3888_v5 }
  0xd3   : > { %v403_v41 = vpop.f32.mrf.mxu0  ;;  %v660_v42 = vpop.f32.mrf.mxu1  ;;  %2398 = vmatmul.mubr.msk.f32.gmra.mxu0 %vm240_vm0, %v2719_v25  ;;  %2430 = vmatmul.mubr.msk.f32.gmra.mxu1 %vm240_vm0, %v2719_v25 }
  0xd4   : > { %1017 = vmatprep.mubr.f32.mxu0 %v3888_v5  ;;  %1274 = vmatprep.mubr.f32.mxu1 %v3888_v5 }
  0xd5   : > { %v405_v43 = vpop.f32.mrf.mxu0  ;;  %v2964_v44 = vpop.f32.mrf.mxu1 }
  0xd6   : > { %v1464_v45 = vmin.f32 %v403_v41, %v405_v43 }
  0xd7   : > { %v409_v46 = vpop.f32.mrf.mxu0  ;;  %v666_v47 = vpop.f32.mrf.mxu1  ;;  %2399 = vmatmul.mubr.msk.f32.gmra.mxu0 %vm240_vm0, %v2728_v26  ;;  %2431 = vmatmul.mubr.msk.f32.gmra.mxu1 %vm240_vm0, %v2728_v26 }
  0xd8   : > { %v2970_v48 = vmin.f32 %v1464_v45, %v660_v42  ;;  %v1863_v49 = vmin.f32 %v403_v41, %v409_v46  ;;  %v1937_v50 = vmin.f32 %v660_v42, %v666_v47  ;;  %1023 = vmatprep.mubr.f32.mxu0 %v3888_v5  ;;  %1280 = vmatprep.mubr.f32.mxu1 %v3888_v5 }
  0xd9   : > { %v411_v51 = vpop.f32.mrf.mxu0  ;;  %v2974_v52 = vpop.f32.mrf.mxu1 }
  0xda   : > { %v1473_v54 = vmin.f32 %v409_v46, %v411_v51  ;;  %v1900_v55 = vmin.f32 %v405_v43, %v411_v51  ;;  %v1974_v56 = vmin.f32 %v2964_v44, %v2974_v52 }
  0xdb   : > { %v415_v57 = vpop.f32.mrf.mxu0  ;;  %v672_v58 = vpop.f32.mrf.mxu1  ;;  %2400 = vmatmul.mubr.msk.f32.gmra.mxu0 %vm240_vm0, %v2737_v27  ;;  %2432 = vmatmul.mubr.msk.f32.gmra.mxu1 %vm240_vm0, %v2737_v27 }
  0xdc   : > { %v2984_v59 = vmin.f32 %v1473_v54, %v666_v47  ;;  %v1864_v60 = vmin.f32 %v1863_v49, %v415_v57  ;;  %v1938_v61 = vmin.f32 %v1937_v50, %v672_v58  ;;  %1029 = vmatprep.mubr.f32.mxu0 %v3888_v5  ;;  %1286 = vmatprep.mubr.f32.mxu1 %v3888_v5 }
  0xdd   : > { %v417_v62 = vpop.f32.mrf.mxu0  ;;  %v2988_v63 = vpop.f32.mrf.mxu1 }
  0xde   : > { %v1482_v1 = vmin.f32 %v415_v57, %v417_v62  ;;  %v1901_v2 = vmin.f32 %v1900_v55, %v417_v62  ;;  %v1975_v3 = vmin.f32 %v1974_v56, %v2988_v63 }
  0xdf   : > { %v421_v4 = vpop.f32.mrf.mxu0  ;;  %v678_v6 = vpop.f32.mrf.mxu1  ;;  %2401 = vmatmul.mubr.msk.f32.gmra.mxu0 %vm240_vm0, %v2746_v28  ;;  %2433 = vmatmul.mubr.msk.f32.gmra.mxu1 %vm240_vm0, %v2746_v28 }
  0xe0   : > { %v2997_v7 = vmin.f32 %v1482_v1, %v672_v58  ;;  %v1865_v8 = vmin.f32 %v1864_v60, %v421_v4  ;;  %v1939_v9 = vmin.f32 %v1938_v61, %v678_v6  ;;  %1035 = vmatprep.mubr.f32.mxu0 %v3888_v5  ;;  %1292 = vmatprep.mubr.f32.mxu1 %v3888_v5 }
  0xe1   : > { %v423_v10 = vpop.f32.mrf.mxu0  ;;  %v3001_v11 = vpop.f32.mrf.mxu1 }
  0xe2   : > { %v1491_v13 = vmin.f32 %v421_v4, %v423_v10  ;;  %v1902_v14 = vmin.f32 %v1901_v2, %v423_v10  ;;  %v1976_v15 = vmin.f32 %v1975_v3, %v3001_v11 }
  0xe3   : > { %v427_v16 = vpop.f32.mrf.mxu0  ;;  %v684_v17 = vpop.f32.mrf.mxu1  ;;  %2402 = vmatmul.mubr.msk.f32.gmra.mxu0 %vm240_vm0, %v2755_v29  ;;  %2434 = vmatmul.mubr.msk.f32.gmra.mxu1 %vm240_vm0, %v2755_v29 }
  0xe4   : > { %v3010_v18 = vmin.f32 %v1491_v13, %v678_v6  ;;  %v1866_v19 = vmin.f32 %v1865_v8, %v427_v16  ;;  %v1940_v20 = vmin.f32 %v1939_v9, %v684_v17  ;;  %1041 = vmatprep.mubr.f32.mxu0 %v3888_v5  ;;  %1298 = vmatprep.mubr.f32.mxu1 %v3888_v5 }
  0xe5   : > { %v429_v21 = vpop.f32.mrf.mxu0  ;;  %v3014_v22 = vpop.f32.mrf.mxu1 }
  0xe6   : > { %v1500_v24 = vmin.f32 %v427_v16, %v429_v21  ;;  %v1903_v25 = vmin.f32 %v1902_v14, %v429_v21  ;;  %v1977_v26 = vmin.f32 %v1976_v15, %v3014_v22 }
  0xe7   : > { %v433_v27 = vpop.f32.mrf.mxu0  ;;  %v690_v28 = vpop.f32.mrf.mxu1  ;;  %2403 = vmatmul.mubr.msk.f32.gmra.mxu0 %vm240_vm0, %v2764_v30  ;;  %2435 = vmatmul.mubr.msk.f32.gmra.mxu1 %vm240_vm0, %v2764_v30 }
  0xe8   : > { %v3023_v29 = vmin.f32 %v1500_v24, %v684_v17  ;;  %v1867_v41 = vmin.f32 %v1866_v19, %v433_v27  ;;  %v1941_v42 = vmin.f32 %v1940_v20, %v690_v28  ;;  %1047 = vmatprep.mubr.f32.mxu0 %v3888_v5  ;;  %1304 = vmatprep.mubr.f32.mxu1 %v3888_v5 }
  0xe9   : > { %v435_v43 = vpop.f32.mrf.mxu0  ;;  %v3027_v45 = vpop.f32.mrf.mxu1 }
  0xea   : > { %v1509_v47 = vmin.f32 %v433_v27, %v435_v43  ;;  %v1904_v49 = vmin.f32 %v1903_v25, %v435_v43  ;;  %v1978_v50 = vmin.f32 %v1977_v26, %v3027_v45 }
  0xeb   : > { %v439_v51 = vpop.f32.mrf.mxu0  ;;  %v696_v30 = vpop.f32.mrf.mxu1  ;;  %2404 = vmatmul.mubr.msk.f32.gmra.mxu0 %vm240_vm0, %v2773_v31  ;;  %2436 = vmatmul.mubr.msk.f32.gmra.mxu1 %vm240_vm0, %v2773_v31 }
  0xec   : > { %v3036_v54 = vmin.f32 %v1509_v47, %v690_v28  ;;  %v1868_v55 = vmin.f32 %v1867_v41, %v439_v51  ;;  %v1942_v56 = vmin.f32 %v1941_v42, %v696_v30  ;;  %1053 = vmatprep.mubr.f32.mxu0 %v3888_v5  ;;  %1310 = vmatprep.mubr.f32.mxu1 %v3888_v5 }
  0xed   : > { %v441_v57 = vpop.f32.mrf.mxu0  ;;  %v3040_v58 = vpop.f32.mrf.mxu1 }
  0xee   : > { %v1518_v61 = vmin.f32 %v439_v51, %v441_v57  ;;  %v1905_v62 = vmin.f32 %v1904_v49, %v441_v57  ;;  %v1979_v1 = vmin.f32 %v1978_v50, %v3040_v58 }
  0xef   : > { %v445_v2 = vpop.f32.mrf.mxu0  ;;  %v702_v31 = vpop.f32.mrf.mxu1  ;;  %2405 = vmatmul.mubr.msk.f32.gmra.mxu0 %vm240_vm0, %v2782_v32  ;;  %2437 = vmatmul.mubr.msk.f32.gmra.mxu1 %vm240_vm0, %v2782_v32 }
  0xf0   : > { %v3049_v3 = vmin.f32 %v1518_v61, %v696_v30  ;;  %v1869_v4 = vmin.f32 %v1868_v55, %v445_v2  ;;  %v1943_v6 = vmin.f32 %v1942_v56, %v702_v31  ;;  %1059 = vmatprep.mubr.f32.mxu0 %v3888_v5  ;;  %1316 = vmatprep.mubr.f32.mxu1 %v3888_v5 }
  0xf1   : > { %v447_v8 = vpop.f32.mrf.mxu0  ;;  %v3053_v9 = vpop.f32.mrf.mxu1 }
  0xf2   : > { %v1527_v13 = vmin.f32 %v445_v2, %v447_v8  ;;  %v1906_v14 = vmin.f32 %v1905_v62, %v447_v8  ;;  %v1980_v15 = vmin.f32 %v1979_v1, %v3053_v9 }
  0xf3   : > { %v451_v16 = vpop.f32.mrf.mxu0  ;;  %v708_v32 = vpop.f32.mrf.mxu1  ;;  %2406 = vmatmul.mubr.msk.f32.gmra.mxu0 %vm240_vm0, %v2791_v33  ;;  %2438 = vmatmul.mubr.msk.f32.gmra.mxu1 %vm240_vm0, %v2791_v33 }
  0xf4   : > { %v3062_v17 = vmin.f32 %v1527_v13, %v702_v31  ;;  %v1870_v19 = vmin.f32 %v1869_v4, %v451_v16  ;;  %v1944_v20 = vmin.f32 %v1943_v6, %v708_v32  ;;  %1065 = vmatprep.mubr.f32.mxu0 %v3888_v5  ;;  %1322 = vmatprep.mubr.f32.mxu1 %v3888_v5 }
  0xf5   : > { %v453_v21 = vpop.f32.mrf.mxu0  ;;  %v3066_v24 = vpop.f32.mrf.mxu1 }
  0xf6   : > { %v1536_v26 = vmin.f32 %v451_v16, %v453_v21  ;;  %v1907_v27 = vmin.f32 %v1906_v14, %v453_v21  ;;  %v1981_v28 = vmin.f32 %v1980_v15, %v3066_v24 }
  0xf7   : > { %v457_v41 = vpop.f32.mrf.mxu0  ;;  %v714_v33 = vpop.f32.mrf.mxu1  ;;  %2407 = vmatmul.mubr.msk.f32.gmra.mxu0 %vm240_vm0, %v2800_v34  ;;  %2439 = vmatmul.mubr.msk.f32.gmra.mxu1 %vm240_vm0, %v2800_v34 }
  0xf8   : > { %v3075_v42 = vmin.f32 %v1536_v26, %v708_v32  ;;  %v1871_v43 = vmin.f32 %v1870_v19, %v457_v41  ;;  %v1945_v47 = vmin.f32 %v1944_v20, %v714_v33  ;;  %1071 = vmatprep.mubr.f32.mxu0 %v3888_v5  ;;  %1328 = vmatprep.mubr.f32.mxu1 %v3888_v5 }
  0xf9   : > { %v459_v49 = vpop.f32.mrf.mxu0  ;;  %v3079_v50 = vpop.f32.mrf.mxu1 }
  0xfa   : > { %v1545_v30 = vmin.f32 %v457_v41, %v459_v49  ;;  %v1908_v55 = vmin.f32 %v1907_v27, %v459_v49  ;;  %v1982_v56 = vmin.f32 %v1981_v28, %v3079_v50 }
  0xfb   : > { %v463_v57 = vpop.f32.mrf.mxu0  ;;  %v720_v34 = vpop.f32.mrf.mxu1  ;;  %2408 = vmatmul.mubr.msk.f32.gmra.mxu0 %vm240_vm0, %v2809_v35  ;;  %2440 = vmatmul.mubr.msk.f32.gmra.mxu1 %vm240_vm0, %v2809_v35 }
  0xfc   : > { %v3088_v61 = vmin.f32 %v1545_v30, %v714_v33  ;;  %v1872_v62 = vmin.f32 %v1871_v43, %v463_v57  ;;  %v1946_v1 = vmin.f32 %v1945_v47, %v720_v34  ;;  %1077 = vmatprep.mubr.f32.mxu0 %v3888_v5  ;;  %1334 = vmatprep.mubr.f32.mxu1 %v3888_v5 }
  0xfd   : > { %v465_v2 = vpop.f32.mrf.mxu0  ;;  %v3092_v31 = vpop.f32.mrf.mxu1 }
  0xfe   : > { %v1554_v6 = vmin.f32 %v463_v57, %v465_v2  ;;  %v1909_v8 = vmin.f32 %v1908_v55, %v465_v2  ;;  %v1983_v13 = vmin.f32 %v1982_v56, %v3092_v31 }
  0xff   : > { %v469_v14 = vpop.f32.mrf.mxu0  ;;  %v726_v35 = vpop.f32.mrf.mxu1  ;;  %2409 = vmatmul.mubr.msk.f32.gmra.mxu0 %vm240_vm0, %v2818_v36  ;;  %2441 = vmatmul.mubr.msk.f32.gmra.mxu1 %vm240_vm0, %v2818_v36 }
 0x100   : > { %v3101_v15 = vmin.f32 %v1554_v6, %v720_v34  ;;  %v1873_v16 = vmin.f32 %v1872_v62, %v469_v14  ;;  %v1947_v32 = vmin.f32 %v1946_v1, %v726_v35  ;;  %1083 = vmatprep.mubr.f32.mxu0 %v3888_v5  ;;  %1340 = vmatprep.mubr.f32.mxu1 %v3888_v5 }
 0x101   : > { %v471_v19 = vpop.f32.mrf.mxu0  ;;  %v3105_v20 = vpop.f32.mrf.mxu1 }
 0x102   : > { %v1563_v26 = vmin.f32 %v469_v14, %v471_v19  ;;  %v1910_v27 = vmin.f32 %v1909_v8, %v471_v19  ;;  %v1984_v28 = vmin.f32 %v1983_v13, %v3105_v20 }
 0x103   : > { %v475_v41 = vpop.f32.mrf.mxu0  ;;  %v732_v36 = vpop.f32.mrf.mxu1  ;;  %2410 = vmatmul.mubr.msk.f32.gmra.mxu0 %vm240_vm0, %v2827_v37  ;;  %2442 = vmatmul.mubr.msk.f32.gmra.mxu1 %vm240_vm0, %v2827_v37 }
 0x104   : > { %v3114_v33 = vmin.f32 %v1563_v26, %v726_v35  ;;  %v1874_v43 = vmin.f32 %v1873_v16, %v475_v41  ;;  %v1948_v47 = vmin.f32 %v1947_v32, %v732_v36  ;;  %1089 = vmatprep.mubr.f32.mxu0 %v3888_v5  ;;  %1346 = vmatprep.mubr.f32.mxu1 %v3888_v5 }
 0x105   : > { %v477_v49 = vpop.f32.mrf.mxu0  ;;  %v3118_v30 = vpop.f32.mrf.mxu1 }
 0x106   : > { %v1572_v56 = vmin.f32 %v475_v41, %v477_v49  ;;  %v1911_v57 = vmin.f32 %v1910_v27, %v477_v49  ;;  %v1985_v34 = vmin.f32 %v1984_v28, %v3118_v30 }
 0x107   : > { %v481_v62 = vpop.f32.mrf.mxu0  ;;  %v738_v37 = vpop.f32.mrf.mxu1  ;;  %2411 = vmatmul.mubr.msk.f32.gmra.mxu0 %vm240_vm0, %v2836_v38  ;;  %2443 = vmatmul.mubr.msk.f32.gmra.mxu1 %vm240_vm0, %v2836_v38 }
 0x108   : > { %v3127_v1 = vmin.f32 %v1572_v56, %v732_v36  ;;  %v1875_v2 = vmin.f32 %v1874_v43, %v481_v62  ;;  %v1949_v6 = vmin.f32 %v1948_v47, %v738_v37  ;;  %1095 = vmatprep.mubr.f32.mxu0 %v3888_v5  ;;  %1352 = vmatprep.mubr.f32.mxu1 %v3888_v5 }
 0x109   : > { %v483_v8 = vpop.f32.mrf.mxu0  ;;  %v3131_v13 = vpop.f32.mrf.mxu1 }
 0x10a   : > { %v1581_v35 = vmin.f32 %v481_v62, %v483_v8  ;;  %v1912_v16 = vmin.f32 %v1911_v57, %v483_v8  ;;  %v1986_v32 = vmin.f32 %v1985_v34, %v3131_v13 }
 0x10b   : > { %v487_v19 = vpop.f32.mrf.mxu0  ;;  %v744_v38 = vpop.f32.mrf.mxu1  ;;  %2412 = vmatmul.mubr.msk.f32.gmra.mxu0 %vm240_vm0, %v2845_v39  ;;  %2444 = vmatmul.mubr.msk.f32.gmra.mxu1 %vm240_vm0, %v2845_v39 }
 0x10c   : > { %v3140_v26 = vmin.f32 %v1581_v35, %v738_v37  ;;  %v1876_v27 = vmin.f32 %v1875_v2, %v487_v19  ;;  %v1950_v28 = vmin.f32 %v1949_v6, %v744_v38  ;;  %1101 = vmatprep.mubr.f32.mxu0 %v3888_v5  ;;  %1358 = vmatprep.mubr.f32.mxu1 %v3888_v5 }
 0x10d   : > { %v489_v41 = vpop.f32.mrf.mxu0  ;;  %v3144_v36 = vpop.f32.mrf.mxu1 }
 0x10e   : > { %v1590_v47 = vmin.f32 %v487_v19, %v489_v41  ;;  %v1913_v49 = vmin.f32 %v1912_v16, %v489_v41  ;;  %v1987_v56 = vmin.f32 %v1986_v32, %v3144_v36 }
 0x10f   : > { %v493_v57 = vpop.f32.mrf.mxu0  ;;  %v750_v39 = vpop.f32.mrf.mxu1  ;;  %2413 = vmatmul.mubr.msk.f32.gmra.mxu0 %vm240_vm0, %v2854_v40  ;;  %2445 = vmatmul.mubr.msk.f32.gmra.mxu1 %vm240_vm0, %v2854_v40 }
 0x110   : > { %v3153_v34 = vmin.f32 %v1590_v47, %v744_v38  ;;  %v1877_v62 = vmin.f32 %v1876_v27, %v493_v57  ;;  %v1951_v37 = vmin.f32 %v1950_v28, %v750_v39 }
 0x111   : > { %v495_v2 = vpop.f32.mrf.mxu0  ;;  %v3155_v6 = vpop.f32.mrf.mxu1 }
 0x112   : > { %v1599_v35 = vmin.f32 %v493_v57, %v495_v2  ;;  %v1914_v16 = vmin.f32 %v1913_v49, %v495_v2  ;;  %v1988_v32 = vmin.f32 %v1987_v56, %v3155_v6 }
 0x113   : > { %v499_v19 = vpop.f32.mrf.mxu0  ;;  %v756_v41 = vpop.f32.mrf.mxu1 }
 0x114   : > { %v3160_v5 = vmin.f32 %v1599_v35, %v750_v39  ;;  %v1878_v43 = vmin.f32 %v1877_v62, %v499_v19  ;;  %v1952_v40 = vmin.f32 %v1951_v37, %v756_v41 }
 0x115   : > { %v501_v38 = vpop.f32.mrf.mxu0  ;;  %v3162_v47 = vpop.f32.mrf.mxu1 }
 0x116   : > { %v1608_v28 = vmin.f32 %v499_v19, %v501_v38  ;;  %v1915_v14 = vmin.f32 %v1914_v16, %v501_v38  ;;  %v1989_v8 = vmin.f32 %v1988_v32, %v3162_v47 }
 0x117   : > { %v505_v57 = vpop.f32.mrf.mxu0  ;;  %v762_v49 = vpop.f32.mrf.mxu1 }
 0x118   : > { %v3167_v2 = vmin.f32 %v1608_v28, %v756_v41  ;;  %v1879_v56 = vmin.f32 %v1878_v43, %v505_v57  ;;  %v1953_v55 = vmin.f32 %v1952_v40, %v762_v49 }
 0x119   : > { %v507_v39 = vpop.f32.mrf.mxu0  ;;  %v3169_v35 = vpop.f32.mrf.mxu1 }
 0x11a   : > { %3939 = vst [vmem:[#allocation2_spill] sm:$0xff] %v3169_v35  ;;  %v1617_v37 = vmin.f32 %v505_v57, %v507_v39  ;;  %v1916_v21 = vmin.f32 %v1915_v14, %v507_v39  ;;  %v1990_v27 = vmin.f32 %v1989_v8, %v3169_v35 }
 0x11b   : > { %v511_v19 = vpop.f32.mrf.mxu0  ;;  %v768_v16 = vpop.f32.mrf.mxu1 }
 0x11c   : > { %v3174_v38 = vmin.f32 %v1617_v37, %v762_v49  ;;  %v1880_v32 = vmin.f32 %v1879_v56, %v511_v19  ;;  %v1954_v4 = vmin.f32 %v1953_v55, %v768_v16 }
 0x11d   : > { %v513_v41 = vpop.f32.mrf.mxu0  ;;  %v3176_v28 = vpop.f32.mrf.mxu1 }
 0x11e   : > { %3940 = vst [vmem:[#allocation3_spill] sm:$0xff] %v3176_v28  ;;  %v1626_v40 = vmin.f32 %v511_v19, %v513_v41  ;;  %v1917_v51 = vmin.f32 %v1916_v21, %v513_v41  ;;  %v1991_v62 = vmin.f32 %v1990_v27, %v3176_v28 }
 0x11f   : > { %v517_v57 = vpop.f32.mrf.mxu0  ;;  %v774_v14 = vpop.f32.mrf.mxu1 }
 0x120   : > { %v3181_v39 = vmin.f32 %v1626_v40, %v768_v16  ;;  %v1881_v8 = vmin.f32 %v1880_v32, %v517_v57  ;;  %v1955_v25 = vmin.f32 %v1954_v4, %v774_v14 }
 0x121   : > { %v519_v49 = vpop.f32.mrf.mxu0  ;;  %v3183_v37 = vpop.f32.mrf.mxu1 }
 0x122   : > { %3941 = vst [vmem:[#allocation4_spill] sm:$0xff] %v3181_v39  ;;  %3942 = vst [vmem:[#allocation5_spill] sm:$0xff] %v3183_v37  ;;  %v1635_v56 = vmin.f32 %v517_v57, %v519_v49  ;;  %v1918_v10 = vmin.f32 %v1917_v51, %v519_v49  ;;  %v1992_v43 = vmin.f32 %v1991_v62, %v3183_v37 }
 0x123   : > { %v523_v19 = vpop.f32.mrf.mxu0  ;;  %v780_v21 = vpop.f32.mrf.mxu1 }
 0x124   : > { %v3188_v41 = vmin.f32 %v1635_v56, %v774_v14  ;;  %v1882_v27 = vmin.f32 %v1881_v8, %v523_v19  ;;  %v1956_v60 = vmin.f32 %v1955_v25, %v780_v21 }
 0x125   : > { %v525_v16 = vpop.f32.mrf.mxu0  ;;  %v3190_v40 = vpop.f32.mrf.mxu1 }
 0x126   : > { %3943 = vst [vmem:[#allocation6_spill] sm:$0xff] %v3188_v41  ;;  %3944 = vst [vmem:[#allocation7_spill] sm:$0xff] %v3190_v40  ;;  %v1644_v32 = vmin.f32 %v523_v19, %v525_v16  ;;  %v1919_v46 = vmin.f32 %v1918_v10, %v525_v16  ;;  %v1993_v55 = vmin.f32 %v1992_v43, %v3190_v40 }
 0x127   : > { %v529_v57 = vpop.f32.mrf.mxu0  ;;  %v786_v51 = vpop.f32.mrf.mxu1 }
 0x128   : > { %v3195_v49 = vmin.f32 %v1644_v32, %v780_v21  ;;  %v1883_v62 = vmin.f32 %v1882_v27, %v529_v57  ;;  %v1957_v23 = vmin.f32 %v1956_v60, %v786_v51 }
 0x129   : > { %v531_v14 = vpop.f32.mrf.mxu0  ;;  %v3197_v56 = vpop.f32.mrf.mxu1 }
 0x12a   : > { %3945 = vst [vmem:[#allocation8_spill] sm:$0xff] %v3195_v49  ;;  %3946 = vst [vmem:[#allocation9_spill] sm:$0xff] %v3197_v56  ;;  %v1653_v8 = vmin.f32 %v529_v57, %v531_v14  ;;  %v1920_v12 = vmin.f32 %v1919_v46, %v531_v14  ;;  %v1994_v4 = vmin.f32 %v1993_v55, %v3197_v56 }
 0x12b   : > { %v535_v19 = vpop.f32.mrf.mxu0  ;;  %v792_v10 = vpop.f32.mrf.mxu1 }
 0x12c   : > { %v3202_v16 = vmin.f32 %v1653_v8, %v786_v51  ;;  %v1884_v43 = vmin.f32 %v1883_v62, %v535_v19  ;;  %v1958_v0 = vmin.f32 %v1957_v23, %v792_v10 }
 0x12d   : > { %v537_v21 = vpop.f32.mrf.mxu0  ;;  %v3204_v32 = vpop.f32.mrf.mxu1 }
 0x12e   : > { %3947 = vst [vmem:[#allocation10_spill] sm:$0xff] %v3202_v16  ;;  %3948 = vst [vmem:[#allocation11_spill] sm:$0xff] %v3204_v32  ;;  %v1662_v27 = vmin.f32 %v535_v19, %v537_v21  ;;  %v1921_v53 = vmin.f32 %v1920_v12, %v537_v21  ;;  %v1995_v25 = vmin.f32 %v1994_v4, %v3204_v32 }
 0x12f   : > { %v541_v57 = vpop.f32.mrf.mxu0  ;;  %v798_v46 = vpop.f32.mrf.mxu1 }
 0x130   : > { %v3209_v14 = vmin.f32 %v1662_v27, %v792_v10  ;;  %v1885_v55 = vmin.f32 %v1884_v43, %v541_v57  ;;  %v1959_v40 = vmin.f32 %v1958_v0, %v798_v46 }
 0x131   : > { %v543_v51 = vpop.f32.mrf.mxu0  ;;  %v3211_v8 = vpop.f32.mrf.mxu1 }
 0x132   : > { %3949 = vst [vmem:[#allocation12_spill] sm:$0xff] %v3209_v14  ;;  %3950 = vst [vmem:[#allocation13_spill] sm:$0xff] %v3211_v8  ;;  %v1671_v62 = vmin.f32 %v541_v57, %v543_v51  ;;  %v1922_v49 = vmin.f32 %v1921_v53, %v543_v51  ;;  %v1996_v60 = vmin.f32 %v1995_v25, %v3211_v8 }
 0x133   : > { %v547_v19 = vpop.f32.mrf.mxu0  ;;  %v804_v12 = vpop.f32.mrf.mxu1 }
 0x134   : > { %v3216_v21 = vmin.f32 %v1671_v62, %v798_v46  ;;  %v1886_v4 = vmin.f32 %v1885_v55, %v547_v19  ;;  %v1960_v56 = vmin.f32 %v1959_v40, %v804_v12 }
 0x135   : > { %v549_v10 = vpop.f32.mrf.mxu0  ;;  %v3218_v27 = vpop.f32.mrf.mxu1 }
 0x136   : > { %3951 = vst [vmem:[#allocation14_spill] sm:$0xff] %v3216_v21  ;;  %3952 = vst [vmem:[#allocation15_spill] sm:$0xff] %v3218_v27  ;;  %v1680_v43 = vmin.f32 %v547_v19, %v549_v10  ;;  %v1923_v16 = vmin.f32 %v1922_v49, %v549_v10  ;;  %v1997_v23 = vmin.f32 %v1996_v60, %v3218_v27 }
 0x137   : > { %v553_v57 = vpop.f32.mrf.mxu0  ;;  %v810_v53 = vpop.f32.mrf.mxu1 }
 0x138   : > { %v3223_v51 = vmin.f32 %v1680_v43, %v804_v12  ;;  %v1887_v25 = vmin.f32 %v1886_v4, %v553_v57  ;;  %v1961_v32 = vmin.f32 %v1960_v56, %v810_v53 }
 0x139   : > { %v555_v46 = vpop.f32.mrf.mxu0  ;;  %v3225_v62 = vpop.f32.mrf.mxu1 }
 0x13a   : > { %3953 = vst [vmem:[#allocation16_spill] sm:$0xff] %v3223_v51  ;;  %3954 = vst [vmem:[#allocation17_spill] sm:$0xff] %v3225_v62  ;;  %v1689_v55 = vmin.f32 %v553_v57, %v555_v46  ;;  %v1924_v14 = vmin.f32 %v1923_v16, %v555_v46  ;;  %v1998_v0 = vmin.f32 %v1997_v23, %v3225_v62 }
 0x13b   : > { %v559_v19 = vpop.f32.mrf.mxu0  ;;  %v816_v49 = vpop.f32.mrf.mxu1 }
 0x13c   : > { %v3230_v10 = vmin.f32 %v1689_v55, %v810_v53  ;;  %v1888_v60 = vmin.f32 %v1887_v25, %v559_v19  ;;  %v1962_v8 = vmin.f32 %v1961_v32, %v816_v49 }
 0x13d   : > { %v561_v12 = vpop.f32.mrf.mxu0  ;;  %v3232_v43 = vpop.f32.mrf.mxu1 }
 0x13e   : > { %3955 = vst [vmem:[#allocation18_spill] sm:$0xff] %v3230_v10  ;;  %3956 = vst [vmem:[#allocation19_spill] sm:$0xff] %v3232_v43  ;;  %v1698_v4 = vmin.f32 %v559_v19, %v561_v12  ;;  %v1925_v21 = vmin.f32 %v1924_v14, %v561_v12  ;;  %v1999_v40 = vmin.f32 %v1998_v0, %v3232_v43 }
 0x13f   : > { %v565_v57 = vpop.f32.mrf.mxu0  ;;  %v822_v16 = vpop.f32.mrf.mxu1 }
 0x140   : > { %v3237_v46 = vmin.f32 %v1698_v4, %v816_v49  ;;  %v1889_v23 = vmin.f32 %v1888_v60, %v565_v57  ;;  %v1963_v27 = vmin.f32 %v1962_v8, %v822_v16 }
 0x141   : > { %v567_v53 = vpop.f32.mrf.mxu0  ;;  %v3239_v55 = vpop.f32.mrf.mxu1 }
 0x142   : > { %3957 = vst [vmem:[#allocation20_spill] sm:$0xff] %v3237_v46  ;;  %3958 = vst [vmem:[#allocation21_spill] sm:$0xff] %v3239_v55  ;;  %v1707_v25 = vmin.f32 %v565_v57, %v567_v53  ;;  %v1926_v51 = vmin.f32 %v1925_v21, %v567_v53  ;;  %v2000_v56 = vmin.f32 %v1999_v40, %v3239_v55 }
 0x143   : > { %v571_v19 = vpop.f32.mrf.mxu0  ;;  %v828_v14 = vpop.f32.mrf.mxu1 }
 0x144   : > { %v3244_v12 = vmin.f32 %v1707_v25, %v822_v16  ;;  %v1890_v0 = vmin.f32 %v1889_v23, %v571_v19  ;;  %v1964_v62 = vmin.f32 %v1963_v27, %v828_v14 }
 0x145   : > { %v573_v49 = vpop.f32.mrf.mxu0  ;;  %v3246_v4 = vpop.f32.mrf.mxu1 }
 0x146   : > { %3959 = vst [vmem:[#allocation22_spill] sm:$0xff] %v3244_v12  ;;  %3960 = vst [vmem:[#allocation23_spill] sm:$0xff] %v3246_v4  ;;  %v1716_v60 = vmin.f32 %v571_v19, %v573_v49  ;;  %v1927_v10 = vmin.f32 %v1926_v51, %v573_v49  ;;  %v2001_v32 = vmin.f32 %v2000_v56, %v3246_v4 }
 0x147   : > { %v577_v57 = vpop.f32.mrf.mxu0  ;;  %v834_v21 = vpop.f32.mrf.mxu1 }
 0x148   : > { %v3251_v53 = vmin.f32 %v1716_v60, %v828_v14  ;;  %v1891_v40 = vmin.f32 %v1890_v0, %v577_v57  ;;  %v1965_v43 = vmin.f32 %v1964_v62, %v834_v21 }
 0x149   : > { %v579_v16 = vpop.f32.mrf.mxu0  ;;  %v3253_v25 = vpop.f32.mrf.mxu1 }
 0x14a   : > { %3961 = vst [vmem:[#allocation24_spill] sm:$0xff] %v3251_v53  ;;  %3962 = vst [vmem:[#allocation25_spill] sm:$0xff] %v3253_v25  ;;  %v1725_v23 = vmin.f32 %v577_v57, %v579_v16  ;;  %v1928_v46 = vmin.f32 %v1927_v10, %v579_v16  ;;  %v2002_v8 = vmin.f32 %v2001_v32, %v3253_v25 }
 0x14b   : > { %v583_v19 = vpop.f32.mrf.mxu0  ;;  %v840_v51 = vpop.f32.mrf.mxu1 }
 0x14c   : > { %v3258_v49 = vmin.f32 %v1725_v23, %v834_v21  ;;  %v1892_v56 = vmin.f32 %v1891_v40, %v583_v19  ;;  %v1966_v55 = vmin.f32 %v1965_v43, %v840_v51  ;;  %v1366_v43 = vlaneseq }
 0x14d   : > { %v585_v14 = vpop.f32.mrf.mxu0  ;;  %v3260_v60 = vpop.f32.mrf.mxu1 }
 0x14e   : > { %3963 = vst [vmem:[#allocation26_spill] sm:$0xff] %v3258_v49  ;;  %3964 = vst [vmem:[#allocation27_spill] sm:$0xff] %v3260_v60  ;;  %v1734_v0 = vmin.f32 %v583_v19, %v585_v14  ;;  %v1929_v12 = vmin.f32 %v1928_v46, %v585_v14  ;;  %v2003_v27 = vmin.f32 %v2002_v8, %v3260_v60 }
 0x14f   : > { %v589_v57 = vpop.f32.mrf.mxu0  ;;  %v846_v10 = vpop.f32.mrf.mxu1 }
 0x150   : > { %v3265_v16 = vmin.f32 %v1734_v0, %v840_v51  ;;  %v1893_v32 = vmin.f32 %v1892_v56, %v589_v57  ;;  %v1967_v4 = vmin.f32 %v1966_v55, %v846_v10  ;;  %v3968_v55 = vmin.f32 %v2970_v48, %v2964_v44 }
 0x151   : > { %v591_v21 = vpop.f32.mrf.mxu0  ;;  %v3267_v23 = vpop.f32.mrf.mxu1 }
 0x152   : > { %3965 = vst [vmem:[#allocation28_spill] sm:$0xff] %v3265_v16  ;;  %3966 = vst [vmem:[#allocation29_spill] sm:$0xff] %v3267_v23  ;;  %v1894_v40 = vrot.slane %v1893_v32, 4  ;;  %v1968_v53 = vrot.slane %v1967_v4, 4  ;;  %v1743_v37 = vmin.f32 %v589_v57, %v591_v21  ;;  %v1930_v62 = vmin.f32 %v1929_v12, %v591_v21 }
 0x153   : > { %v2004_v46 = vmin.f32 %v2003_v27, %v3267_v23  ;;  %v3272_v19 = vpop.f32.mrf.mxu0  ;;  %v3274_v8 = vpop.f32.mrf.mxu1  ;;  %v2501_v16 = vmov 1966171168  }
 0x154   : > { %v1895_v51 = vmin.f32 %v1893_v32, %v1894_v40  ;;  %v1969_v14 = vmin.f32 %v1967_v4, %v1968_v53  ;;  %v3276_v56 = vmin.f32 %v1743_v37, %v846_v10  ;;  %v1467_v0 = vmin.f32 %v3968_v55, %v3272_v19 }
 0x155   : > { %v1931_v60 = vrot.slane %v1930_v62, 4  ;;  %v2177_v57 = vunpack.c.l.s4 %v2501_v16  ;;  %v2005_v12 = vrot.slane %v2004_v46, 4  ;;  %v3282_v21 = vpop.f32.mrf.mxu0  ;;  %v3284_v27 = vpop.f32.mrf.mxu1  ;;  %v3969_v40 = vmin.f32 %v2984_v59, %v2974_v52 }
 0x156   : > { %3967 = vst [vmem:[#allocation30_spill] sm:$0xff] %v3276_v56  ;;  %v1896_v25 = vrot.slane %v1895_v51, 2  ;;  %v1970_v49 = vrot.slane %v1969_v14, 2  ;;  %v1468_v4 = vmin.f32 %v1467_v0, %v3282_v21 }
 0x157   : > { %v1932_v53 = vmin.f32 %v1930_v62, %v1931_v60  ;;  %v2006_v10 = vmin.f32 %v2004_v46, %v2005_v12  ;;  %v3289_v44 = vpop.f32.mrf.mxu0  ;;  %v3291_v48 = vpop.f32.mrf.mxu1  ;;  %v3302_v46 = vshrl.u32 %v1366_v43, 7  ;;  %v2178_v0 = vunpack.c.0.s8 %v2177_v57 }
 0x158   : > { %v1897_v32 = vmin.f32 %v1895_v51, %v1896_v25  ;;  %v1971_v16 = vmin.f32 %v1969_v14, %v1970_v49  ;;  %v1476_v55 = vmin.f32 %v3969_v40, %v3289_v44  ;;  %v1469_v60 = vmin.f32 %v1468_v4, %v3274_v8 }
 0x159   : > { %v1933_v41 = vrot.slane %v1932_v53, 2  ;;  %v2007_v28 = vrot.slane %v2006_v10, 2  ;;  %v3297_v39 = vpop.f32.mrf.mxu0  ;;  %v3299_v37 = vpop.f32.mrf.mxu1  ;;  %3970 = vst [vmem:[#allocation31_spill] sm:$0xff] %v3302_v46  ;;  %v3971_v40 = vmin.f32 %v2997_v7, %v2988_v63 }
 0x15a   : > { %v1898_v62 = vrot.slane %v1897_v32, 1  ;;  %v1477_v25 = vmin.f32 %v1476_v55, %v3297_v39  ;;  %v1972_v49 = vrot.slane %v1971_v16, 1  ;;  %v1470_v59 = vmin.f32 %v1469_v60, %v3284_v27 }
 0x15b   : > { %v1934_v51 = vmin.f32 %v1932_v53, %v1933_v41  ;;  %v2008_v14 = vmin.f32 %v2006_v10, %v2007_v28  ;;  %v3305_v12 = vpop.f32.mrf.mxu0  ;;  %v3307_v52 = vpop.f32.mrf.mxu1  ;;  %v3320_v53 = vsub.s32 %v2178_v0, %v3302_v46 }
 0x15c   : > { %v1485_v4 = vmin.f32 %v3971_v40, %v3305_v12  ;;  %1471 = vmin.xlane.f32.xlu0 %v1470_v59  ;;  %v1478_v28 = vmin.f32 %v1477_v25, %v3291_v48  ;;  %v1899_v41 = vmin.f32 %v1897_v32, %v1898_v62  ;;  %v1973_v60 = vmin.f32 %v1971_v16, %v1972_v49 }
 0x15d   : > { %v1935_v23 = vrot.slane %v1934_v51, 1  ;;  %v2009_v43 = vrot.slane %v2008_v14, 1  ;;  %v3314_v57 = vpop.f32.mrf.mxu0  ;;  %v3316_v55 = vpop.f32.mrf.mxu1  ;;  %3972 = vst [vmem:[#allocation32_spill] sm:$0xff] %v3320_v53  ;;  %v3973_v40 = vmin.f32 %v3010_v18, %v3001_v11 }
 0x15e   : > { %v1486_v10 = vmin.f32 %v1485_v4, %v3314_v57  ;;  %v1479_v59 = vmin.f32 %v1478_v28, %v3299_v37 }
 0x15f   : > { %v1936_v56 = vmin.f32 %v1934_v51, %v1935_v23  ;;  %v2010_v35 = vmin.f32 %v2008_v14, %v2009_v43  ;;  %v3323_v63 = vpop.f32.mrf.mxu0  ;;  %v3325_v7 = vpop.f32.mrf.mxu1 }
 0x160   : > { %v1494_v25 = vmin.f32 %v3973_v40, %v3323_v63  ;;  %v1487_v32 = vmin.f32 %v1486_v10, %v3307_v52  ;;  %1480 = vmin.xlane.f32.xlu0 %v1479_v59 }
 0x161   : > { %v2172_v62 = vcombine.low %v1899_v41, %v1936_v56  ;;  %v2173_v0 = vcombine.low %v1973_v60, %v2010_v35  ;;  %v3333_v4 = vpop.f32.mrf.mxu0  ;;  %v3335_v23 = vpop.f32.mrf.mxu1  ;;  %v3976_v35 = vmin.f32 %v3023_v29, %v3014_v22  ;;  %v3977_v22 = vmin.f32 %v3036_v54, %v3027_v45 }
 0x162   : > { %v1495_v16 = vmin.f32 %v1494_v25, %v3333_v4  ;;  %v1488_v49 = vmin.f32 %v1487_v32, %v3316_v55  ;;  %v3978_v45 = vmin.f32 %v3049_v3, %v3040_v58  ;;  %v3979_v58 = vmin.f32 %v3062_v17, %v3053_v9 }
 0x163   : > { %v3340_v51 = vrot.slane %v2172_v62, %v3320_v53  ;;  %v3343_v14 = vrot.slane %v2173_v0, %v3320_v53  ;;  %v3345_v11 = vpop.f32.mrf.mxu0  ;;  %v3347_v18 = vpop.f32.mrf.mxu1  ;;  %v3981_v9 = vmin.f32 %v3075_v42, %v3066_v24  ;;  %v3984_v24 = vmin.f32 %v3088_v61, %v3079_v50 }
 0x164   : > { %v1503_v56 = vmin.f32 %v3976_v35, %v3345_v11  ;;  %1489 = vmin.xlane.f32.xlu1 %v1488_v49  ;;  %v1496_v43 = vmin.f32 %v1495_v16, %v3325_v7  ;;  %v3987_v50 = vmin.f32 %v3101_v15, %v3092_v31  ;;  %v3990_v31 = vmin.f32 %v3114_v33, %v3105_v20 }
 0x165   : > { %3974 = vst [vmem:[#allocation33_spill] sm:$0xff] %v3340_v51  ;;  %3975 = vst [vmem:[#allocation34_spill] sm:$0xff] %v3343_v14  ;;  %v3356_v41 = vpop.f32.mrf.mxu0  ;;  %v3358_v10 = vpop.f32.mrf.mxu1  ;;  %v3993_v20 = vmin.f32 %v3127_v1, %v3118_v30  ;;  %v3996_v30 = vmin.f32 %v3140_v26, %v3131_v13  ;;  %v4000_v13 = vmin.f32 %v3153_v34, %v3144_v36 }
 0x166   : > { %v1504_v60 = vmin.f32 %v1503_v56, %v3356_v41  ;;  %v1497_v59 = vmin.f32 %v1496_v43, %v3335_v23  ;;  %v4002_v36 = vmin.f32 %v3160_v5, %v3155_v6  ;;  %v2085_v5 = vmin.f32 %v3274_v8, %v3291_v48 }
 0x167   : > { %v3362_v40 = vpop.f32.mrf.mxu0  ;;  %v3364_v25 = vpop.f32.mrf.mxu1  ;;  %v4003_v6 = vmin.f32 %v3167_v2, %v3162_v47  ;;  %v2122_v47 = vmin.f32 %v3284_v27, %v3299_v37 }
 0x168   : > { %v1512_v29 = vmin.f32 %v3977_v22, %v3362_v40  ;;  %1498 = vmin.xlane.f32.xlu1 %v1497_v59  ;;  %v1505_v32 = vmin.f32 %v1504_v60, %v3347_v18 }
 0x169   : > { %v3371_v62 = vpop.f32.mrf.mxu0  ;;  %v3373_v0 = vpop.f32.mrf.mxu1  ;;  %v2123_v27 = vmin.f32 %v2122_v47, %v3316_v55 }
 0x16a   : > { %v1513_v16 = vmin.f32 %v1512_v29, %v3371_v62  ;;  %v1506_v49 = vmin.f32 %v1505_v32, %v3358_v10 }
 0x16b   : > { %v3377_v35 = vpop.f32.mrf.mxu0  ;;  %v3379_v56 = vpop.f32.mrf.mxu1 }
 0x16c   : > { %v1521_v54 = vmin.f32 %v3978_v45, %v3377_v35  ;;  %1507 = vmin.xlane.f32.xlu0 %v1506_v49  ;;  %v1514_v43 = vmin.f32 %v1513_v16, %v3364_v25 }
 0x16d   : > { %v3386_v60 = vpop.f32.mrf.mxu0  ;;  %v3388_v59 = vpop.f32.mrf.mxu1 }
 0x16e   : > { %v1522_v22 = vmin.f32 %v1521_v54, %v3386_v60  ;;  %v1515_v29 = vmin.f32 %v1514_v43, %v3373_v0 }
 0x16f   : > { %v3392_v32 = vpop.f32.mrf.mxu0  ;;  %v3394_v28 = vpop.f32.mrf.mxu1 }
 0x170   : > { %v1530_v3 = vmin.f32 %v3979_v58, %v3392_v32  ;;  %1516 = vmin.xlane.f32.xlu1 %v1515_v29  ;;  %v1523_v16 = vmin.f32 %v1522_v22, %v3379_v56 }
 0x171   : > { %v3401_v49 = vpop.f32.mrf.mxu0  ;;  %v3403_v45 = vpop.f32.mrf.mxu1 }
 0x172   : > { %3980 = vst [vmem:[#allocation35_spill] sm:$0xff] %v3403_v45  ;;  %v1531_v54 = vmin.f32 %v1530_v3, %v3401_v49  ;;  %v1524_v43 = vmin.f32 %v1523_v16, %v3388_v59 }
 0x173   : > { %v3407_v46 = vpop.f32.mrf.mxu0  ;;  %v3409_v14 = vpop.f32.mrf.mxu1 }
 0x174   : > { %v1539_v17 = vmin.f32 %v3981_v9, %v3407_v46  ;;  %1525 = vmin.xlane.f32.xlu0 %v1524_v43  ;;  %v1532_v22 = vmin.f32 %v1531_v54, %v3394_v28 }
 0x175   : > { %v3416_v29 = vpop.f32.mrf.mxu0  ;;  %v3418_v58 = vpop.f32.mrf.mxu1 }
 0x176   : > { %3982 = vst [vmem:[#allocation36_spill] sm:$0xff] %v3416_v29  ;;  %3983 = vst [vmem:[#allocation37_spill] sm:$0xff] %v3418_v58  ;;  %v1540_v3 = vmin.f32 %v1539_v17, %v3416_v29  ;;  %v1533_v16 = vmin.f32 %v1532_v22, %v3403_v45 }
 0x177   : > { %v3422_v51 = vpop.f32.mrf.mxu0  ;;  %v3424_v53 = vpop.f32.mrf.mxu1 }
 0x178   : > { %v1548_v42 = vmin.f32 %v3984_v24, %v3422_v51  ;;  %1534 = vmin.xlane.f32.xlu1 %v1533_v16  ;;  %v1541_v54 = vmin.f32 %v1540_v3, %v3409_v14 }
 0x179   : > { %v3431_v43 = vpop.f32.mrf.mxu0  ;;  %v3433_v9 = vpop.f32.mrf.mxu1 }
 0x17a   : > { %3985 = vst [vmem:[#allocation38_spill] sm:$0xff] %v3431_v43  ;;  %3986 = vst [vmem:[#allocation39_spill] sm:$0xff] %v3433_v9  ;;  %v1549_v17 = vmin.f32 %v1548_v42, %v3431_v43  ;;  %v1542_v22 = vmin.f32 %v1541_v54, %v3418_v58 }
 0x17b   : > { %v3437_v29 = vpop.f32.mrf.mxu0  ;;  %v3439_v45 = vpop.f32.mrf.mxu1 }
 0x17c   : > { %v1557_v61 = vmin.f32 %v3987_v50, %v3437_v29  ;;  %1543 = vmin.xlane.f32.xlu0 %v1542_v22  ;;  %v1550_v3 = vmin.f32 %v1549_v17, %v3424_v53 }
 0x17d   : > { %v3446_v16 = vpop.f32.mrf.mxu0  ;;  %v3448_v24 = vpop.f32.mrf.mxu1 }
 0x17e   : > { %3988 = vst [vmem:[#allocation40_spill] sm:$0xff] %v3446_v16  ;;  %3989 = vst [vmem:[#allocation41_spill] sm:$0xff] %v3448_v24  ;;  %v1558_v42 = vmin.f32 %v1557_v61, %v3446_v16  ;;  %v1551_v54 = vmin.f32 %v1550_v3, %v3433_v9 }
 0x17f   : > { %v3452_v43 = vpop.f32.mrf.mxu0  ;;  %v3454_v58 = vpop.f32.mrf.mxu1 }
 0x180   : > { %v1566_v15 = vmin.f32 %v3990_v31, %v3452_v43  ;;  %1552 = vmin.xlane.f32.xlu1 %v1551_v54  ;;  %v1559_v17 = vmin.f32 %v1558_v42, %v3439_v45 }
 0x181   : > { %v3461_v22 = vpop.f32.mrf.mxu0  ;;  %v3463_v50 = vpop.f32.mrf.mxu1 }
 0x182   : > { %3991 = vst [vmem:[#allocation42_spill] sm:$0xff] %v3461_v22  ;;  %3992 = vst [vmem:[#allocation43_spill] sm:$0xff] %v3463_v50  ;;  %v1567_v61 = vmin.f32 %v1566_v15, %v3461_v22  ;;  %v1560_v3 = vmin.f32 %v1559_v17, %v3448_v24 }
 0x183   : > { %v3467_v16 = vpop.f32.mrf.mxu0  ;;  %v3469_v9 = vpop.f32.mrf.mxu1 }
 0x184   : > { %v1575_v33 = vmin.f32 %v3993_v20, %v3467_v16  ;;  %1561 = vmin.xlane.f32.xlu0 %v1560_v3  ;;  %v1568_v42 = vmin.f32 %v1567_v61, %v3454_v58 }
 0x185   : > { %v3476_v54 = vpop.f32.mrf.mxu0  ;;  %v3478_v31 = vpop.f32.mrf.mxu1 }
 0x186   : > { %3994 = vst [vmem:[#allocation44_spill] sm:$0xff] %v3476_v54  ;;  %3995 = vst [vmem:[#allocation45_spill] sm:$0xff] %v3478_v31  ;;  %v1576_v15 = vmin.f32 %v1575_v33, %v3476_v54  ;;  %v1569_v17 = vmin.f32 %v1568_v42, %v3463_v50 }
 0x187   : > { %v3482_v22 = vpop.f32.mrf.mxu0  ;;  %v3484_v24 = vpop.f32.mrf.mxu1 }
 0x188   : > { %v1584_v1 = vmin.f32 %v3996_v30, %v3482_v22  ;;  %1570 = vmin.xlane.f32.xlu1 %v1569_v17  ;;  %v1577_v61 = vmin.f32 %v1576_v15, %v3469_v9 }
 0x189   : > { %v3491_v3 = vpop.f32.mrf.mxu0  ;;  %v3493_v20 = vpop.f32.mrf.mxu1 }
 0x18a   : > { %3997 = vst [vmem:[#allocation46_spill] sm:$0xff] %v3491_v3  ;;  %3998 = vst [vmem:[#allocation47_spill] sm:$0xff] %v3493_v20  ;;  %v1585_v33 = vmin.f32 %v1584_v1, %v3491_v3  ;;  %v1578_v42 = vmin.f32 %v1577_v61, %v3478_v31 }
 0x18b   : > { %v3497_v54 = vpop.f32.mrf.mxu0  ;;  %v3499_v50 = vpop.f32.mrf.mxu1 }
 0x18c   : > { %3999 = vst [vmem:[#allocation48_spill] sm:$0xff] %v3497_v54  ;;  %v1593_v26 = vmin.f32 %v4000_v13, %v3497_v54  ;;  %1579 = vmin.xlane.f32.xlu0 %v1578_v42  ;;  %v1586_v15 = vmin.f32 %v1585_v33, %v3484_v24  ;;  %v2011_v54 = vmin.f32 %v3272_v19, %v3289_v44 }
 0x18d   : > { %v3506_v17 = vpop.f32.mrf.mxu0  ;;  %v3508_v30 = vpop.f32.mrf.mxu1  ;;  %v2086_v44 = vmin.f32 %v2085_v5, %v3307_v52 }
 0x18e   : > { %4001 = vst [vmem:[#allocation49_spill] sm:$0xff] %v3506_v17  ;;  %v1594_v1 = vmin.f32 %v1593_v26, %v3506_v17  ;;  %v1587_v61 = vmin.f32 %v1586_v15, %v3493_v20  ;;  %v2012_v19 = vmin.f32 %v2011_v54, %v3305_v12  ;;  %v4004_v12 = vld [vmem:[#allocation2_spill] sm:$0xff] }
 0x18f   : > { %v3512_v3 = vpop.f32.mrf.mxu0  ;;  %v3514_v31 = vpop.f32.mrf.mxu1  ;;  %v4005_v52 = vmin.f32 %v3174_v38, %v4004_v12 }
 0x190   : > { %v1602_v34 = vmin.f32 %v4002_v36, %v3512_v3  ;;  %1588 = vmin.xlane.f32.xlu1 %v1587_v61  ;;  %v1595_v33 = vmin.f32 %v1594_v1, %v3499_v50  ;;  %v2048_v36 = vmin.f32 %v3282_v21, %v3297_v39  ;;  %v2013_v21 = vmin.f32 %v2012_v19, %v3323_v63 }
 0x191   : > { %v3521_v42 = vpop.f32.mrf.mxu0  ;;  %v3523_v13 = vpop.f32.mrf.mxu1 }
 0x192   : > { %v1603_v26 = vmin.f32 %v1602_v34, %v3521_v42  ;;  %v1596_v15 = vmin.f32 %v1595_v33, %v3508_v30  ;;  %v2049_v2 = vmin.f32 %v2048_v36, %v3314_v57  ;;  %v2014_v63 = vmin.f32 %v2013_v21, %v3345_v11  ;;  %v4006_v11 = vld [vmem:[#allocation4_spill] sm:$0xff] }
 0x193   : > { %v3527_v17 = vpop.f32.mrf.mxu0  ;;  %v3529_v20 = vpop.f32.mrf.mxu1 }
 0x194   : > { %v1611_v1 = vmin.f32 %v4003_v6, %v3527_v17  ;;  %1597 = vmin.xlane.f32.xlu0 %v1596_v15  ;;  %v1604_v61 = vmin.f32 %v1603_v26, %v3514_v31  ;;  %v2087_v15 = vmin.f32 %v2086_v44, %v3325_v7  ;;  %v2050_v37 = vmin.f32 %v2049_v2, %v3333_v4 }
 0x195   : > { %v3542_v34 = vpop.f32.mrf.mxu0  ;;  %v3544_v33 = vpop.f32.mrf.mxu1  ;;  %v2015_v4 = vmin.f32 %v2014_v63, %v3362_v40 }
 0x196   : > { %v1612_v8 = vmin.f32 %v1611_v1, %v3542_v34  ;;  %v1605_v48 = vmin.f32 %v1604_v61, %v3523_v13  ;;  %v2088_v7 = vmin.f32 %v2087_v15, %v3347_v18  ;;  %v2124_v61 = vmin.f32 %v2123_v27, %v3335_v23 }
 0x197   : > { %v3553_v26 = vpop.f32.mrf.mxu0  ;;  %v3555_v39 = vpop.f32.mrf.mxu1  ;;  %v2051_v36 = vmin.f32 %v2050_v37, %v3356_v41  ;;  %v2016_v40 = vmin.f32 %v2015_v4, %v3377_v35  ;;  %v4009_v35 = vld [vmem:[#allocation6_spill] sm:$0xff]  ;;  %v4010_v37 = vld [vmem:[#allocation5_spill] sm:$0xff]  ;;  %v4012_v4 = vld [vmem:[#allocation35_spill] sm:$0xff] }
 0x198   : > { %v1620_v54 = vmin.f32 %v4005_v52, %v3553_v26  ;;  %1606 = vmin.xlane.f32.xlu1 %v1605_v48  ;;  %v1613_v5 = vmin.f32 %v1612_v8, %v3529_v20  ;;  %v2089_v44 = vmin.f32 %v2088_v7, %v3364_v25  ;;  %v4007_v8 = vld [vmem:[#allocation3_spill] sm:$0xff]  ;;  %v2125_v23 = vmin.f32 %v2124_v61, %v3358_v10 }
 0x199   : > { %v3566_v57 = vpop.f32.mrf.mxu0  ;;  %v3568_v6 = vpop.f32.mrf.mxu1  ;;  %v4008_v18 = vmin.f32 %v4006_v11, %v4007_v8  ;;  %v2052_v41 = vmin.f32 %v2051_v36, %v3371_v62  ;;  %v2017_v62 = vmin.f32 %v2016_v40, %v3392_v32  ;;  %v4013_v11 = vld [vmem:[#allocation36_spill] sm:$0xff]  ;;  %v4017_v40 = vld [vmem:[#allocation37_spill] sm:$0xff] }
 0x19a   : > { %v1621_v1 = vmin.f32 %v1620_v54, %v3566_v57  ;;  %v1614_v38 = vmin.f32 %v1613_v5, %v3544_v33  ;;  %v2090_v25 = vmin.f32 %v2089_v44, %v3379_v56  ;;  %v2126_v52 = vmin.f32 %v2125_v23, %v3373_v0 }
 0x19b   : > { %v3576_v19 = vpop.f32.mrf.mxu0  ;;  %v3578_v55 = vpop.f32.mrf.mxu1  ;;  %v2053_v54 = vmin.f32 %v2052_v41, %v3386_v60  ;;  %v4011_v56 = vmin.f32 %v4009_v35, %v4010_v37  ;;  %v2018_v32 = vmin.f32 %v2017_v62, %v3407_v46  ;;  %v4014_v46 = vld [vmem:[#allocation8_spill] sm:$0xff]  ;;  %v4019_v35 = vld [vmem:[#allocation39_spill] sm:$0xff] }
 0x19c   : > { %v1629_v48 = vmin.f32 %v4008_v18, %v3576_v19  ;;  %1615 = vmin.xlane.f32.xlu0 %v1614_v38  ;;  %v1622_v47 = vmin.f32 %v1621_v1, %v3555_v39  ;;  %v2091_v27 = vmin.f32 %v2090_v25, %v3394_v28  ;;  %v2127_v0 = vmin.f32 %v2126_v52, %v3388_v59 }
 0x19d   : > { %v3589_v2 = vpop.f32.mrf.mxu0  ;;  %v3591_v21 = vpop.f32.mrf.mxu1  ;;  %v2054_v60 = vmin.f32 %v2053_v54, %v3401_v49  ;;  %v2019_v49 = vmin.f32 %v2018_v32, %v3422_v51 }
 0x19e   : > { %v1630_v15 = vmin.f32 %v1629_v48, %v3589_v2  ;;  %v1623_v12 = vmin.f32 %v1622_v47, %v3568_v6  ;;  %v2092_v28 = vmin.f32 %v2091_v27, %v3409_v14  ;;  %v2128_v44 = vmin.f32 %v2127_v0, %v4012_v4  ;;  %v4015_v47 = vld [vmem:[#allocation7_spill] sm:$0xff]  ;;  %v4024_v4 = vld [vmem:[#allocation41_spill] sm:$0xff] }
 0x19f   : > { %v3599_v5 = vpop.f32.mrf.mxu0  ;;  %v3601_v10 = vpop.f32.mrf.mxu1  ;;  %v2055_v8 = vmin.f32 %v2054_v60, %v4013_v11  ;;  %v4016_v14 = vmin.f32 %v4014_v46, %v4015_v47  ;;  %v2020_v51 = vmin.f32 %v2019_v49, %v3437_v29  ;;  %v4021_v29 = vld [vmem:[#allocation10_spill] sm:$0xff] }
 0x1a0   : > { %v1638_v63 = vmin.f32 %v4011_v56, %v3599_v5  ;;  %1624 = vmin.xlane.f32.xlu1 %v1623_v12  ;;  %v1631_v7 = vmin.f32 %v1630_v15, %v3578_v55  ;;  %v2093_v48 = vmin.f32 %v2092_v28, %v3424_v53  ;;  %v2129_v25 = vmin.f32 %v2128_v44, %v4017_v40  ;;  %v4018_v15 = vld [vmem:[#allocation38_spill] sm:$0xff]  ;;  %v4020_v56 = vld [vmem:[#allocation40_spill] sm:$0xff]  ;;  %v4022_v28 = vld [vmem:[#allocation9_spill] sm:$0xff] }
 0x1a1   : > { %v3612_v1 = vpop.f32.mrf.mxu0  ;;  %v3614_v38 = vpop.f32.mrf.mxu1  ;;  %v2056_v12 = vmin.f32 %v2055_v8, %v4018_v15  ;;  %v2021_v60 = vmin.f32 %v2020_v51, %v3452_v43  ;;  %v4025_v11 = vld [vmem:[#allocation42_spill] sm:$0xff] }
 0x1a2   : > { %v1639_v61 = vmin.f32 %v1638_v63, %v3612_v1  ;;  %v1632_v36 = vmin.f32 %v1631_v7, %v3591_v21  ;;  %v2094_v53 = vmin.f32 %v2093_v48, %v3439_v45  ;;  %v2130_v37 = vmin.f32 %v2129_v25, %v4019_v35  ;;  %v4031_v35 = vld [vmem:[#allocation45_spill] sm:$0xff] }
 0x1a3   : > { %v3622_v18 = vpop.f32.mrf.mxu0  ;;  %v3624_v59 = vpop.f32.mrf.mxu1  ;;  %v2057_v63 = vmin.f32 %v2056_v12, %v4020_v56  ;;  %v4023_v45 = vmin.f32 %v4021_v29, %v4022_v28  ;;  %v2022_v43 = vmin.f32 %v2021_v60, %v3467_v16  ;;  %v4028_v16 = vld [vmem:[#allocation12_spill] sm:$0xff]  ;;  %v4032_v56 = vld [vmem:[#allocation46_spill] sm:$0xff] }
 0x1a4   : > { %v1647_v23 = vmin.f32 %v4016_v14, %v3622_v18  ;;  %1633 = vmin.xlane.f32.xlu0 %v1632_v36  ;;  %v1640_v41 = vmin.f32 %v1639_v61, %v3601_v10  ;;  %v2095_v32 = vmin.f32 %v2094_v53, %v3454_v58  ;;  %v2131_v44 = vmin.f32 %v2130_v37, %v4024_v4  ;;  %v4026_v14 = vld [vmem:[#allocation43_spill] sm:$0xff]  ;;  %v4033_v29 = vld [vmem:[#allocation48_spill] sm:$0xff]  ;;  %v4035_v4 = vld [vmem:[#allocation49_spill] sm:$0xff] }
 0x1a5   : > { %v3635_v52 = vpop.f32.mrf.mxu0  ;;  %v3637_v54 = vpop.f32.mrf.mxu1  ;;  %v2058_v8 = vmin.f32 %v2057_v63, %v4025_v11  ;;  %v2023_v12 = vmin.f32 %v2022_v43, %v3482_v22  ;;  %v4029_v53 = vld [vmem:[#allocation11_spill] sm:$0xff] }
 0x1a6   : > { %v1648_v62 = vmin.f32 %v1647_v23, %v3635_v52  ;;  %v1641_v27 = vmin.f32 %v1640_v41, %v3614_v38  ;;  %v2096_v58 = vmin.f32 %v2095_v32, %v3469_v9  ;;  %v2132_v23 = vmin.f32 %v2131_v44, %v4026_v14  ;;  %v4027_v41 = vld [vmem:[#allocation44_spill] sm:$0xff] }
 0x1a7   : > { %v3645_v7 = vpop.f32.mrf.mxu0  ;;  %v3647_v0 = vpop.f32.mrf.mxu1  ;;  %v2059_v40 = vmin.f32 %v2058_v8, %v4027_v41  ;;  %v4030_v9 = vmin.f32 %v4028_v16, %v4029_v53  ;;  %v2024_v22 = vmin.f32 %v2023_v12, %v4033_v29 }
 0x1a8   : > { %v1656_v61 = vmin.f32 %v4023_v45, %v3645_v7  ;;  %1642 = vmin.xlane.f32.xlu1 %v1641_v27  ;;  %v1649_v36 = vmin.f32 %v1648_v62, %v3624_v59  ;;  %v2097_v51 = vmin.f32 %v2096_v58, %v3484_v24  ;;  %v2133_v37 = vmin.f32 %v2132_v23, %v4031_v35 }
 0x1a9   : > { %v3658_v49 = vpop.f32.mrf.mxu0  ;;  %v3660_v48 = vpop.f32.mrf.mxu1  ;;  %v2060_v63 = vmin.f32 %v2059_v40, %v4032_v56  ;;  %v2025_v43 = vmin.f32 %v2024_v22, %v3512_v3  ;;  %v4040_v56 = vld [vmem:[#allocation15_spill] sm:$0xff] }
 0x1aa   : > { %v1657_v46 = vmin.f32 %v1656_v61, %v3658_v49  ;;  %v1650_v47 = vmin.f32 %v1649_v36, %v3637_v54  ;;  %v2098_v24 = vmin.f32 %v2097_v51, %v3499_v50  ;;  %v4034_v61 = vld [vmem:[#allocation47_spill] sm:$0xff] }
 0x1ab   : > { %v3668_v25 = vpop.f32.mrf.mxu0  ;;  %v3670_v15 = vpop.f32.mrf.mxu1  ;;  %v2134_v36 = vmin.f32 %v2133_v37, %v4034_v61  ;;  %v2061_v44 = vmin.f32 %v2060_v63, %v4035_v4  ;;  %v2026_v3 = vmin.f32 %v2025_v43, %v3527_v17  ;;  %v4039_v37 = vld [vmem:[#allocation16_spill] sm:$0xff] }
 0x1ac   : > { %v1665_v62 = vmin.f32 %v4030_v9, %v3668_v25  ;;  %1651 = vmin.xlane.f32.xlu0 %v1650_v47  ;;  %v1658_v27 = vmin.f32 %v1657_v46, %v3647_v0  ;;  %v2099_v58 = vmin.f32 %v2098_v24, %v3514_v31  ;;  %v4036_v46 = vld [vmem:[#allocation14_spill] sm:$0xff]  ;;  %v4037_v47 = vld [vmem:[#allocation13_spill] sm:$0xff]  ;;  %v4041_v63 = vmin.f32 %v4039_v37, %v4040_v56 }
 0x1ad   : > { %v3681_v60 = vpop.f32.mrf.mxu0  ;;  %v3683_v32 = vpop.f32.mrf.mxu1  ;;  %v4038_v50 = vmin.f32 %v4036_v46, %v4037_v47  ;;  %v2135_v41 = vmin.f32 %v2134_v36, %v3508_v30  ;;  %v2062_v40 = vmin.f32 %v2061_v44, %v3521_v42  ;;  %v2027_v42 = vmin.f32 %v2026_v3, %v3553_v26  ;;  %v4042_v44 = vld [vmem:[#allocation18_spill] sm:$0xff] }
 0x1ae   : > { %v1666_v28 = vmin.f32 %v1665_v62, %v3681_v60  ;;  %v1659_v45 = vmin.f32 %v1658_v27, %v3660_v48  ;;  %v2100_v31 = vmin.f32 %v2099_v58, %v3529_v20 }
 0x1af   : > { %v3691_v11 = vpop.f32.mrf.mxu0  ;;  %v3693_v8 = vpop.f32.mrf.mxu1  ;;  %v2136_v9 = vmin.f32 %v2135_v41, %v3523_v13  ;;  %v2063_v62 = vmin.f32 %v2062_v40, %v3542_v34  ;;  %v2028_v34 = vmin.f32 %v2027_v42, %v3576_v19  ;;  %v4043_v19 = vld [vmem:[#allocation17_spill] sm:$0xff] }
 0x1b0   : > { %v1674_v14 = vmin.f32 %v4038_v50, %v3691_v11  ;;  %1660 = vmin.xlane.f32.xlu1 %v1659_v45  ;;  %v1667_v23 = vmin.f32 %v1666_v28, %v3670_v15  ;;  %v2101_v35 = vmin.f32 %v2100_v31, %v3555_v39  ;;  %v4044_v43 = vmin.f32 %v4042_v44, %v4043_v19  ;;  %v4045_v31 = vld [vmem:[#allocation20_spill] sm:$0xff] }
 0x1b1   : > { %v3704_v12 = vpop.f32.mrf.mxu0  ;;  %v3706_v51 = vpop.f32.mrf.mxu1  ;;  %v2137_v29 = vmin.f32 %v2136_v9, %v3544_v33  ;;  %v2064_v22 = vmin.f32 %v2063_v62, %v3566_v57  ;;  %v2029_v33 = vmin.f32 %v2028_v34, %v3599_v5 }
 0x1b2   : > { %v1675_v16 = vmin.f32 %v1674_v14, %v3704_v12  ;;  %v1668_v53 = vmin.f32 %v1667_v23, %v3683_v32  ;;  %v2102_v26 = vmin.f32 %v2101_v35, %v3578_v55 }
 0x1b3   : > { %v1061_v27 = vpop.f32.mrf.mxu0  ;;  %v1318_v30 = vpop.f32.mrf.mxu1  ;;  %v2138_v45 = vmin.f32 %v2137_v29, %v3568_v6  ;;  %v2065_v61 = vmin.f32 %v2064_v22, %v3589_v2  ;;  %v2030_v50 = vmin.f32 %v2029_v33, %v3622_v18  ;;  %v4049_v29 = vld [vmem:[#allocation21_spill] sm:$0xff] }
 0x1b4   : > { %v1683_v17 = vmin.f32 %v4041_v63, %v1061_v27  ;;  %1669 = vmin.xlane.f32.xlu0 %v1668_v53  ;;  %v1676_v20 = vmin.f32 %v1675_v16, %v3693_v8  ;;  %v2103_v57 = vmin.f32 %v2102_v26, %v3601_v10  ;;  %v4046_v16 = vld [vmem:[#allocation19_spill] sm:$0xff] }
 0x1b5   : > { %v1063_v13 = vpop.f32.mrf.mxu0  ;;  %v3722_v24 = vpop.f32.mrf.mxu1  ;;  %v2139_v46 = vmin.f32 %v2138_v45, %v3591_v21  ;;  %v2066_v6 = vmin.f32 %v2065_v61, %v3612_v1  ;;  %v2031_v21 = vmin.f32 %v2030_v50, %v3645_v7  ;;  %v4047_v53 = vmin.f32 %v4045_v31, %v4046_v16 }
 0x1b6   : > { %v1684_v28 = vmin.f32 %v1683_v17, %v1063_v13  ;;  %v1677_v39 = vmin.f32 %v1676_v20, %v3706_v51  ;;  %v2104_v5 = vmin.f32 %v2103_v57, %v3624_v59 }
 0x1b7   : > { %v3729_v36 = vpop.f32.mrf.mxu0  ;;  %v3731_v4 = vpop.f32.mrf.mxu1  ;;  %v2140_v23 = vmin.f32 %v2139_v46, %v3614_v38  ;;  %v2067_v41 = vmin.f32 %v2066_v6, %v3635_v52  ;;  %v2032_v52 = vmin.f32 %v2031_v21, %v3668_v25  ;;  %v4054_v21 = vld [vmem:[#allocation26_spill] sm:$0xff] }
 0x1b8   : > { %v1692_v55 = vmin.f32 %v4044_v43, %v3729_v36  ;;  %1678 = vmin.xlane.f32.xlu1 %v1677_v39  ;;  %v1685_v58 = vmin.f32 %v1684_v28, %v1318_v30  ;;  %v2105_v1 = vmin.f32 %v2104_v5, %v3647_v0  ;;  %v4051_v43 = vld [vmem:[#allocation24_spill] sm:$0xff] }
 0x1b9   : > { %v1069_v2 = vpop.f32.mrf.mxu0  ;;  %v3741_v47 = vpop.f32.mrf.mxu1  ;;  %v2141_v59 = vmin.f32 %v2140_v23, %v3637_v54  ;;  %v2068_v62 = vmin.f32 %v2067_v41, %v3658_v49  ;;  %v2033_v20 = vmin.f32 %v2032_v52, %v3691_v11  ;;  %v4048_v49 = vld [vmem:[#allocation22_spill] sm:$0xff] }
 0x1ba   : > { %v1693_v14 = vmin.f32 %v1692_v55, %v1069_v2  ;;  %v1686_v10 = vmin.f32 %v1685_v58, %v3722_v24  ;;  %v2106_v35 = vmin.f32 %v2105_v1, %v3670_v15  ;;  %v4050_v22 = vmin.f32 %v4048_v49, %v4049_v29  ;;  %v4052_v55 = vld [vmem:[#allocation23_spill] sm:$0xff]  ;;  %v4055_v1 = vld [vmem:[#allocation25_spill] sm:$0xff] }
 0x1bb   : > { %v1073_v40 = vpop.f32.mrf.mxu0  ;;  %v1330_v3 = vpop.f32.mrf.mxu1  ;;  %v2142_v37 = vmin.f32 %v2141_v59, %v3660_v48  ;;  %v2069_v56 = vmin.f32 %v2068_v62, %v3681_v60  ;;  %v2034_v39 = vmin.f32 %v2033_v20, %v1061_v27  ;;  %v4056_v31 = vmin.f32 %v4054_v21, %v4055_v1 }
 0x1bc   : > { %v1701_v9 = vmin.f32 %v4047_v53, %v1073_v40  ;;  %1687 = vmin.xlane.f32.xlu0 %v1686_v10  ;;  %v1694_v18 = vmin.f32 %v1693_v14, %v3731_v4  ;;  %v2107_v54 = vmin.f32 %v2106_v35, %v3693_v8 }
 0x1bd   : > { %v1075_v38 = vpop.f32.mrf.mxu0  ;;  %v1332_v42 = vpop.f32.mrf.mxu1  ;;  %v2143_v15 = vmin.f32 %v2142_v37, %v3683_v32  ;;  %v2070_v26 = vmin.f32 %v2069_v56, %v3704_v12  ;;  %v2035_v44 = vmin.f32 %v2034_v39, %v3729_v36  ;;  %v4053_v32 = vmin.f32 %v4051_v43, %v4052_v55  ;;  %v4057_v37 = vld [vmem:[#allocation28_spill] sm:$0xff]  ;;  %v4058_v56 = vld [vmem:[#allocation27_spill] sm:$0xff] }
 0x1be   : > { %v1702_v7 = vmin.f32 %v1701_v9, %v1075_v38  ;;  %v1695_v0 = vmin.f32 %v1694_v18, %v3741_v47  ;;  %v2108_v60 = vmin.f32 %v2107_v54, %v1318_v30 }
 0x1bf   : > { %v1079_v63 = vpop.f32.mrf.mxu0  ;;  %v1336_v17 = vpop.f32.mrf.mxu1  ;;  %v2144_v11 = vmin.f32 %v2143_v15, %v3706_v51  ;;  %v2071_v33 = vmin.f32 %v2070_v26, %v1063_v13  ;;  %v2036_v50 = vmin.f32 %v2035_v44, %v1073_v40 }
 0x1c0   : > { %v1710_v34 = vmin.f32 %v4050_v22, %v1079_v63  ;;  %1696 = vmin.xlane.f32.xlu1 %v1695_v0  ;;  %v1703_v25 = vmin.f32 %v1702_v7, %v1330_v3  ;;  %v2109_v19 = vmin.f32 %v2108_v60, %v3731_v4  ;;  %v4060_v60 = vld [vmem:[#allocation30_spill] sm:$0xff] }
 0x1c1   : > { %v1081_v28 = vpop.f32.mrf.mxu0  ;;  %v1338_v48 = vpop.f32.mrf.mxu1  ;;  %v2145_v27 = vmin.f32 %v2144_v11, %v3722_v24  ;;  %v2072_v30 = vmin.f32 %v2071_v33, %v1069_v2  ;;  %v2037_v23 = vmin.f32 %v2036_v50, %v1079_v63  ;;  %v4059_v63 = vmin.f32 %v4057_v37, %v4058_v56  ;;  %v4065_v37 = vld [vmem:[#allocation33_spill] sm:$0xff]  ;;  %v4066_v56 = vld [vmem:[#allocation34_spill] sm:$0xff] }
 0x1c2   : > { %v1711_v45 = vmin.f32 %v1710_v34, %v1081_v28  ;;  %v1704_v61 = vmin.f32 %v1703_v25, %v1332_v42  ;;  %v2110_v51 = vmin.f32 %v2109_v19, %v1330_v3 }
 0x1c3   : > { %v1085_v8 = vpop.f32.mrf.mxu0  ;;  %v1342_v57 = vpop.f32.mrf.mxu1  ;;  %v2146_v14 = vmin.f32 %v2145_v27, %v3741_v47  ;;  %v2073_v36 = vmin.f32 %v2072_v30, %v1075_v38 }
 0x1c4   : > { %v1719_v58 = vmin.f32 %v4053_v32, %v1085_v8  ;;  %1705 = vmin.xlane.f32.xlu0 %v1704_v61  ;;  %v1712_v12 = vmin.f32 %v1711_v45, %v1336_v17  ;;  %v2111_v41 = vmin.f32 %v2110_v51, %v1336_v17  ;;  %v2038_v3 = vmin.f32 %v2037_v23, %v1085_v8  ;;  %v4061_v45 = vld [vmem:[#allocation29_spill] sm:$0xff] }
 0x1c5   : > { %v1087_v46 = vpop.f32.mrf.mxu0  ;;  %v1344_v6 = vpop.f32.mrf.mxu1  ;;  %v2147_v2 = vmin.f32 %v2146_v14, %v1332_v42  ;;  %v2074_v53 = vmin.f32 %v2073_v36, %v1081_v28  ;;  %v4062_v61 = vmin.f32 %v4060_v60, %v4061_v45 }
 0x1c6   : > { %v1720_v13 = vmin.f32 %v1719_v58, %v1087_v46  ;;  %v1713_v5 = vmin.f32 %v1712_v12, %v1338_v48  ;;  %v2112_v18 = vmin.f32 %v2111_v41, %v1342_v57 }
 0x1c7   : > { %v1091_v10 = vpop.f32.mrf.mxu0  ;;  %v1348_v4 = vpop.f32.mrf.mxu1  ;;  %v2148_v47 = vmin.f32 %v2147_v2, %v1338_v48  ;;  %v2075_v38 = vmin.f32 %v2074_v53, %v1087_v46 }
 0x1c8   : > { %v1728_v16 = vmin.f32 %v4056_v31, %v1091_v10  ;;  %1714 = vmin.xlane.f32.xlu1 %v1713_v5  ;;  %v1721_v24 = vmin.f32 %v1720_v13, %v1342_v57  ;;  %v2039_v7 = vmin.f32 %v2038_v3, %v1091_v10  ;;  %v2113_v0 = vmin.f32 %v2112_v18, %v1348_v4 }
 0x1c9   : > { %v1093_v9 = vpop.f32.mrf.mxu0  ;;  %v1350_v40 = vpop.f32.mrf.mxu1  ;;  %v2149_v42 = vmin.f32 %v2148_v47, %v1344_v6 }
 0x1ca   : > { %v1729_v59 = vmin.f32 %v1728_v16, %v1093_v9  ;;  %v1722_v62 = vmin.f32 %v1721_v24, %v1344_v6  ;;  %v2076_v54 = vmin.f32 %v2075_v38, %v1093_v9  ;;  %v4063_v38 = vld [vmem:[#allocation32_spill] sm:$0xff] }
 0x1cb   : > { %v1097_v52 = vpop.f32.mrf.mxu0  ;;  %v1354_v35 = vpop.f32.mrf.mxu1  ;;  %v2150_v26 = vmin.f32 %v2149_v42, %v1350_v40 }
 0x1cc   : > { %v1737_v17 = vmin.f32 %v4059_v63, %v1097_v52  ;;  %1723 = vmin.xlane.f32.xlu0 %v1722_v62  ;;  %v1730_v20 = vmin.f32 %v1729_v59, %v1348_v4  ;;  %v2040_v22 = vmin.f32 %v2039_v7, %v1097_v52  ;;  %v2114_v34 = vmin.f32 %v2113_v0, %v1354_v35 }
 0x1cd   : > { %v1099_v49 = vpop.f32.mrf.mxu0  ;;  %v1356_v29 = vpop.f32.mrf.mxu1  ;;  %v4064_v7 = vmov 0.0   ;;  %v4067_v63 = vcombine.low %v4065_v37, %v4066_v56 }
 0x1ce   : > { %v1738_v25 = vmin.f32 %v1737_v17, %v1099_v49  ;;  %v1731_v15 = vmin.f32 %v1730_v20, %v1350_v40  ;;  %v2077_v28 = vmin.f32 %v2076_v54, %v1099_v49  ;;  %v2151_v44 = vmin.f32 %v2150_v26, %v1356_v29  ;;  %1858 = vst.msk [vmem:[%s3791_s17] sm:$0x1] %vm1857_vm1, %v4064_v7 }
 0x1cf   : > { %v1103_v48 = vpop.f32.mrf.mxu0  ;;  %v1360_v39 = vpop.f32.mrf.mxu1  ;;  %v2212_v17 = vrot.slane %v4067_v63, %v4063_v38 }
 0x1d0   : > { %v1746_v11 = vmin.f32 %v4062_v61, %v1103_v48  ;;  %v2041_v33 = vmin.f32 %v2040_v22, %v1103_v48  ;;  %v2115_v8 = vmin.f32 %v2114_v34, %v1360_v39  ;;  %1732 = vmin.xlane.f32.xlu1 %v1731_v15  ;;  %v1739_v57 = vmin.f32 %v1738_v25, %v1354_v35 }
 0x1d1   : > { %v1105_v19 = vpop.f32.mrf.mxu0  ;;  %v1362_v43 = vpop.f32.mrf.mxu1  ;;  %v3808_v15 = vstv %s2446_s22 }
 0x1d2   : > { %v2042_v55 = vrot.slane %v2041_v33, 4  ;;  %v2116_v32 = vrot.slane %v2115_v8, 4  ;;  %v1747_v58 = vmin.f32 %v1746_v11, %v1105_v19  ;;  %v2078_v12 = vmin.f32 %v2077_v28, %v1105_v19 }
 0x1d3   : > { %v2152_v27 = vmin.f32 %v2151_v44, %v1362_v43  ;;  %v1740_v30 = vmin.f32 %v1739_v57, %v1356_v29  ;;  %v4068_v29 = vld [vmem:[#allocation31_spill] sm:$0xff] }
 0x1d4   : > { %v2043_v46 = vmin.f32 %v2041_v33, %v2042_v55  ;;  %v2117_v6 = vmin.f32 %v2115_v8, %v2116_v32  ;;  %v2079_v50 = vrot.slane %v2078_v12, 4  ;;  %v1748_v51 = vmin.f32 %v1747_v58, %v1360_v39 }
 0x1d5   : > { %v2153_v13 = vrot.slane %v2152_v27, 4  ;;  %1741 = vmin.xlane.f32.xlu0 %v1740_v30  ;;  %v1368_v22 = vadd.s32 8, %v4068_v29  ;;  %v1369_v34 = vadd.s32 16, %v4068_v29  ;;  %v1370_v48 = vadd.s32 24, %v4068_v29 }
 0x1d6   : > { %v2044_v5 = vrot.slane %v2043_v46, 2  ;;  %v2118_v14 = vrot.slane %v2117_v6, 2  ;;  %v2080_v36 = vmin.f32 %v2078_v12, %v2079_v50  ;;  %v1749_v10 = vmin.f32 %v1748_v51, %v1362_v43 }
 0x1d7   : > { %v2154_v4 = vmin.f32 %v2152_v27, %v2153_v13  ;;  %v1401_v26 = vadd.s32 %v3808_v15, %v1368_v22  ;;  %v1400_v39 = vadd.s32 %v3808_v15, %v4068_v29  ;;  %v1402_v60 = vadd.s32 %v3808_v15, %v1369_v34 }
 0x1d8   : > { %v2045_v23 = vmin.f32 %v2043_v46, %v2044_v5  ;;  %v2119_v41 = vmin.f32 %v2117_v6, %v2118_v14  ;;  %v2081_v21 = vrot.slane %v2080_v36, 2  ;;  %1750 = vmin.xlane.f32.xlu1 %v1749_v10  ;;  %v1371_v45 = vadd.s32 32, %v4068_v29 }
 0x1d9   : > { %v2155_v1 = vrot.slane %v2154_v4, 2  ;;  %vm1433_vm2 = vcmp.lt.s32.totalorder %v1401_v26, 512  ;;  %v1403_v11 = vadd.s32 %v3808_v15, %v1370_v48  ;;  %v1372_v8 = vadd.s32 40, %v4068_v29 }
 0x1da   : > { %v2046_v31 = vrot.slane %v2045_v23, 1  ;;  %v2082_v16 = vmin.f32 %v2080_v36, %v2081_v21  ;;  %v2120_v24 = vrot.slane %v2119_v41, 1  ;;  %vm1432_vm3 = vcmp.lt.s32.totalorder %v1400_v39, 512 }
 0x1db   : > { %v2156_v2 = vmin.f32 %v2154_v4, %v2155_v1  ;;  %vm1434_vm4 = vcmp.lt.s32.totalorder %v1402_v60, 512  ;;  %v1404_v19 = vadd.s32 %v3808_v15, %v1371_v45  ;;  %v1373_v55 = vadd.s32 48, %v4068_v29 }
 0x1dc   : > { %v2083_v53 = vrot.slane %v2082_v16, 1  ;;  %v2047_v40 = vmin.f32 %v2045_v23, %v2046_v31  ;;  %v2121_v18 = vmin.f32 %v2119_v41, %v2120_v24  ;;  %vm1435_vm5 = vcmp.lt.s32.totalorder %v1403_v11, 512 }
 0x1dd   : > { %v2157_v9 = vrot.slane %v2156_v2, 1  ;;  %v1405_v12 = vadd.s32 %v3808_v15, %v1372_v8  ;;  %v1374_v30 = vadd.s32 56, %v4068_v29  ;;  %vm1436_vm6 = vcmp.lt.s32.totalorder %v1404_v19, 512 }
 0x1de   : > { %v2084_v3 = vmin.f32 %v2082_v16, %v2083_v53  ;;  %v1406_v13 = vadd.s32 %v3808_v15, %v1373_v55  ;;  %v1375_v14 = vadd.s32 64, %v4068_v29  ;;  %v1376_v21 = vadd.s32 72, %v4068_v29 }
 0x1df   : > { %v2158_v59 = vmin.f32 %v2156_v2, %v2157_v9  ;;  %vm1437_vm7 = vcmp.lt.s32.totalorder %v1405_v12, 512  ;;  %v1407_v23 = vadd.s32 %v3808_v15, %v1374_v30  ;;  %v1377_v53 = vadd.s32 80, %v4068_v29 }
 0x1e0   : > { %v2174_v62 = vcombine.low %v2047_v40, %v2084_v3  ;;  %vm1438_vm8 = vcmp.lt.s32.totalorder %v1406_v13, 512  ;;  %v1408_v24 = vadd.s32 %v3808_v15, %v1375_v14  ;;  %v1381_v26 = vadd.s32 112, %v4068_v29 }
 0x1e1   : > { %v2175_v47 = vcombine.low %v2121_v18, %v2158_v59  ;;  %vm1439_vm9 = vcmp.lt.s32.totalorder %v1407_v23, 512  ;;  %v1409_v18 = vadd.s32 %v3808_v15, %v1376_v21  ;;  %v1383_v19 = vadd.s32 128, %v4068_v29 }
 0x1e2   : > { %v2196_v52 = vrot.slane %v2174_v62, %v4063_v38  ;;  %v1378_v62 = vadd.s32 88, %v4068_v29  ;;  %vm1440_vm10 = vcmp.lt.s32.totalorder %v1408_v24, 512  ;;  %v1385_v13 = vadd.s32 144, %v4068_v29 }
 0x1e3   : > { %v2203_v35 = vrot.slane %v2175_v47, %v4063_v38  ;;  %vm1441_vm11 = vcmp.lt.s32.totalorder %v1409_v18, 512  ;;  %v1386_v23 = vadd.s32 152, %v4068_v29  ;;  %v1387_v24 = vadd.s32 160, %v4068_v29 }
 0x1e4   : > { %v1388_v18 = vadd.s32 168, %v4068_v29 }
 0x1e5   : > { %v2205_v0 = vcombine.low %v2196_v52, %v2203_v35  ;;  %v1472_v49 = vpop.xlane.xlu0 %1471  ;;  %v1410_v35 = vadd.s32 %v3808_v15, %v1377_v53 }
 0x1e6   : > { %v1752_v57 = vmax.f32 %v1472_v49, 0.0 }
 0x1e7   : > { %v2219_v20 = vrot.slane %v2205_v0, %v4063_v38  ;;  %v1379_v0 = vadd.s32 96, %v4068_v29  ;;  %vm1442_vm12 = vcmp.lt.s32.totalorder %v1410_v35, 512  ;;  %v1389_v35 = vadd.s32 176, %v4068_v29 }
 0x1e8   : > { %v1784_v46 = vsel %vm1432_vm3, %v1752_v57, 0.0  ;;  %v1414_v57 = vadd.s32 %v3808_v15, %v1381_v26 }
 0x1e9   : > { %v2220_v42 = vcombine.low %v2212_v17, %v2219_v20  ;;  %v1481_v28 = vpop.xlane.xlu0 %1480  ;;  %v1411_v17 = vadd.s32 %v3808_v15, %v1378_v62  ;;  %v1412_v34 = vadd.s32 %v3808_v15, %v1379_v0 }
 0x1ea   : > { %v1753_v61 = vmax.f32 %v1481_v28, 0.0  ;;  %vm1446_vm0 = vcmp.lt.s32.totalorder %v1414_v57, 512  ;;  %v1393_v57 = vadd.s32 208, %v4068_v29 }
 0x1eb   : > { %v2222_v54 = vmin.f32 %v2220_v42, 1e+30  ;;  %v1380_v42 = vadd.s32 104, %v4068_v29  ;;  %vm1443_vm13 = vcmp.lt.s32.totalorder %v1411_v17, 512  ;;  %vm1444_vm14 = vcmp.lt.s32.totalorder %v1412_v34, 512 }
 0x1ec   : > { %v1785_v32 = vsel %vm1433_vm2, %v1753_v61, 0.0  ;;  %v1382_v61 = vadd.s32 120, %v4068_v29  ;;  %v1390_v17 = vadd.s32 184, %v4068_v29  ;;  %v1391_v34 = vadd.s32 192, %v4068_v29 }
 0x1ed   : > { %2223 = vst [vmem:[%s198_s21] sm:$0xff] %v2222_v54  ;;  %v1490_v25 = vpop.xlane.xlu1 %1489  ;;  %v1816_v51 = vadd.f32 %v1785_v32, %v1784_v46  ;;  %v1413_v60 = vadd.s32 %v3808_v15, %v1380_v42 }
 0x1ee   : > { %v1754_v44 = vmax.f32 %v1490_v25, 0.0 }
 0x1ef   : > { %vm1445_vm15 = vcmp.lt.s32.totalorder %v1413_v60, 512  ;;  %v1392_v60 = vadd.s32 200, %v4068_v29 }
 0x1f0   : > { %v1786_v6 = vsel %vm1434_vm4, %v1754_v44, 0.0 }
 0x1f1   : > { %v1499_v33 = vpop.xlane.xlu1 %1498  ;;  %v1817_v4 = vadd.f32 %v1816_v51, %v1786_v6 }
 0x1f2   : > { %v1755_v58 = vmax.f32 %v1499_v33, 0.0 }
 0x1f4   : > { %v1787_v36 = vsel %vm1435_vm5, %v1755_v58, 0.0  ;;  %v1415_v58 = vadd.s32 %v3808_v15, %v1382_v61 }
 0x1f5   : > { %v1508_v43 = vpop.xlane.xlu0 %1507  ;;  %v1818_v16 = vadd.f32 %v1817_v4, %v1787_v36 }
 0x1f6   : > { %v1756_v50 = vmax.f32 %v1508_v43, 0.0  ;;  %vm1447_vm2 = vcmp.lt.s32.totalorder %v1415_v58, 512  ;;  %v1394_v58 = vadd.s32 216, %v4068_v29 }
 0x1f8   : > { %v1788_v1 = vsel %vm1436_vm6, %v1756_v50, 0.0  ;;  %v1416_v50 = vadd.s32 %v3808_v15, %v1383_v19 }
 0x1f9   : > { %v1517_v27 = vpop.xlane.xlu1 %1516  ;;  %v1819_v3 = vadd.f32 %v1818_v16, %v1788_v1 }
 0x1fa   : > { %v1757_v10 = vmax.f32 %v1517_v27, 0.0  ;;  %v1384_v27 = vadd.s32 136, %v4068_v29  ;;  %vm1448_vm3 = vcmp.lt.s32.totalorder %v1416_v50, 512  ;;  %v1395_v50 = vadd.s32 224, %v4068_v29 }
 0x1fc   : > { %v1789_v9 = vsel %vm1437_vm7, %v1757_v10, 0.0  ;;  %v1417_v10 = vadd.s32 %v3808_v15, %v1384_v27 }
 0x1fd   : > { %v1526_v5 = vpop.xlane.xlu0 %1525  ;;  %v1820_v52 = vadd.f32 %v1819_v3, %v1789_v9 }
 0x1fe   : > { %v1758_v31 = vmax.f32 %v1526_v5, 0.0  ;;  %vm1449_vm4 = vcmp.lt.s32.totalorder %v1417_v10, 512  ;;  %v1396_v10 = vadd.s32 232, %v4068_v29 }
 0x200   : > { %v1790_v47 = vsel %vm1438_vm8, %v1758_v31, 0.0  ;;  %v1418_v31 = vadd.s32 %v3808_v15, %v1385_v13 }
 0x201   : > { %v1535_v41 = vpop.xlane.xlu1 %1534  ;;  %v1821_v63 = vadd.f32 %v1820_v52, %v1790_v47 }
 0x202   : > { %v1759_v40 = vmax.f32 %v1535_v41, 0.0  ;;  %vm1450_vm5 = vcmp.lt.s32.totalorder %v1418_v31, 512 }
 0x204   : > { %v1791_v37 = vsel %vm1439_vm9, %v1759_v40, 0.0  ;;  %v1419_v40 = vadd.s32 %v3808_v15, %v1386_v23 }
 0x205   : > { %v1544_v2 = vpop.xlane.xlu0 %1543  ;;  %v1822_v22 = vadd.f32 %v1821_v63, %v1791_v37 }
 0x206   : > { %v1760_v38 = vmax.f32 %v1544_v2, 0.0  ;;  %vm1451_vm6 = vcmp.lt.s32.totalorder %v1419_v40, 512 }
 0x208   : > { %v1792_v54 = vsel %vm1440_vm10, %v1760_v38, 0.0  ;;  %v1420_v38 = vadd.s32 %v3808_v15, %v1387_v24  ;;  %v1397_v24 = vadd.s32 240, %v4068_v29 }
 0x209   : > { %v1553_v59 = vpop.xlane.xlu1 %1552  ;;  %v1823_v39 = vadd.f32 %v1822_v22, %v1792_v54 }
 0x20a   : > { %v1761_v56 = vmax.f32 %v1553_v59, 0.0  ;;  %vm1452_vm7 = vcmp.lt.s32.totalorder %v1420_v38, 512  ;;  %v1430_v38 = vadd.s32 %v3808_v15, %v1397_v24 }
 0x20c   : > { %v1793_v28 = vsel %vm1441_vm11, %v1761_v56, 0.0  ;;  %v1421_v56 = vadd.s32 %v3808_v15, %v1388_v18 }
 0x20d   : > { %v1562_v7 = vpop.xlane.xlu0 %1561  ;;  %v1824_v8 = vadd.f32 %v1823_v39, %v1793_v28 }
 0x20e   : > { %v1762_v49 = vmax.f32 %v1562_v7, 0.0  ;;  %vm1453_vm8 = vcmp.lt.s32.totalorder %v1421_v56, 512 }
 0x210   : > { %v1794_v11 = vsel %vm1442_vm12, %v1762_v49, 0.0  ;;  %v1422_v49 = vadd.s32 %v3808_v15, %v1389_v35 }
 0x211   : > { %v1571_v20 = vpop.xlane.xlu1 %1570  ;;  %v1825_v32 = vadd.f32 %v1824_v8, %v1794_v11 }
 0x212   : > { %v1763_v48 = vmax.f32 %v1571_v20, 0.0  ;;  %vm1454_vm9 = vcmp.lt.s32.totalorder %v1422_v49, 512 }
 0x214   : > { %v1795_v43 = vsel %vm1443_vm13, %v1763_v48, 0.0  ;;  %v1423_v48 = vadd.s32 %v3808_v15, %v1390_v17 }
 0x215   : > { %v1580_v25 = vpop.xlane.xlu0 %1579  ;;  %v1826_v6 = vadd.f32 %v1825_v32, %v1795_v43 }
 0x216   : > { %v1764_v33 = vmax.f32 %v1580_v25, 0.0  ;;  %vm1455_vm10 = vcmp.lt.s32.totalorder %v1423_v48, 512 }
 0x218   : > { %v1796_v30 = vsel %vm1444_vm14, %v1764_v33, 0.0  ;;  %v1424_v33 = vadd.s32 %v3808_v15, %v1391_v34 }
 0x219   : > { %v1589_v45 = vpop.xlane.xlu1 %1588  ;;  %v1827_v36 = vadd.f32 %v1826_v6, %v1796_v30 }
 0x21a   : > { %v1765_v55 = vmax.f32 %v1589_v45, 0.0  ;;  %vm1456_vm11 = vcmp.lt.s32.totalorder %v1424_v33, 512 }
 0x21c   : > { %v1797_v5 = vsel %vm1445_vm15, %v1765_v55, 0.0  ;;  %v1425_v55 = vadd.s32 %v3808_v15, %v1392_v60 }
 0x21d   : > { %v1598_v44 = vpop.xlane.xlu0 %1597  ;;  %v1828_v1 = vadd.f32 %v1827_v36, %v1797_v5 }
 0x21e   : > { %v1766_v46 = vmax.f32 %v1598_v44, 0.0  ;;  %vm1457_vm12 = vcmp.lt.s32.totalorder %v1425_v55, 512 }
 0x220   : > { %v1798_v41 = vsel %vm1446_vm0, %v1766_v46, 0.0  ;;  %v1426_v46 = vadd.s32 %v3808_v15, %v1393_v57 }
 0x221   : > { %v1607_v12 = vpop.xlane.xlu1 %1606  ;;  %v1829_v9 = vadd.f32 %v1828_v1, %v1798_v41 }
 0x222   : > { %v1767_v14 = vmax.f32 %v1607_v12, 0.0  ;;  %vm1458_vm13 = vcmp.lt.s32.totalorder %v1426_v46, 512 }
 0x224   : > { %v1799_v2 = vsel %vm1447_vm2, %v1767_v14, 0.0  ;;  %v1427_v14 = vadd.s32 %v3808_v15, %v1394_v58  ;;  %vm1462_vm2 = vcmp.lt.s32.totalorder %v1430_v38, 512 }
 0x225   : > { %v1616_v51 = vpop.xlane.xlu0 %1615  ;;  %v1830_v47 = vadd.f32 %v1829_v9, %v1799_v2 }
 0x226   : > { %v1768_v21 = vmax.f32 %v1616_v51, 0.0  ;;  %vm1459_vm14 = vcmp.lt.s32.totalorder %v1427_v14, 512 }
 0x228   : > { %v1800_v59 = vsel %vm1448_vm3, %v1768_v21, 0.0  ;;  %v1428_v21 = vadd.s32 %v3808_v15, %v1395_v50 }
 0x229   : > { %v1625_v4 = vpop.xlane.xlu1 %1624  ;;  %v1831_v37 = vadd.f32 %v1830_v47, %v1800_v59  ;;  %v1398_v59 = vadd.s32 248, %v4068_v29 }
 0x22a   : > { %v1769_v53 = vmax.f32 %v1625_v4, 0.0  ;;  %vm1460_vm15 = vcmp.lt.s32.totalorder %v1428_v21, 512 }
 0x22c   : > { %v1801_v7 = vsel %vm1449_vm4, %v1769_v53, 0.0  ;;  %v1429_v53 = vadd.s32 %v3808_v15, %v1396_v10 }
 0x22d   : > { %v1634_v16 = vpop.xlane.xlu0 %1633  ;;  %v1832_v54 = vadd.f32 %v1831_v37, %v1801_v7 }
 0x22e   : > { %v1770_v62 = vmax.f32 %v1634_v16, 0.0  ;;  %vm1461_vm0 = vcmp.lt.s32.totalorder %v1429_v53, 512 }
 0x230   : > { %v1802_v20 = vsel %vm1450_vm5, %v1770_v62, 0.0 }
 0x231   : > { %v1643_v3 = vpop.xlane.xlu1 %1642  ;;  %v1833_v28 = vadd.f32 %v1832_v54, %v1802_v20 }
 0x232   : > { %v1771_v0 = vmax.f32 %v1643_v3, 0.0 }
 0x234   : > { %v1803_v25 = vsel %vm1451_vm6, %v1771_v0, 0.0  ;;  %v1431_v0 = vadd.s32 %v3808_v15, %v1398_v59 }
 0x235   : > { %v1652_v52 = vpop.xlane.xlu0 %1651  ;;  %v1834_v11 = vadd.f32 %v1833_v28, %v1803_v25 }
 0x236   : > { %v1772_v42 = vmax.f32 %v1652_v52, 0.0  ;;  %vm1463_vm3 = vcmp.lt.s32.totalorder %v1431_v0, 512 }
 0x238   : > { %v1804_v45 = vsel %vm1452_vm7, %v1772_v42, 0.0 }
 0x239   : > { %v1661_v63 = vpop.xlane.xlu1 %1660  ;;  %v1835_v43 = vadd.f32 %v1834_v11, %v1804_v45 }
 0x23a   : > { %v1773_v26 = vmax.f32 %v1661_v63, 0.0 }
 0x23c   : > { %v1805_v44 = vsel %vm1453_vm8, %v1773_v26, 0.0 }
 0x23d   : > { %v1670_v22 = vpop.xlane.xlu0 %1669  ;;  %v1836_v30 = vadd.f32 %v1835_v43, %v1805_v44 }
 0x23e   : > { %v1774_v61 = vmax.f32 %v1670_v22, 0.0 }
 0x240   : > { %v1806_v12 = vsel %vm1454_vm9, %v1774_v61, 0.0 }
 0x241   : > { %v1679_v39 = vpop.xlane.xlu1 %1678  ;;  %v1837_v5 = vadd.f32 %v1836_v30, %v1806_v12 }
 0x242   : > { %v1775_v19 = vmax.f32 %v1679_v39, 0.0  ;;  %v1859_v39 = vld [vmem:[%s3791_s17] sm:$0x1] }
 0x244   : > { %v1807_v51 = vsel %vm1455_vm10, %v1775_v19, 0.0 }
 0x245   : > { %v1688_v8 = vpop.xlane.xlu0 %1687  ;;  %v1838_v41 = vadd.f32 %v1837_v5, %v1807_v51 }
 0x246   : > { %v1776_v27 = vmax.f32 %v1688_v8, 0.0 }
 0x248   : > { %v1808_v4 = vsel %vm1456_vm11, %v1776_v27, 0.0 }
 0x249   : > { %v1697_v32 = vpop.xlane.xlu1 %1696  ;;  %v1839_v2 = vadd.f32 %v1838_v41, %v1808_v4 }
 0x24a   : > { %v1777_v13 = vmax.f32 %v1697_v32, 0.0 }
 0x24c   : > { %v1809_v31 = vsel %vm1457_vm12, %v1777_v13, 0.0 }
 0x24d   : > { %v1706_v6 = vpop.xlane.xlu0 %1705  ;;  %v1840_v3 = vadd.f32 %v1839_v2, %v1809_v31 }
 0x24e   : > { %v1778_v23 = vmax.f32 %v1706_v6, 0.0 }
 0x250   : > { %v1810_v9 = vsel %vm1458_vm13, %v1778_v23, 0.0 }
 0x251   : > { %v1715_v36 = vpop.xlane.xlu1 %1714  ;;  %v1841_v52 = vadd.f32 %v1840_v3, %v1810_v9 }
 0x252   : > { %v1779_v16 = vmax.f32 %v1715_v36, 0.0 }
 0x254   : > { %v1811_v62 = vsel %vm1459_vm14, %v1779_v16, 0.0 }
 0x255   : > { %v1724_v1 = vpop.xlane.xlu0 %1723  ;;  %v1842_v7 = vadd.f32 %v1841_v52, %v1811_v62 }
 0x256   : > { %v1780_v40 = vmax.f32 %v1724_v1, 0.0 }
 0x258   : > { %v1812_v35 = vsel %vm1460_vm15, %v1780_v40, 0.0 }
 0x259   : > { %v1733_v18 = vpop.xlane.xlu1 %1732  ;;  %v1843_v63 = vadd.f32 %v1842_v7, %v1812_v35 }
 0x25a   : > { %v1781_v47 = vmax.f32 %v1733_v18, 0.0 }
 0x25c   : > { %v1813_v37 = vsel %vm1461_vm0, %v1781_v47, 0.0 }
 0x25d   : > { %v1844_v20 = vadd.f32 %v1843_v63, %v1813_v37 }
 0x25e   : > { %v1742_v56 = vpop.xlane.xlu0 %1741 }
 0x25f   : > { %v1782_v17 = vmax.f32 %v1742_v56, 0.0 }
 0x261   : > { %v1814_v42 = vsel %vm1462_vm2, %v1782_v17, 0.0  ;;  %v1751_v29 = vpop.xlane.xlu1 %1750 }
 0x262   : > { %v1783_v54 = vmax.f32 %v1751_v29, 0.0  ;;  %v1845_v49 = vadd.f32 %v1844_v20, %v1814_v42 }
 0x264   : > { %v1815_v22 = vsel %vm1463_vm3, %v1783_v54, 0.0 }
 0x265   : > { %v1846_v34 = vadd.f32 %v1845_v49, %v1815_v22 }
 0x267   : > { %v1847_v25 = vrot.slane %v1846_v34, 4 }
 0x269   : > { %v1848_v26 = vadd.f32 %v1847_v25, %v1846_v34 }
 0x26b   : > { %v1849_v28 = vrot.slane %v1848_v26, 2 }
 0x26d   : > { %v1850_v48 = vadd.f32 %v1849_v28, %v1848_v26 }
 0x26f   : > { %v1851_v15 = vrot.slane %v1850_v48, 1 }
 0x271   : > { %v1852_v60 = vadd.f32 %v1851_v15, %v1850_v48 }
 0x273   : > { %v1860_v45 = vadd.f32 %v1859_v39, %v1852_v60 }
 0x275   : > { %1862 = vst.msk [vmem:[%s3791_s17] sm:$0x1] %vm1857_vm1, %v1860_v45 }
 0x276 PF: > { %s14_s14 = sadd.s32 1, %s2498_s14   ;;  %s4069_s12 = smov %s2494_s13 }
 0x277   : > { %p11_p6 = scmp.ge.s32.totalorder %s14_s14, 4   ;;  %s4070_s13 = smov %s4072_s15 }
 0x279   :  { %13 = sbr.rel (!%p11_p6) target bundleno = 2 (0x2), region = 78 }

// kernel: smpl2mesh_forward_loss.5
= control target key start
LH: loop header
LB: loop body
LE: loop exit
PB: predicated region body
PF: predicated region fallthrough
CT: control target
= control target key end

     0   :  { %vm69_vm0 = vcmask 64512   ;;  %v807_v3 = vmov 0.0   ;;  %s1044_s0 = inlined_call_operand.vmem [shape: f32[256,8], index: 0, kind: input, shape index: {}]   ;;  %s1045_s1 = inlined_call_operand.vmem [shape: f32[8,256], index: 1, kind: input, shape index: {}]   ;;  %s1046_s2 = inlined_call_operand.hbm [shape: f32[1,1,1], index: 2, kind: output, shape index: {}]  }
   0x1   :  { %v68_v0 = vld [vmem:[%s1045_s1 + $0x8] sm:$0xff]  ;;  %v67_v1 = vld [vmem:[%s1045_s1] sm:$0xff]  ;;  %230 = vmatprep.mubr.f32.mxu0 %v807_v3  ;;  %326 = vmatprep.mubr.f32.mxu1 %v807_v3  ;;  %v37_v7 = vld [vmem:[%s1044_s0 + $0x10] sm:$0xff] }
   0x2   :  { %v35_v2 = vld [vmem:[%s1044_s0] sm:$0xff]  ;;  %196 = vmatprep.subr.mxu0 %v68_v0  ;;  %781 = vmatprep.subr.mxu1 %v68_v0  ;;  %v36_v5 = vld [vmem:[%s1044_s0 + $0x8] sm:$0xff]  ;;  %v53_v8 = vld [vmem:[%s1044_s0 + $0x90] sm:$0xff] }
   0x3   :  { %197 = vmatpush1.msra.mxu0 %v67_v1  ;;  %782 = vmatpush1.msra.mxu1 %v67_v1  ;;  %v51_v4 = vld [vmem:[%s1044_s0 + $0x80] sm:$0xff]  ;;  %v52_v6 = vld [vmem:[%s1044_s0 + $0x88] sm:$0xff] }
   0x4   :  { %749 = vmatmul.mubr.msk.f32.vlgmr.msra.gmra.mxu0 %vm69_vm0, %v35_v2  ;;  %765 = vmatmul.mubr.msk.f32.vlgmr.msra.gmra.mxu1 %vm69_vm0, %v51_v4 }
   0x5   :  { %236 = vmatprep.mubr.f32.mxu0 %v807_v3  ;;  %332 = vmatprep.mubr.f32.mxu1 %v807_v3 }
   0x8   :  { %750 = vmatmul.mubr.msk.f32.gmra.mxu0 %vm69_vm0, %v36_v5  ;;  %766 = vmatmul.mubr.msk.f32.gmra.mxu1 %vm69_vm0, %v52_v6 }
   0x9   :  { %242 = vmatprep.mubr.f32.mxu0 %v807_v3  ;;  %338 = vmatprep.mubr.f32.mxu1 %v807_v3 }
   0xc   :  { %751 = vmatmul.mubr.msk.f32.gmra.mxu0 %vm69_vm0, %v37_v7 }
   0xd   :  { %7 = vsyncpa [#allocation3], 0  ;;  %248 = vmatprep.mubr.f32.mxu0 %v807_v3  ;;  %v38_v9 = vld [vmem:[%s1044_s0 + $0x18] sm:$0xff]  ;;  %767 = vmatmul.mubr.msk.f32.gmra.mxu1 %vm69_vm0, %v53_v8  ;;  %v39_v11 = vld [vmem:[%s1044_s0 + $0x20] sm:$0xff]  ;;  %vm723_vm1 = vcmask 0  }
   0xe   :  { %344 = vmatprep.mubr.f32.mxu1 %v807_v3  ;;  %v54_v10 = vld [vmem:[%s1044_s0 + $0x98] sm:$0xff]  ;;  %v55_v12 = vld [vmem:[%s1044_s0 + $0xa0] sm:$0xff]  ;;  %v40_v13 = vld [vmem:[%s1044_s0 + $0x28] sm:$0xff]  ;;  %724 = vst.msk [vmem:[#allocation2] sm:$0x1] %vm723_vm1, %v807_v3 }
   0xf   :  { %v56_v14 = vld [vmem:[%s1044_s0 + $0xa8] sm:$0xff]  ;;  %v41_v15 = vld [vmem:[%s1044_s0 + $0x30] sm:$0xff]  ;;  %v42_v17 = vld [vmem:[%s1044_s0 + $0x38] sm:$0xff] }
  0x10   :  { %752 = vmatmul.mubr.msk.f32.gmra.mxu0 %vm69_vm0, %v38_v9  ;;  %v57_v16 = vld [vmem:[%s1044_s0 + $0xb0] sm:$0xff]  ;;  %v58_v18 = vld [vmem:[%s1044_s0 + $0xb8] sm:$0xff]  ;;  %v43_v19 = vld [vmem:[%s1044_s0 + $0x40] sm:$0xff] }
  0x11   :  { %254 = vmatprep.mubr.f32.mxu0 %v807_v3  ;;  %768 = vmatmul.mubr.msk.f32.gmra.mxu1 %vm69_vm0, %v54_v10  ;;  %v59_v20 = vld [vmem:[%s1044_s0 + $0xc0] sm:$0xff]  ;;  %v44_v21 = vld [vmem:[%s1044_s0 + $0x48] sm:$0xff]  ;;  %v45_v23 = vld [vmem:[%s1044_s0 + $0x50] sm:$0xff] }
  0x12   :  { %350 = vmatprep.mubr.f32.mxu1 %v807_v3  ;;  %v60_v22 = vld [vmem:[%s1044_s0 + $0xc8] sm:$0xff]  ;;  %v61_v24 = vld [vmem:[%s1044_s0 + $0xd0] sm:$0xff]  ;;  %v46_v25 = vld [vmem:[%s1044_s0 + $0x58] sm:$0xff] }
  0x13   :  { %v62_v26 = vld [vmem:[%s1044_s0 + $0xd8] sm:$0xff]  ;;  %v47_v27 = vld [vmem:[%s1044_s0 + $0x60] sm:$0xff]  ;;  %v48_v29 = vld [vmem:[%s1044_s0 + $0x68] sm:$0xff] }
  0x14   :  { %753 = vmatmul.mubr.msk.f32.gmra.mxu0 %vm69_vm0, %v39_v11  ;;  %v63_v28 = vld [vmem:[%s1044_s0 + $0xe0] sm:$0xff]  ;;  %v64_v30 = vld [vmem:[%s1044_s0 + $0xe8] sm:$0xff]  ;;  %v49_v31 = vld [vmem:[%s1044_s0 + $0x70] sm:$0xff] }
  0x15   :  { %260 = vmatprep.mubr.f32.mxu0 %v807_v3  ;;  %769 = vmatmul.mubr.msk.f32.gmra.mxu1 %vm69_vm0, %v55_v12  ;;  %v65_v32 = vld [vmem:[%s1044_s0 + $0xf0] sm:$0xff]  ;;  %v50_v33 = vld [vmem:[%s1044_s0 + $0x78] sm:$0xff] }
  0x16   :  { %356 = vmatprep.mubr.f32.mxu1 %v807_v3  ;;  %v66_v34 = vld [vmem:[%s1044_s0 + $0xf8] sm:$0xff]  ;;  %s808_s0 = smov [#allocation2]  }
  0x17   :  { %s735_s18 = sshll.u32 %s808_s0, 4  ;;  %s736_s18 = int_to_ptr.vmem [resolvable:$true] %s735_s18 }
  0x18   :  { %754 = vmatmul.mubr.msk.f32.gmra.mxu0 %vm69_vm0, %v40_v13  ;;  %s785_s19 = scalar_lea.vmem %s736_s18, 16  ;;  %s789_s20 = scalar_lea.vmem %s736_s18, 32 }
  0x19   :  { %266 = vmatprep.mubr.f32.mxu0 %v807_v3  ;;  %770 = vmatmul.mubr.msk.f32.gmra.mxu1 %vm69_vm0, %v56_v14  ;;  %p786_p0 = scmp.ne.s32.totalorder %s736_s18, %s785_s19  ;;  %p790_p1 = scmp.lt.s32.totalorder %s736_s18, %s736_s18 }
  0x1a   :  { %362 = vmatprep.mubr.f32.mxu1 %v807_v3  ;;  %p791_p2 = scmp.lt.s32.totalorder %s789_s20, %s785_s19 }
  0x1c   :  { %755 = vmatmul.mubr.msk.f32.gmra.mxu0 %vm69_vm0, %v41_v15  ;;  %p792_p3 = por %p791_p2, %p790_p1 }
  0x1d   :  { %272 = vmatprep.mubr.f32.mxu0 %v807_v3  ;;  %771 = vmatmul.mubr.msk.f32.gmra.mxu1 %vm69_vm0, %v57_v16 }
  0x1e   :  { %368 = vmatprep.mubr.f32.mxu1 %v807_v3  ;;  %p793_p4 = pnand %p792_p3, %p786_p0 }
  0x20   :  { %756 = vmatmul.mubr.msk.f32.gmra.mxu0 %vm69_vm0, %v42_v17 }
  0x21   :  { %278 = vmatprep.mubr.f32.mxu0 %v807_v3  ;;  %772 = vmatmul.mubr.msk.f32.gmra.mxu1 %vm69_vm0, %v58_v18 }
  0x22   :  { %374 = vmatprep.mubr.f32.mxu1 %v807_v3 }
  0x24   :  { %757 = vmatmul.mubr.msk.f32.gmra.mxu0 %vm69_vm0, %v43_v19 }
  0x25   :  { %284 = vmatprep.mubr.f32.mxu0 %v807_v3  ;;  %773 = vmatmul.mubr.msk.f32.gmra.mxu1 %vm69_vm0, %v59_v20 }
  0x26   :  { %380 = vmatprep.mubr.f32.mxu1 %v807_v3 }
  0x28   :  { %758 = vmatmul.mubr.msk.f32.gmra.mxu0 %vm69_vm0, %v44_v21 }
  0x29   :  { %290 = vmatprep.mubr.f32.mxu0 %v807_v3  ;;  %774 = vmatmul.mubr.msk.f32.gmra.mxu1 %vm69_vm0, %v60_v22 }
  0x2a   :  { %386 = vmatprep.mubr.f32.mxu1 %v807_v3 }
  0x2c   :  { %759 = vmatmul.mubr.msk.f32.gmra.mxu0 %vm69_vm0, %v45_v23 }
  0x2d   :  { %296 = vmatprep.mubr.f32.mxu0 %v807_v3  ;;  %775 = vmatmul.mubr.msk.f32.gmra.mxu1 %vm69_vm0, %v61_v24 }
  0x2e   :  { %392 = vmatprep.mubr.f32.mxu1 %v807_v3 }
  0x30   :  { %760 = vmatmul.mubr.msk.f32.gmra.mxu0 %vm69_vm0, %v46_v25 }
  0x31   :  { %302 = vmatprep.mubr.f32.mxu0 %v807_v3  ;;  %776 = vmatmul.mubr.msk.f32.gmra.mxu1 %vm69_vm0, %v62_v26 }
  0x32   :  { %398 = vmatprep.mubr.f32.mxu1 %v807_v3 }
  0x34   :  { %761 = vmatmul.mubr.msk.f32.gmra.mxu0 %vm69_vm0, %v47_v27 }
  0x35   :  { %308 = vmatprep.mubr.f32.mxu0 %v807_v3  ;;  %777 = vmatmul.mubr.msk.f32.gmra.mxu1 %vm69_vm0, %v63_v28 }
  0x36   :  { %404 = vmatprep.mubr.f32.mxu1 %v807_v3 }
  0x38   :  { %762 = vmatmul.mubr.msk.f32.gmra.mxu0 %vm69_vm0, %v48_v29 }
  0x39   :  { %314 = vmatprep.mubr.f32.mxu0 %v807_v3  ;;  %778 = vmatmul.mubr.msk.f32.gmra.mxu1 %vm69_vm0, %v64_v30 }
  0x3a   :  { %410 = vmatprep.mubr.f32.mxu1 %v807_v3 }
  0x3c   :  { %763 = vmatmul.mubr.msk.f32.gmra.mxu0 %vm69_vm0, %v49_v31 }
  0x3d   :  { %320 = vmatprep.mubr.f32.mxu0 %v807_v3  ;;  %779 = vmatmul.mubr.msk.f32.gmra.mxu1 %vm69_vm0, %v65_v32 }
  0x3e   :  { %416 = vmatprep.mubr.f32.mxu1 %v807_v3 }
  0x40   :  { %764 = vmatmul.mubr.msk.f32.gmra.mxu0 %vm69_vm0, %v50_v33 }
  0x41   :  { %780 = vmatmul.mubr.msk.f32.gmra.mxu1 %vm69_vm0, %v66_v34 }
  0xc4   :  { %v232_v35 = vpop.f32.mrf.mxu0  ;;  %v990_v37 = vpop.f32.mrf.mxu1 }
  0xc6   :  { %v234_v36 = vpop.f32.mrf.mxu0  ;;  %v992_v40 = vpop.f32.mrf.mxu1 }
  0xc7   :  { %v522_v38 = vmin.f32 %v232_v35, %v234_v36 }
  0xc8   :  { %v238_v39 = vpop.f32.mrf.mxu0  ;;  %v994_v42 = vpop.f32.mrf.mxu1 }
  0xc9   :  { %523 = vmin.xlane.f32.xlu0 %v522_v38 }
  0xca   :  { %v240_v41 = vpop.f32.mrf.mxu0  ;;  %v996_v45 = vpop.f32.mrf.mxu1 }
  0xcb   :  { %v525_v43 = vmin.f32 %v238_v39, %v240_v41 }
  0xcc   :  { %v244_v44 = vpop.f32.mrf.mxu0 }
  0xcd   :  { %526 = vmin.xlane.f32.xlu0 %v525_v43  ;;  %v998_v47 = vpop.f32.mrf.mxu1 }
  0xce   :  { %v246_v46 = vpop.f32.mrf.mxu0 }
  0xcf   :  { %v528_v48 = vmin.f32 %v244_v44, %v246_v46  ;;  %v1000_v50 = vpop.f32.mrf.mxu1 }
  0xd0   :  { %v250_v49 = vpop.f32.mrf.mxu0 }
  0xd1   :  { %529 = vmin.xlane.f32.xlu1 %v528_v48  ;;  %v1002_v52 = vpop.f32.mrf.mxu1  ;;  %v570_v48 = vmin.f32 %v990_v37, %v992_v40 }
  0xd2   :  { %v252_v51 = vpop.f32.mrf.mxu0 }
  0xd3   :  { %v531_v53 = vmin.f32 %v250_v49, %v252_v51  ;;  %v1004_v55 = vpop.f32.mrf.mxu1 }
  0xd4   :  { %v256_v54 = vpop.f32.mrf.mxu0 }
  0xd5   :  { %532 = vmin.xlane.f32.xlu1 %v531_v53  ;;  %v1006_v57 = vpop.f32.mrf.mxu1  ;;  %v573_v53 = vmin.f32 %v994_v42, %v996_v45 }
  0xd6   :  { %v258_v56 = vpop.f32.mrf.mxu0 }
  0xd7   :  { %v534_v58 = vmin.f32 %v256_v54, %v258_v56  ;;  %v1008_v60 = vpop.f32.mrf.mxu1  ;;  %v576_v54 = vmin.f32 %v998_v47, %v1000_v50 }
  0xd8   :  { %v262_v59 = vpop.f32.mrf.mxu0 }
  0xd9   :  { %535 = vmin.xlane.f32.xlu0 %v534_v58  ;;  %v1010_v62 = vpop.f32.mrf.mxu1  ;;  %v579_v58 = vmin.f32 %v1002_v52, %v1004_v55 }
  0xda   :  { %v264_v61 = vpop.f32.mrf.mxu0 }
  0xdb   :  { %v537_v63 = vmin.f32 %v262_v59, %v264_v61  ;;  %v1012_v1 = vpop.f32.mrf.mxu1  ;;  %v582_v59 = vmin.f32 %v1006_v57, %v1008_v60 }
  0xdc   :  { %v268_v0 = vpop.f32.mrf.mxu0  ;;  %v585_v40 = vmin.f32 %v1010_v62, %v1012_v1 }
  0xdd   :  { %538 = vmin.xlane.f32.xlu1 %v537_v63  ;;  %v1014_v4 = vpop.f32.mrf.mxu1 }
  0xde   :  { %v270_v2 = vpop.f32.mrf.mxu0 }
  0xdf   :  { %v540_v5 = vmin.f32 %v268_v0, %v270_v2  ;;  %v1016_v7 = vpop.f32.mrf.mxu1 }
  0xe0   :  { %v274_v6 = vpop.f32.mrf.mxu0  ;;  %v588_v42 = vmin.f32 %v1014_v4, %v1016_v7 }
  0xe1   :  { %541 = vmin.xlane.f32.xlu0 %v540_v5  ;;  %v1018_v9 = vpop.f32.mrf.mxu1 }
  0xe2   :  { %v276_v8 = vpop.f32.mrf.mxu0 }
  0xe3   :  { %v543_v10 = vmin.f32 %v274_v6, %v276_v8  ;;  %v1020_v12 = vpop.f32.mrf.mxu1 }
  0xe4   :  { %v280_v11 = vpop.f32.mrf.mxu0  ;;  %v591_v47 = vmin.f32 %v1018_v9, %v1020_v12 }
  0xe5   :  { %544 = vmin.xlane.f32.xlu1 %v543_v10  ;;  %v376_v14 = vpop.f32.mrf.mxu1 }
  0xe6   :  { %v282_v13 = vpop.f32.mrf.mxu0 }
  0xe7   :  { %v546_v15 = vmin.f32 %v280_v11, %v282_v13  ;;  %v378_v17 = vpop.f32.mrf.mxu1 }
  0xe8   :  { %v286_v16 = vpop.f32.mrf.mxu0  ;;  %v594_v50 = vmin.f32 %v376_v14, %v378_v17 }
  0xe9   :  { %547 = vmin.xlane.f32.xlu0 %v546_v15  ;;  %v382_v21 = vpop.f32.mrf.mxu1 }
  0xea   :  { %v288_v18 = vpop.f32.mrf.mxu0 }
  0xeb   :  { %v549_v19 = vmin.f32 %v286_v16, %v288_v18  ;;  %v384_v25 = vpop.f32.mrf.mxu1 }
  0xec   :  { %v292_v20 = vpop.f32.mrf.mxu0  ;;  %v597_v55 = vmin.f32 %v382_v21, %v384_v25 }
  0xed   :  { %550 = vmin.xlane.f32.xlu1 %v549_v19  ;;  %v388_v29 = vpop.f32.mrf.mxu1 }
  0xee   :  { %v294_v22 = vpop.f32.mrf.mxu0 }
  0xef   :  { %v552_v23 = vmin.f32 %v292_v20, %v294_v22  ;;  %v390_v33 = vpop.f32.mrf.mxu1 }
  0xf0   :  { %v298_v24 = vpop.f32.mrf.mxu0  ;;  %v600_v57 = vmin.f32 %v388_v29, %v390_v33 }
  0xf1   :  { %553 = vmin.xlane.f32.xlu0 %v552_v23  ;;  %v394_v38 = vpop.f32.mrf.mxu1 }
  0xf2   :  { %v300_v26 = vpop.f32.mrf.mxu0 }
  0xf3   :  { %v555_v27 = vmin.f32 %v298_v24, %v300_v26  ;;  %v396_v44 = vpop.f32.mrf.mxu1 }
  0xf4   :  { %v304_v28 = vpop.f32.mrf.mxu0  ;;  %v603_v61 = vmin.f32 %v394_v38, %v396_v44 }
  0xf5   :  { %556 = vmin.xlane.f32.xlu1 %v555_v27  ;;  %v400_v51 = vpop.f32.mrf.mxu1 }
  0xf6   :  { %v306_v30 = vpop.f32.mrf.mxu0 }
  0xf7   :  { %v558_v31 = vmin.f32 %v304_v28, %v306_v30  ;;  %v402_v56 = vpop.f32.mrf.mxu1 }
  0xf8   :  { %v310_v32 = vpop.f32.mrf.mxu0  ;;  %v606_v62 = vmin.f32 %v400_v51, %v402_v56 }
  0xf9   :  { %559 = vmin.xlane.f32.xlu0 %v558_v31  ;;  %v406_v37 = vpop.f32.mrf.mxu1 }
  0xfa   :  { %v312_v34 = vpop.f32.mrf.mxu0 }
  0xfb   :  { %v561_v35 = vmin.f32 %v310_v32, %v312_v34  ;;  %v408_v45 = vpop.f32.mrf.mxu1 }
  0xfc   :  { %v316_v36 = vpop.f32.mrf.mxu0  ;;  %v609_v0 = vmin.f32 %v406_v37, %v408_v45 }
  0xfd   :  { %562 = vmin.xlane.f32.xlu1 %v561_v35  ;;  %v412_v52 = vpop.f32.mrf.mxu1 }
  0xfe   :  { %v318_v39 = vpop.f32.mrf.mxu0 }
  0xff   :  { %v564_v41 = vmin.f32 %v316_v36, %v318_v39  ;;  %v414_v60 = vpop.f32.mrf.mxu1 }
 0x100   :  { %v322_v43 = vpop.f32.mrf.mxu0  ;;  %v612_v1 = vmin.f32 %v412_v52, %v414_v60 }
 0x101   :  { %565 = vmin.xlane.f32.xlu0 %v564_v41  ;;  %v418_v63 = vpop.f32.mrf.mxu1 }
 0x102   :  { %v324_v46 = vpop.f32.mrf.mxu0 }
 0x103   :  { %v567_v49 = vmin.f32 %v322_v43, %v324_v46  ;;  %v420_v2 = vpop.f32.mrf.mxu1 }
 0x104   :  { %v615_v4 = vmin.f32 %v418_v63, %v420_v2 }
 0x105   :  { %571 = vmin.xlane.f32.xlu0 %v570_v48  ;;  %568 = vmin.xlane.f32.xlu1 %v567_v49 }
 0x109   :  { %577 = vmin.xlane.f32.xlu0 %v576_v54  ;;  %574 = vmin.xlane.f32.xlu1 %v573_v53 }
 0x10d   :  { %583 = vmin.xlane.f32.xlu0 %v582_v59  ;;  %580 = vmin.xlane.f32.xlu1 %v579_v58 }
 0x111   :  { %589 = vmin.xlane.f32.xlu0 %v588_v42  ;;  %586 = vmin.xlane.f32.xlu1 %v585_v40 }
 0x115   :  { %595 = vmin.xlane.f32.xlu0 %v594_v50  ;;  %592 = vmin.xlane.f32.xlu1 %v591_v47 }
 0x119   :  { %601 = vmin.xlane.f32.xlu0 %v600_v57  ;;  %598 = vmin.xlane.f32.xlu1 %v597_v55 }
 0x11d   :  { %607 = vmin.xlane.f32.xlu0 %v606_v62  ;;  %604 = vmin.xlane.f32.xlu1 %v603_v61 }
 0x121   :  { %613 = vmin.xlane.f32.xlu0 %v612_v1  ;;  %610 = vmin.xlane.f32.xlu1 %v609_v0 }
 0x125   :  { %616 = vmin.xlane.f32.xlu1 %v615_v4 }
 0x152   :  { %v524_v5 = vpop.xlane.xlu0 %523 }
 0x153   :  { %v618_v10 = vmax.f32 %v524_v5, 0.0 }
 0x156   :  { %v527_v7 = vpop.xlane.xlu0 %526 }
 0x157   :  { %v619_v8 = vmax.f32 %v527_v7, 0.0 }
 0x159   :  { %v682_v13 = vadd.f32 %v619_v8, %v618_v10 }
 0x15a   :  { %v530_v6 = vpop.xlane.xlu1 %529 }
 0x15b   :  { %v620_v11 = vmax.f32 %v530_v6, 0.0 }
 0x15d   :  { %v683_v16 = vadd.f32 %v682_v13, %v620_v11 }
 0x15e   :  { %v533_v9 = vpop.xlane.xlu1 %532 }
 0x15f   :  { %v621_v14 = vmax.f32 %v533_v9, 0.0 }
 0x161   :  { %v684_v19 = vadd.f32 %v683_v16, %v621_v14 }
 0x162   :  { %v536_v12 = vpop.xlane.xlu0 %535 }
 0x163   :  { %v622_v17 = vmax.f32 %v536_v12, 0.0 }
 0x165   :  { %v685_v22 = vadd.f32 %v684_v19, %v622_v17 }
 0x166   :  { %v539_v15 = vpop.xlane.xlu1 %538 }
 0x167   :  { %v623_v20 = vmax.f32 %v539_v15, 0.0 }
 0x169   :  { %v686_v24 = vadd.f32 %v685_v22, %v623_v20 }
 0x16a   :  { %v542_v18 = vpop.xlane.xlu0 %541 }
 0x16b   :  { %v624_v23 = vmax.f32 %v542_v18, 0.0 }
 0x16d   :  { %v687_v27 = vadd.f32 %v686_v24, %v624_v23 }
 0x16e   :  { %v545_v21 = vpop.xlane.xlu1 %544 }
 0x16f   :  { %v625_v25 = vmax.f32 %v545_v21, 0.0 }
 0x171   :  { %v688_v30 = vadd.f32 %v687_v27, %v625_v25 }
 0x172   :  { %v548_v3 = vpop.xlane.xlu0 %547 }
 0x173   :  { %v626_v28 = vmax.f32 %v548_v3, 0.0 }
 0x175   :  { %v689_v33 = vadd.f32 %v688_v30, %v626_v28 }
 0x176   :  { %v551_v26 = vpop.xlane.xlu1 %550 }
 0x177   :  { %v627_v31 = vmax.f32 %v551_v26, 0.0 }
 0x179   :  { %v690_v36 = vadd.f32 %v689_v33, %v627_v31 }
 0x17a   :  { %v554_v29 = vpop.xlane.xlu0 %553 }
 0x17b   :  { %v628_v34 = vmax.f32 %v554_v29, 0.0 }
 0x17d   :  { %v691_v41 = vadd.f32 %v690_v36, %v628_v34 }
 0x17e   :  { %v557_v32 = vpop.xlane.xlu1 %556 }
 0x17f   :  { %v629_v38 = vmax.f32 %v557_v32, 0.0 }
 0x181   :  { %v692_v44 = vadd.f32 %v691_v41, %v629_v38 }
 0x182   :  { %v560_v35 = vpop.xlane.xlu0 %559 }
 0x183   :  { %v630_v43 = vmax.f32 %v560_v35, 0.0 }
 0x185   :  { %v693_v49 = vadd.f32 %v692_v44, %v630_v43  ;;  %v725_v43 = vld [vmem:[#allocation2] sm:$0x1] }
 0x186   :  { %v563_v39 = vpop.xlane.xlu1 %562 }
 0x187   :  { %v631_v46 = vmax.f32 %v563_v39, 0.0 }
 0x189   :  { %v694_v53 = vadd.f32 %v693_v49, %v631_v46 }
 0x18a   :  { %v566_v48 = vpop.xlane.xlu0 %565 }
 0x18b   :  { %v632_v51 = vmax.f32 %v566_v48, 0.0 }
 0x18d   :  { %v695_v58 = vadd.f32 %v694_v53, %v632_v51 }
 0x18e   :  { %v572_v54 = vpop.xlane.xlu0 %571  ;;  %v569_v56 = vpop.xlane.xlu1 %568 }
 0x18f   :  { %v633_v59 = vmax.f32 %v569_v56, 0.0  ;;  %v634_v37 = vmax.f32 %v572_v54, 0.0 }
 0x191   :  { %v696_v40 = vadd.f32 %v695_v58, %v633_v59 }
 0x192   :  { %v578_v42 = vpop.xlane.xlu0 %577  ;;  %v575_v45 = vpop.xlane.xlu1 %574 }
 0x193   :  { %v697_v47 = vadd.f32 %v696_v40, %v634_v37  ;;  %v635_v50 = vmax.f32 %v575_v45, 0.0  ;;  %v636_v52 = vmax.f32 %v578_v42, 0.0 }
 0x195   :  { %v698_v55 = vadd.f32 %v697_v47, %v635_v50 }
 0x196   :  { %v584_v57 = vpop.xlane.xlu0 %583  ;;  %v581_v60 = vpop.xlane.xlu1 %580 }
 0x197   :  { %v699_v61 = vadd.f32 %v698_v55, %v636_v52  ;;  %v637_v62 = vmax.f32 %v581_v60, 0.0  ;;  %v638_v63 = vmax.f32 %v584_v57, 0.0 }
 0x199   :  { %v700_v0 = vadd.f32 %v699_v61, %v637_v62 }
 0x19a   :  { %v590_v1 = vpop.xlane.xlu0 %589  ;;  %v587_v2 = vpop.xlane.xlu1 %586 }
 0x19b   :  { %v701_v4 = vadd.f32 %v700_v0, %v638_v63  ;;  %v639_v5 = vmax.f32 %v587_v2, 0.0  ;;  %v640_v6 = vmax.f32 %v590_v1, 0.0 }
 0x19d   :  { %v702_v7 = vadd.f32 %v701_v4, %v639_v5 }
 0x19e   :  { %v596_v8 = vpop.xlane.xlu0 %595  ;;  %v593_v9 = vpop.xlane.xlu1 %592 }
 0x19f   :  { %v703_v10 = vadd.f32 %v702_v7, %v640_v6  ;;  %v641_v11 = vmax.f32 %v593_v9, 0.0  ;;  %v642_v12 = vmax.f32 %v596_v8, 0.0 }
 0x1a1   :  { %v704_v13 = vadd.f32 %v703_v10, %v641_v11 }
 0x1a2   :  { %v602_v14 = vpop.xlane.xlu0 %601  ;;  %v599_v15 = vpop.xlane.xlu1 %598 }
 0x1a3   :  { %v705_v16 = vadd.f32 %v704_v13, %v642_v12  ;;  %v643_v17 = vmax.f32 %v599_v15, 0.0  ;;  %v644_v18 = vmax.f32 %v602_v14, 0.0 }
 0x1a5   :  { %v706_v19 = vadd.f32 %v705_v16, %v643_v17 }
 0x1a6   :  { %v608_v20 = vpop.xlane.xlu0 %607  ;;  %v605_v21 = vpop.xlane.xlu1 %604 }
 0x1a7   :  { %v707_v22 = vadd.f32 %v706_v19, %v644_v18  ;;  %v645_v23 = vmax.f32 %v605_v21, 0.0  ;;  %v646_v3 = vmax.f32 %v608_v20, 0.0 }
 0x1a9   :  { %v708_v24 = vadd.f32 %v707_v22, %v645_v23 }
 0x1aa   :  { %v614_v25 = vpop.xlane.xlu0 %613  ;;  %v611_v26 = vpop.xlane.xlu1 %610 }
 0x1ab   :  { %v709_v27 = vadd.f32 %v708_v24, %v646_v3  ;;  %v647_v28 = vmax.f32 %v611_v26, 0.0  ;;  %v648_v29 = vmax.f32 %v614_v25, 0.0 }
 0x1ad   :  { %v710_v30 = vadd.f32 %v709_v27, %v647_v28 }
 0x1ae   :  { %v617_v31 = vpop.xlane.xlu1 %616 }
 0x1af   :  { %v711_v32 = vadd.f32 %v710_v30, %v648_v29  ;;  %v649_v33 = vmax.f32 %v617_v31, 0.0 }
 0x1b1   :  { %v712_v34 = vadd.f32 %v711_v32, %v649_v33 }
 0x1b3   :  { %v713_v35 = vrot.slane %v712_v34, 4 }
 0x1b5   :  { %v714_v36 = vadd.f32 %v713_v35, %v712_v34 }
 0x1b7   :  { %v715_v38 = vrot.slane %v714_v36, 2 }
 0x1b9   :  { %v716_v39 = vadd.f32 %v715_v38, %v714_v36 }
 0x1bb   :  { %v717_v41 = vrot.slane %v716_v39, 1 }
 0x1bd   :  { %v718_v44 = vadd.f32 %v717_v41, %v716_v39 }
 0x1bf   :  { %v726_v46 = vadd.f32 %v725_v43, %v718_v44 }
 0x1c1   :  { %728 = vst.msk [vmem:[#allocation2] sm:$0x1] %vm723_vm1, %v726_v46 }
 0x1c2   :  { %796 = shalt.err (!%p793_p4)
}
 0x1c3   :  { %738 = dma.vmem_to_hbm [thread:$0]  %s736_s18, 16, %s1046_s2, [#allocation3]  }
 0x1c4   :  { %805 = dma.done.wait [#allocation3], 16  }
 0x1c5   :  { %806 = vsyncadd [#allocation3], 4294967280 }
 0x1c6   :  { %742 = vsyncpa [#allocation3], 1 }

</bundles_post_ra>
